<compile_context>
chip_gen: v6e
topology: v6e:2x2x1
jax: 0.10.0
libtpu: 0.0.40
codegen_flags: <defaults>
</compile_context>

<pallas_src>
import jax
import jax.numpy as jnp
from jax.experimental import pallas as pl
from jax.experimental.pallas import tpu as pltpu

# ----------------------- small, self-consistent config -----------------------
IMG = 64              # img_size (must be divisible by 32)
IN_CH = 3             # in_channels
EMB = 64              # embedding_dim
HEADS = 4             # num_heads
HEAD_DIM = EMB // HEADS
MLP = 128             # mlp_size
LAYERS = 2            # num_transformer_layers
CLASSES = 10          # num_classes
BACKBONE_CH = 960     # MobileNetV3-Large feature channels
BACKBONE_CH_PAD = 1024  # padded to a multiple of 128 (zero-padded weights)
STRIDE = 32           # backbone total stride
GRID_HW = IMG // STRIDE
NUM_PATCHES = GRID_HW * GRID_HW          # (img_size // 32) ** 2
SEQ = NUM_PATCHES + 1                    # + class token
PATCH_K = IN_CH * STRIDE * STRIDE        # 3072
TK = 1024             # K tile for the backbone matmul grid (3 pipelined steps)
EPS = 1e-6            # nn.LayerNorm(..., eps=1e-06)
INV_SQRT2 = 0.7071067811865476
NEG_INF = -1e30

# ------------------------- packed-slab layout constants -----------------------
# per-layer weight slab (EMB, 512) columns: [ wqkv | wo | w1 | w2^T ]
W_QKV0, W_QKV1 = 0, 3 * EMB
W_WO0, W_WO1 = W_QKV1, W_QKV1 + EMB
W_W10, W_W11 = W_WO1, W_WO1 + MLP
W_W2T0, W_W2T1 = W_W11, W_W11 + MLP
W_SLAB_W = W_W2T1                        # 512
# per-layer vector slab (8, 3*EMB) rows
V_W = 3 * EMB
R_LN1G, R_LN1B, R_LN2G, R_LN2B, R_BO, R_B2, R_B1, R_BQKV = range(8)
# misc slab (8 + EMB, EMB) rows: proj bias, classifier LN, head bias, head weight
M_PROJB, M_CLSG, M_CLSB, M_HEADB = 0, 1, 2, 3
M_HEADW0 = 8
MISC_ROWS = 8 + EMB


# ----------------------------- in-kernel helpers -----------------------------
def _erf_f32(x):
  """Single-precision erf (Eigen/XLA rational approximation, ~few-ULP accurate)."""
  x = jnp.clip(x, -3.925724883079508, 3.925724883079508)
  x2 = x * x
  a = x2 * (-2.72614225801306e-10) + 2.77068142495902e-08
  a = a * x2 + (-2.10102402082508e-06)
  a = a * x2 + (-5.69250639462346e-05)
  a = a * x2 + (-7.34990630326855e-04)
  a = a * x2 + (-2.95459980854025e-03)
  a = a * x2 + (-1.60960333262415e-02)
  a = a * x
  b = x2 * (-1.45660718464996e-05) + (-2.13374055278905e-04)
  b = b * x2 + (-1.68282697438203e-03)
  b = b * x2 + (-7.37332916720468e-03)
  b = b * x2 + (-1.42647390514189e-02)
  return a / b


def _gelu_exact(x):
  # exact (erf-based) GELU, matching torch.nn.GELU(approximate='none')
  return 0.5 * x * (1.0 + _erf_f32(x * INV_SQRT2))


def _layernorm(x, gamma, beta):
  mu = jnp.mean(x, axis=-1, keepdims=True)
  var = jnp.mean((x - mu) ** 2, axis=-1, keepdims=True)
  return (x - mu) / jnp.sqrt(var + EPS) * gamma + beta


# ------------------------------ the fused kernel ------------------------------
def _make_vit_kernel(batch):
  scale = 1.0 / float(HEAD_DIM) ** 0.5

  def kernel(xp_ref, wb_ref, wp_ref, base_ref, mask_ref, wslab_ref, vslab_ref,
             misc_ref, o_ref, acc_ref, x_scr):
    k_step = pl.program_id(0)

    # ---- backbone stand-in (stride-32 conv as K-tiled matmul), f32 accumulation ----
    @pl.when(k_step == 0)
    def _init():
      acc_ref[...] = jnp.zeros_like(acc_ref)

    acc_ref[...] += jnp.dot(xp_ref[...], wb_ref[...],
                            preferred_element_type=jnp.float32)

    # ---- everything else only on the last K step (accumulator is complete) ----
    @pl.when(k_step == pl.num_programs(0) - 1)
    def _tail():
      misc = misc_ref[...]
      proj_b = misc[M_PROJB:M_PROJB + 1, :EMB]

      # fused 1x1 projection conv: (B*P, 1024) -> (B*P, EMB), no HBM round trip
      feats = (jnp.dot(acc_ref[...].astype(jnp.bfloat16), wp_ref[...],
                       preferred_element_type=jnp.float32) + proj_b)

      # class-token + position-embedding base is pre-tiled on the host to
      # (B*SEQ, EMB); CLS rows come straight from it, patch rows add feats.
      x_scr[...] = base_ref[...]
      for b in range(batch):                                   # static unroll
        r0 = b * SEQ + 1
        x_scr[r0:r0 + NUM_PATCHES, :] = (
            base_ref[r0:r0 + NUM_PATCHES, :]
            + feats[b * NUM_PATCHES:(b + 1) * NUM_PATCHES, :])
      x = x_scr[...]                                           # (B*SEQ, EMB)

      # block-diagonal additive mask (precomputed on host): attention never
      # crosses batch boundaries even though all rows share one score matmul.
      neg_mask = mask_ref[...]

      for layer in range(LAYERS):                              # static unroll
        W = wslab_ref[layer]                                   # (EMB, 512)
        V = vslab_ref[layer]                                   # (8, 192)
        ln1_g = V[R_LN1G:R_LN1G + 1, :EMB]
        ln1_b = V[R_LN1B:R_LN1B + 1, :EMB]
        ln2_g = V[R_LN2G:R_LN2G + 1, :EMB]
        ln2_b = V[R_LN2B:R_LN2B + 1, :EMB]
        bo = V[R_BO:R_BO + 1, :EMB]
        b2 = V[R_B2:R_B2 + 1, :EMB]
        b1 = V[R_B1:R_B1 + 1, :MLP]
        bqkv = V[R_BQKV:R_BQKV + 1, :3 * EMB]
        wqkv = W[:, W_QKV0:W_QKV1]                             # (EMB, 3*EMB)
        wo = W[:, W_WO0:W_WO1]                                 # (EMB, EMB)
        w1 = W[:, W_W10:W_W11]                                 # (EMB, MLP)
        w2t = W[:, W_W2T0:W_W2T1]                              # (EMB, MLP) = w2^T

        # ---- LayerNorm 1 + multi-head self-attention + residual ----
        xn = _layernorm(x, ln1_g, ln1_b)
        qkv = jnp.dot(xn, wqkv, preferred_element_type=jnp.float32) + bqkv
        q = qkv[:, 0 * EMB:1 * EMB] * scale
        kmat = qkv[:, 1 * EMB:2 * EMB]
        v = qkv[:, 2 * EMB:3 * EMB]
        ohs = []
        for h in range(HEADS):                                 # static unroll
          sl = slice(h * HEAD_DIM, (h + 1) * HEAD_DIM)
          s = jax.lax.dot_general(q[:, sl], kmat[:, sl],
                                  (((1,), (1,)), ((), ())),
                                  preferred_element_type=jnp.float32)
          s = s + neg_mask                                     # (B*SEQ, B*SEQ)
          s = s - jnp.max(s, axis=-1, keepdims=True)
          p = jnp.exp(s)
          p = p / jnp.sum(p, axis=-1, keepdims=True)
          ohs.append(jnp.dot(p, v[:, sl], preferred_element_type=jnp.float32))
        # concat-of-heads @ Wo in a single K=EMB matmul (was 4 K=16 matmuls)
        attn = jnp.dot(jnp.concatenate(ohs, axis=-1), wo,
                       preferred_element_type=jnp.float32) + bo
        x = x + attn

        # ---- LayerNorm 2 + MLP (Linear -> GELU -> Linear) + residual ----
        xn2 = _layernorm(x, ln2_g, ln2_b)
        hmid = jnp.dot(xn2, w1, preferred_element_type=jnp.float32) + b1
        hmid = _gelu_exact(hmid)
        h2 = jax.lax.dot_general(hmid, w2t, (((1,), (1,)), ((), ())),
                                 preferred_element_type=jnp.float32) + b2
        x = x + h2

      # ---- classifier head (LayerNorm + Linear); LN is per-row, so computing on
      # all rows and selecting the CLS rows is exact ----
      cls_g = misc[M_CLSG:M_CLSG + 1, :EMB]
      cls_b = misc[M_CLSB:M_CLSB + 1, :EMB]
      head_b = misc[M_HEADB:M_HEADB + 1, :CLASSES]
      head_w = misc[M_HEADW0:M_HEADW0 + EMB, :CLASSES]
      xn_cls = _layernorm(x, cls_g, cls_b)
      logits = (jnp.dot(xn_cls, head_w, preferred_element_type=jnp.float32)
                + head_b)                                      # (B*SEQ, CLASSES)
      for b in range(batch):
        o_ref[b:b + 1, :] = logits[b * SEQ:b * SEQ + 1, :]

  return kernel


def vit_pallas(x_patches, backbone_w, proj_w, base, mask, wslab, vslab, misc,
               *, batch):
  assert PATCH_K % TK == 0
  bp_rows = batch * NUM_PATCHES
  tok = batch * SEQ
  return pl.pallas_call(
      _make_vit_kernel(batch),
      out_shape=jax.ShapeDtypeStruct((batch, CLASSES), jnp.float32),
      grid_spec=pltpu.PrefetchScalarGridSpec(
          num_scalar_prefetch=0,
          grid=(PATCH_K // TK,),
          in_specs=[
              pl.BlockSpec((bp_rows, TK), lambda k: (0, k)),          # activations
              pl.BlockSpec((TK, BACKBONE_CH_PAD), lambda k: (k, 0)),  # backbone W
              pl.BlockSpec((BACKBONE_CH_PAD, EMB), lambda k: (0, 0)),  # 1x1 proj W
              pl.BlockSpec((tok, EMB), lambda k: (0, 0)),             # cls/pos base
              pl.BlockSpec((tok, tok), lambda k: (0, 0)),             # block-diag mask
              pl.BlockSpec((LAYERS, EMB, W_SLAB_W), lambda k: (0, 0, 0)),
              pl.BlockSpec((LAYERS, 8, V_W), lambda k: (0, 0, 0)),
              pl.BlockSpec((MISC_ROWS, EMB), lambda k: (0, 0)),
          ],
          out_specs=pl.BlockSpec((batch, CLASSES), lambda k: (0, 0)),
          scratch_shapes=[
              pltpu.VMEM((bp_rows, BACKBONE_CH_PAD), jnp.float32),  # backbone acc
              pltpu.VMEM((tok, EMB), jnp.float32),                  # token assembly
          ],
      ),
      compiler_params=pltpu.CompilerParams(
          dimension_semantics=("arbitrary",),
          vmem_limit_bytes=32 * 1024 * 1024),
  )(x_patches, backbone_w, proj_w, base, mask, wslab, vslab, misc)


# ------------------------------ parameter init --------------------------------
def init_params(key):
  ks = jax.random.split(key, 6)

  def nrm(k, shape, scale=0.02):
    return scale * jax.random.normal(k, shape, jnp.float32)

  params = {
      # backbone stand-in: stride-32 conv, weight flattened to (C*32*32, 960).
      "backbone_w": nrm(ks[0], (PATCH_K, BACKBONE_CH)),
      # self.projection = nn.Conv2d(960, embedding_dim, kernel_size=1)
      "proj_w": nrm(ks[1], (BACKBONE_CH, EMB)),
      "proj_b": jnp.zeros((EMB,), jnp.float32),
      "cls_tok": jax.random.normal(ks[2], (1, EMB), jnp.float32),
      "pos_emb": jax.random.normal(ks[3], (SEQ, EMB), jnp.float32),
      "layers": [],
      "cls_gamma": jnp.ones((EMB,), jnp.float32),
      "cls_beta": jnp.zeros((EMB,), jnp.float32),
      "head_w": nrm(ks[4], (EMB, CLASSES)),
      "head_b": jnp.zeros((CLASSES,), jnp.float32),
  }
  for lk in jax.random.split(ks[5], LAYERS):
    w = jax.random.split(lk, 4)
    params["layers"].append(dict(
        ln1_g=jnp.ones((EMB,), jnp.float32),
        ln1_b=jnp.zeros((EMB,), jnp.float32),
        wqkv=nrm(w[0], (EMB, 3 * EMB)),          # in_proj (q|k|v)
        bqkv=jnp.zeros((3 * EMB,), jnp.float32),
        wo=nrm(w[1], (EMB, EMB)),                # out_proj
        bo=jnp.zeros((EMB,), jnp.float32),
        ln2_g=jnp.ones((EMB,), jnp.float32),
        ln2_b=jnp.zeros((EMB,), jnp.float32),
        w1=nrm(w[2], (EMB, MLP)),                # mlp fc1
        b1=jnp.zeros((MLP,), jnp.float32),
        w2=nrm(w[3], (MLP, EMB)),                # mlp fc2
        b2=jnp.zeros((EMB,), jnp.float32),
    ))
  return params


def pack_params(params):
  """Host-side packing of the many small params into a few DMA-friendly slabs."""
  wb = jnp.pad(params["backbone_w"],
               ((0, 0), (0, BACKBONE_CH_PAD - BACKBONE_CH)))
  wp = jnp.pad(params["proj_w"],
               ((0, BACKBONE_CH_PAD - BACKBONE_CH), (0, 0)))

  w_rows, v_rows = [], []
  for lp in params["layers"]:
    w_rows.append(jnp.concatenate(
        [lp["wqkv"], lp["wo"], lp["w1"], lp["w2"].T], axis=1))  # (EMB, 512)
    v = jnp.zeros((8, V_W), jnp.float32)
    v = v.at[R_LN1G, :EMB].set(lp["ln1_g"])
    v = v.at[R_LN1B, :EMB].set(lp["ln1_b"])
    v = v.at[R_LN2G, :EMB].set(lp["ln2_g"])
    v = v.at[R_LN2B, :EMB].set(lp["ln2_b"])
    v = v.at[R_BO, :EMB].set(lp["bo"])
    v = v.at[R_B2, :EMB].set(lp["b2"])
    v = v.at[R_B1, :MLP].set(lp["b1"])
    v = v.at[R_BQKV, :3 * EMB].set(lp["bqkv"])
    v_rows.append(v)

  misc = jnp.zeros((MISC_ROWS, EMB), jnp.float32)
  misc = misc.at[M_PROJB, :EMB].set(params["proj_b"])
  misc = misc.at[M_CLSG, :EMB].set(params["cls_gamma"])
  misc = misc.at[M_CLSB, :EMB].set(params["cls_beta"])
  misc = misc.at[M_HEADB, :CLASSES].set(params["head_b"])
  misc = misc.at[M_HEADW0:M_HEADW0 + EMB, :CLASSES].set(params["head_w"])

  # per-image cls+pos base: row 0 = cls + pos[0], rows 1.. = pos[1:]
  per_img = jnp.concatenate(
      [params["cls_tok"] + params["pos_emb"][0:1, :], params["pos_emb"][1:, :]],
      axis=0)                                                   # (SEQ, EMB)

  return {
      "backbone_w": wb.astype(jnp.bfloat16),
      "proj_w": wp.astype(jnp.bfloat16),
      "wslab": jnp.stack(w_rows),      # (LAYERS, EMB, 512)
      "vslab": jnp.stack(v_rows),      # (LAYERS, 8, 192)
      "misc": misc,                    # (72, 64)
      "per_img": per_img,              # (SEQ, EMB)
  }


# --------------------------------- forward ------------------------------------
def vit_forward(pixel_values, packed):
  b = pixel_values.shape[0]

  # NCHW -> (B*P, C*32*32): non-overlapping 32x32 patch extraction, cast to bf16
  # so the kernel's activation DMA is half-width.
  # TODO(synk): this 6D relayout stays as tiny XLA glue; folding it into the kernel
  # via an index_map is not a safe Mosaic lowering at this shape.
  x = pixel_values.reshape(b, IN_CH, GRID_HW, STRIDE, GRID_HW, STRIDE)
  x = x.transpose(0, 2, 4, 1, 3, 5).reshape(b * NUM_PATCHES, PATCH_K)
  x = x.astype(jnp.bfloat16)

  # cls/pos base tiled to (B*SEQ, EMB) and block-diagonal mask, built outside the
  # kernel (trivial one-time work, removes all in-kernel mask construction).
  base = jnp.tile(packed["per_img"], (b, 1))
  blk = jnp.repeat(jnp.arange(b, dtype=jnp.int32), SEQ)
  mask = jnp.where(blk[:, None] == blk[None, :], 0.0, NEG_INF).astype(jnp.float32)

  # embedding dropout / attn dropout / mlp dropout are p=0.0 -> identity.
  return vit_pallas(x, packed["backbone_w"], packed["proj_w"], base, mask,
                    packed["wslab"], packed["vslab"], packed["misc"], batch=b)


# ----------------------------------- main --------------------------------------
if __name__ == "__main__":
  key = jax.random.PRNGKey(0)
  k_x, k_p = jax.random.split(key)
  pixel_values = jax.random.normal(k_x, (2, IN_CH, IMG, IMG), jnp.float32)
  packed = pack_params(init_params(k_p))

  fwd = jax.jit(vit_forward)
  logits = fwd(pixel_values, packed)
  jax.block_until_ready(logits)

  assert logits.shape == (2, CLASSES), logits.shape
  assert logits.dtype == jnp.float32
  assert bool(jnp.all(jnp.isfinite(logits)))
  print("KERNEL_OK")
</pallas_src>

<mosaic_0001>
module attributes {stable_mosaic.version = 11 : i64} {
  func.func @kernel(%arg0: i32, %arg1: memref<8x1024xbf16, #tpu.memory_space<vmem>>, %arg2: memref<1024x1024xbf16, #tpu.memory_space<vmem>>, %arg3: memref<1024x64xbf16, #tpu.memory_space<vmem>>, %arg4: memref<10x64xf32, #tpu.memory_space<vmem>>, %arg5: memref<10x10xf32, #tpu.memory_space<vmem>>, %arg6: memref<2x64x512xf32, #tpu.memory_space<vmem>>, %arg7: memref<2x8x192xf32, #tpu.memory_space<vmem>>, %arg8: memref<72x64xf32, #tpu.memory_space<vmem>>, %arg9: memref<2x10xf32, #tpu.memory_space<vmem>>, %arg10: memref<8x1024xf32, #tpu.memory_space<vmem>>, %arg11: memref<10x64xf32, #tpu.memory_space<vmem>>) attributes {dimension_semantics = [#tpu.dimension_semantics<arbitrary>], iteration_bounds = array<i64: 3>, scalar_prefetch = 0 : i64, scratch_operands = 2 : i64, tpu.core_type = #tpu.core_type<tc>, window_params = [{transform_indices = @transform_0, window_bounds = array<i64: 8, 1024>}, {transform_indices = @transform_1, window_bounds = array<i64: 1024, 1024>}, {pipeline_mode = #tpu.pipeline_mode<synchronous>, transform_indices = @transform_2, window_bounds = array<i64: 1024, 64>}, {pipeline_mode = #tpu.pipeline_mode<synchronous>, transform_indices = @transform_3, window_bounds = array<i64: 10, 64>}, {pipeline_mode = #tpu.pipeline_mode<synchronous>, transform_indices = @transform_4, window_bounds = array<i64: 10, 10>}, {pipeline_mode = #tpu.pipeline_mode<synchronous>, transform_indices = @transform_5, window_bounds = array<i64: 2, 64, 512>}, {pipeline_mode = #tpu.pipeline_mode<synchronous>, transform_indices = @transform_6, window_bounds = array<i64: 2, 8, 192>}, {pipeline_mode = #tpu.pipeline_mode<synchronous>, transform_indices = @transform_7, window_bounds = array<i64: 72, 64>}, {pipeline_mode = #tpu.pipeline_mode<synchronous>, transform_indices = @transform_8, window_bounds = array<i64: 2, 10>}]} {
    %c0_i32 = arith.constant 0 : i32
    %0 = arith.cmpi eq, %arg0, %c0_i32 : i32
    %1 = arith.extui %0 : i1 to i32
    %c0_i32_0 = arith.constant 0 : i32
    %2 = arith.cmpi ne, %1, %c0_i32_0 : i32
    scf.if %2 {
      %cst_9 = arith.constant 0.000000e+00 : f32
      %12 = vector.broadcast %cst_9 : f32 to vector<8x1024xf32>
      %c0_10 = arith.constant 0 : index
      %c0_11 = arith.constant 0 : index
      %13 = vector.load %arg10[%c0_10, %c0_11] : memref<8x1024xf32, #tpu.memory_space<vmem>>, vector<8x1024xf32>
      tpu.vector_store %arg10[%c0_10, %c0_11], %12 {strides = array<i32>} : memref<8x1024xf32, #tpu.memory_space<vmem>>, vector<8x1024xf32>,
    } else {
    }
    %c0 = arith.constant 0 : index
    %c0_1 = arith.constant 0 : index
    %3 = vector.load %arg10[%c0, %c0_1] : memref<8x1024xf32, #tpu.memory_space<vmem>>, vector<8x1024xf32>
    %c0_2 = arith.constant 0 : index
    %c0_3 = arith.constant 0 : index
    %4 = vector.load %arg1[%c0_2, %c0_3] : memref<8x1024xbf16, #tpu.memory_space<vmem>>, vector<8x1024xbf16>
    %c0_4 = arith.constant 0 : index
    %c0_5 = arith.constant 0 : index
    %5 = vector.load %arg2[%c0_4, %c0_5] : memref<1024x1024xbf16, #tpu.memory_space<vmem>>, vector<1024x1024xbf16>
    %cst = arith.constant dense<0.000000e+00> : vector<8x1024xf32>
    %6 = tpu.matmul %4, %5, %cst {dimension_numbers = #tpu.dot_dimension_numbers<[1], [0], [0], [1], [0, 0, 1, 1], [], []>} : vector<8x1024xbf16>, vector<1024x1024xbf16>, vector<8x1024xf32> -> vector<8x1024xf32>
    %7 = arith.addf %3, %6 : vector<8x1024xf32>
    %c0_6 = arith.constant 0 : index
    %c0_7 = arith.constant 0 : index
    %8 = vector.load %arg10[%c0_6, %c0_7] : memref<8x1024xf32, #tpu.memory_space<vmem>>, vector<8x1024xf32>
    tpu.vector_store %arg10[%c0_6, %c0_7], %7 {strides = array<i32>} : memref<8x1024xf32, #tpu.memory_space<vmem>>, vector<8x1024xf32>,
    %c2_i32 = arith.constant 2 : i32
    %9 = arith.cmpi eq, %arg0, %c2_i32 : i32
    %10 = arith.extui %9 : i1 to i32
    %c0_i32_8 = arith.constant 0 : i32
    %11 = arith.cmpi ne, %10, %c0_i32_8 : i32
    scf.if %11 {
      %c0_9 = arith.constant 0 : index
      %c0_10 = arith.constant 0 : index
      %12 = vector.load %arg8[%c0_9, %c0_10] : memref<72x64xf32, #tpu.memory_space<vmem>>, vector<72x64xf32>
      %13 = vector.extract_strided_slice %12 {offsets = [0, 0], sizes = [1, 64], strides = [1, 1]} : vector<72x64xf32> to vector<1x64xf32>
      %c0_11 = arith.constant 0 : index
      %c0_12 = arith.constant 0 : index
      %14 = vector.load %arg10[%c0_11, %c0_12] : memref<8x1024xf32, #tpu.memory_space<vmem>>, vector<8x1024xf32>
      %15 = arith.truncf %14 : vector<8x1024xf32> to vector<8x1024xbf16>
      %c0_13 = arith.constant 0 : index
      %c0_14 = arith.constant 0 : index
      %16 = vector.load %arg3[%c0_13, %c0_14] : memref<1024x64xbf16, #tpu.memory_space<vmem>>, vector<1024x64xbf16>
      %cst_15 = arith.constant dense<0.000000e+00> : vector<8x64xf32>
      %17 = tpu.matmul %15, %16, %cst_15 {dimension_numbers = #tpu.dot_dimension_numbers<[1], [0], [0], [1], [0, 0, 1, 1], [], []>} : vector<8x1024xbf16>, vector<1024x64xbf16>, vector<8x64xf32> -> vector<8x64xf32>
      %18 = vector.broadcast %13 : vector<1x64xf32> to vector<8x64xf32>
      %19 = arith.addf %17, %18 : vector<8x64xf32>
      %c0_16 = arith.constant 0 : index
      %c0_17 = arith.constant 0 : index
      %20 = vector.load %arg4[%c0_16, %c0_17] : memref<10x64xf32, #tpu.memory_space<vmem>>, vector<10x64xf32>
      %c0_18 = arith.constant 0 : index
      %c0_19 = arith.constant 0 : index
      %21 = vector.load %arg11[%c0_18, %c0_19] : memref<10x64xf32, #tpu.memory_space<vmem>>, vector<10x64xf32>
      tpu.vector_store %arg11[%c0_18, %c0_19], %20 {strides = array<i32>} : memref<10x64xf32, #tpu.memory_space<vmem>>, vector<10x64xf32>,
      %c1 = arith.constant 1 : index
      %c0_20 = arith.constant 0 : index
      %22 = vector.load %arg4[%c1, %c0_20] : memref<10x64xf32, #tpu.memory_space<vmem>>, vector<4x64xf32>
      %23 = vector.extract_strided_slice %19 {offsets = [0, 0], sizes = [4, 64], strides = [1, 1]} : vector<8x64xf32> to vector<4x64xf32>
      %24 = arith.addf %22, %23 : vector<4x64xf32>
      %c1_21 = arith.constant 1 : index
      %c0_22 = arith.constant 0 : index
      %25 = vector.load %arg11[%c1_21, %c0_22] : memref<10x64xf32, #tpu.memory_space<vmem>>, vector<4x64xf32>
      tpu.vector_store %arg11[%c1_21, %c0_22], %24 {strides = array<i32>} : memref<10x64xf32, #tpu.memory_space<vmem>>, vector<4x64xf32>,
      %c6 = arith.constant 6 : index
      %c0_23 = arith.constant 0 : index
      %26 = vector.load %arg4[%c6, %c0_23] : memref<10x64xf32, #tpu.memory_space<vmem>>, vector<4x64xf32>
      %27 = vector.extract_strided_slice %19 {offsets = [4, 0], sizes = [4, 64], strides = [1, 1]} : vector<8x64xf32> to vector<4x64xf32>
      %28 = arith.addf %26, %27 : vector<4x64xf32>
      %c6_24 = arith.constant 6 : index
      %c0_25 = arith.constant 0 : index
      %29 = vector.load %arg11[%c6_24, %c0_25] : memref<10x64xf32, #tpu.memory_space<vmem>>, vector<4x64xf32>
      tpu.vector_store %arg11[%c6_24, %c0_25], %28 {strides = array<i32>} : memref<10x64xf32, #tpu.memory_space<vmem>>, vector<4x64xf32>,
      %c0_26 = arith.constant 0 : index
      %c0_27 = arith.constant 0 : index
      %30 = vector.load %arg11[%c0_26, %c0_27] : memref<10x64xf32, #tpu.memory_space<vmem>>, vector<10x64xf32>
      %c0_28 = arith.constant 0 : index
      %c0_29 = arith.constant 0 : index
      %31 = vector.load %arg5[%c0_28, %c0_29] : memref<10x10xf32, #tpu.memory_space<vmem>>, vector<10x10xf32>
      %c0_30 = arith.constant 0 : index
      %c0_31 = arith.constant 0 : index
      %c0_32 = arith.constant 0 : index
      %32 = vector.load %arg6[%c0_30, %c0_31, %c0_32] : memref<2x64x512xf32, #tpu.memory_space<vmem>>, vector<1x64x512xf32>
      %33 = vector.shape_cast %32 : vector<1x64x512xf32> to vector<64x512xf32>
      %c0_33 = arith.constant 0 : index
      %c0_34 = arith.constant 0 : index
      %c0_35 = arith.constant 0 : index
      %34 = vector.load %arg7[%c0_33, %c0_34, %c0_35] : memref<2x8x192xf32, #tpu.memory_space<vmem>>, vector<1x8x192xf32>
      %35 = vector.shape_cast %34 : vector<1x8x192xf32> to vector<8x192xf32>
      %36 = vector.extract_strided_slice %35 {offsets = [0, 0], sizes = [1, 64], strides = [1, 1]} : vector<8x192xf32> to vector<1x64xf32>
      %37 = vector.extract_strided_slice %35 {offsets = [1, 0], sizes = [1, 64], strides = [1, 1]} : vector<8x192xf32> to vector<1x64xf32>
      %38 = vector.extract_strided_slice %35 {offsets = [2, 0], sizes = [1, 64], strides = [1, 1]} : vector<8x192xf32> to vector<1x64xf32>
      %39 = vector.extract_strided_slice %35 {offsets = [3, 0], sizes = [1, 64], strides = [1, 1]} : vector<8x192xf32> to vector<1x64xf32>
      %40 = vector.extract_strided_slice %35 {offsets = [4, 0], sizes = [1, 64], strides = [1, 1]} : vector<8x192xf32> to vector<1x64xf32>
      %41 = vector.extract_strided_slice %35 {offsets = [5, 0], sizes = [1, 64], strides = [1, 1]} : vector<8x192xf32> to vector<1x64xf32>
      %42 = vector.extract_strided_slice %35 {offsets = [6, 0], sizes = [1, 128], strides = [1, 1]} : vector<8x192xf32> to vector<1x128xf32>
      %43 = vector.extract_strided_slice %35 {offsets = [7, 0], sizes = [1, 192], strides = [1, 1]} : vector<8x192xf32> to vector<1x192xf32>
      %44 = vector.extract_strided_slice %33 {offsets = [0, 0], sizes = [64, 192], strides = [1, 1]} : vector<64x512xf32> to vector<64x192xf32>
      %45 = vector.extract_strided_slice %33 {offsets = [0, 192], sizes = [64, 64], strides = [1, 1]} : vector<64x512xf32> to vector<64x64xf32>
      %46 = vector.extract_strided_slice %33 {offsets = [0, 256], sizes = [64, 128], strides = [1, 1]} : vector<64x512xf32> to vector<64x128xf32>
      %47 = vector.extract_strided_slice %33 {offsets = [0, 384], sizes = [64, 128], strides = [1, 1]} : vector<64x512xf32> to vector<64x128xf32>
      %cst_36 = arith.constant dense<0.000000e+00> : vector<10xf32>
      %48 = vector.multi_reduction <add>, %30, %cst_36 [1] : vector<10x64xf32> to vector<10xf32>
      %49 = vector.shape_cast %48 : vector<10xf32> to vector<10x1xf32>
      %cst_37 = arith.constant 6.400000e+01 : f32
      %50 = vector.broadcast %cst_37 : f32 to vector<10x1xf32>
      %51 = arith.divf %49, %50 : vector<10x1xf32>
      %52 = vector.broadcast %51 : vector<10x1xf32> to vector<10x64xf32>
      %53 = arith.subf %30, %52 : vector<10x64xf32>
      %54 = arith.mulf %53, %53 : vector<10x64xf32>
      %cst_38 = arith.constant dense<0.000000e+00> : vector<10xf32>
      %55 = vector.multi_reduction <add>, %54, %cst_38 [1] : vector<10x64xf32> to vector<10xf32>
      %56 = vector.shape_cast %55 : vector<10xf32> to vector<10x1xf32>
      %cst_39 = arith.constant 6.400000e+01 : f32
      %57 = vector.broadcast %cst_39 : f32 to vector<10x1xf32>
      %58 = arith.divf %56, %57 : vector<10x1xf32>
      %59 = vector.broadcast %51 : vector<10x1xf32> to vector<10x64xf32>
      %60 = arith.subf %30, %59 : vector<10x64xf32>
      %cst_40 = arith.constant 9.99999997E-7 : f32
      %61 = vector.broadcast %cst_40 : f32 to vector<10x1xf32>
      %62 = arith.addf %58, %61 : vector<10x1xf32>
      %63 = math.sqrt %62 : vector<10x1xf32>
      %64 = vector.broadcast %63 : vector<10x1xf32> to vector<10x64xf32>
      %65 = arith.divf %60, %64 : vector<10x64xf32>
      %66 = vector.broadcast %36 : vector<1x64xf32> to vector<10x64xf32>
      %67 = arith.mulf %65, %66 : vector<10x64xf32>
      %68 = vector.broadcast %37 : vector<1x64xf32> to vector<10x64xf32>
      %69 = arith.addf %67, %68 : vector<10x64xf32>
      %cst_41 = arith.constant dense<0.000000e+00> : vector<10x192xf32>
      %70 = tpu.matmul %69, %44, %cst_41 {dimension_numbers = #tpu.dot_dimension_numbers<[1], [0], [0], [1], [0, 0, 1, 1], [], []>} : vector<10x64xf32>, vector<64x192xf32>, vector<10x192xf32> -> vector<10x192xf32>
      %71 = vector.broadcast %43 : vector<1x192xf32> to vector<10x192xf32>
      %72 = arith.addf %70, %71 : vector<10x192xf32>
      %73 = vector.extract_strided_slice %72 {offsets = [0, 0], sizes = [10, 64], strides = [1, 1]} : vector<10x192xf32> to vector<10x64xf32>
      %cst_42 = arith.constant 2.500000e-01 : f32
      %74 = vector.broadcast %cst_42 : f32 to vector<10x64xf32>
      %75 = arith.mulf %73, %74 : vector<10x64xf32>
      %76 = vector.extract_strided_slice %72 {offsets = [0, 64], sizes = [10, 64], strides = [1, 1]} : vector<10x192xf32> to vector<10x64xf32>
      %77 = vector.extract_strided_slice %72 {offsets = [0, 128], sizes = [10, 64], strides = [1, 1]} : vector<10x192xf32> to vector<10x64xf32>
      %78 = vector.extract_strided_slice %75 {offsets = [0, 0], sizes = [10, 16], strides = [1, 1]} : vector<10x64xf32> to vector<10x16xf32>
      %79 = vector.extract_strided_slice %76 {offsets = [0, 0], sizes = [10, 16], strides = [1, 1]} : vector<10x64xf32> to vector<10x16xf32>
      %cst_43 = arith.constant dense<0.000000e+00> : vector<10x10xf32>
      %80 = tpu.matmul %78, %79, %cst_43 {dimension_numbers = #tpu.dot_dimension_numbers<[1], [1], [0], [0], [0, 0, 1, 0], [], []>} : vector<10x16xf32>, vector<10x16xf32>, vector<10x10xf32> -> vector<10x10xf32>
      %81 = arith.addf %80, %31 : vector<10x10xf32>
      %cst_44 = arith.constant dense<0xFF800000> : vector<10xf32>
      %82 = vector.multi_reduction <maximumf>, %81, %cst_44 [1] : vector<10x10xf32> to vector<10xf32>
      %83 = vector.shape_cast %82 : vector<10xf32> to vector<10x1xf32>
      %84 = vector.broadcast %83 : vector<10x1xf32> to vector<10x10xf32>
      %85 = arith.subf %81, %84 : vector<10x10xf32>
      %86 = math.exp %85 : vector<10x10xf32>
      %cst_45 = arith.constant dense<0.000000e+00> : vector<10xf32>
      %87 = vector.multi_reduction <add>, %86, %cst_45 [1] : vector<10x10xf32> to vector<10xf32>
      %88 = vector.shape_cast %87 : vector<10xf32> to vector<10x1xf32>
      %89 = vector.broadcast %88 : vector<10x1xf32> to vector<10x10xf32>
      %90 = arith.divf %86, %89 : vector<10x10xf32>
      %91 = vector.extract_strided_slice %77 {offsets = [0, 0], sizes = [10, 16], strides = [1, 1]} : vector<10x64xf32> to vector<10x16xf32>
      %cst_46 = arith.constant dense<0.000000e+00> : vector<10x16xf32>
      %92 = tpu.matmul %90, %91, %cst_46 {dimension_numbers = #tpu.dot_dimension_numbers<[1], [0], [0], [1], [0, 0, 1, 1], [], []>} : vector<10x10xf32>, vector<10x16xf32>, vector<10x16xf32> -> vector<10x16xf32>
      %93 = vector.extract_strided_slice %75 {offsets = [0, 16], sizes = [10, 16], strides = [1, 1]} : vector<10x64xf32> to vector<10x16xf32>
      %94 = vector.extract_strided_slice %76 {offsets = [0, 16], sizes = [10, 16], strides = [1, 1]} : vector<10x64xf32> to vector<10x16xf32>
      %cst_47 = arith.constant dense<0.000000e+00> : vector<10x10xf32>
      %95 = tpu.matmul %93, %94, %cst_47 {dimension_numbers = #tpu.dot_dimension_numbers<[1], [1], [0], [0], [0, 0, 1, 0], [], []>} : vector<10x16xf32>, vector<10x16xf32>, vector<10x10xf32> -> vector<10x10xf32>
      %96 = arith.addf %95, %31 : vector<10x10xf32>
      %cst_48 = arith.constant dense<0xFF800000> : vector<10xf32>
      %97 = vector.multi_reduction <maximumf>, %96, %cst_48 [1] : vector<10x10xf32> to vector<10xf32>
      %98 = vector.shape_cast %97 : vector<10xf32> to vector<10x1xf32>
      %99 = vector.broadcast %98 : vector<10x1xf32> to vector<10x10xf32>
      %100 = arith.subf %96, %99 : vector<10x10xf32>
      %101 = math.exp %100 : vector<10x10xf32>
      %cst_49 = arith.constant dense<0.000000e+00> : vector<10xf32>
      %102 = vector.multi_reduction <add>, %101, %cst_49 [1] : vector<10x10xf32> to vector<10xf32>
      %103 = vector.shape_cast %102 : vector<10xf32> to vector<10x1xf32>
      %104 = vector.broadcast %103 : vector<10x1xf32> to vector<10x10xf32>
      %105 = arith.divf %101, %104 : vector<10x10xf32>
      %106 = vector.extract_strided_slice %77 {offsets = [0, 16], sizes = [10, 16], strides = [1, 1]} : vector<10x64xf32> to vector<10x16xf32>
      %cst_50 = arith.constant dense<0.000000e+00> : vector<10x16xf32>
      %107 = tpu.matmul %105, %106, %cst_50 {dimension_numbers = #tpu.dot_dimension_numbers<[1], [0], [0], [1], [0, 0, 1, 1], [], []>} : vector<10x10xf32>, vector<10x16xf32>, vector<10x16xf32> -> vector<10x16xf32>
      %108 = vector.extract_strided_slice %75 {offsets = [0, 32], sizes = [10, 16], strides = [1, 1]} : vector<10x64xf32> to vector<10x16xf32>
      %109 = vector.extract_strided_slice %76 {offsets = [0, 32], sizes = [10, 16], strides = [1, 1]} : vector<10x64xf32> to vector<10x16xf32>
      %cst_51 = arith.constant dense<0.000000e+00> : vector<10x10xf32>
      %110 = tpu.matmul %108, %109, %cst_51 {dimension_numbers = #tpu.dot_dimension_numbers<[1], [1], [0], [0], [0, 0, 1, 0], [], []>} : vector<10x16xf32>, vector<10x16xf32>, vector<10x10xf32> -> vector<10x10xf32>
      %111 = arith.addf %110, %31 : vector<10x10xf32>
      %cst_52 = arith.constant dense<0xFF800000> : vector<10xf32>
      %112 = vector.multi_reduction <maximumf>, %111, %cst_52 [1] : vector<10x10xf32> to vector<10xf32>
      %113 = vector.shape_cast %112 : vector<10xf32> to vector<10x1xf32>
      %114 = vector.broadcast %113 : vector<10x1xf32> to vector<10x10xf32>
      %115 = arith.subf %111, %114 : vector<10x10xf32>
      %116 = math.exp %115 : vector<10x10xf32>
      %cst_53 = arith.constant dense<0.000000e+00> : vector<10xf32>
      %117 = vector.multi_reduction <add>, %116, %cst_53 [1] : vector<10x10xf32> to vector<10xf32>
      %118 = vector.shape_cast %117 : vector<10xf32> to vector<10x1xf32>
      %119 = vector.broadcast %118 : vector<10x1xf32> to vector<10x10xf32>
      %120 = arith.divf %116, %119 : vector<10x10xf32>
      %121 = vector.extract_strided_slice %77 {offsets = [0, 32], sizes = [10, 16], strides = [1, 1]} : vector<10x64xf32> to vector<10x16xf32>
      %cst_54 = arith.constant dense<0.000000e+00> : vector<10x16xf32>
      %122 = tpu.matmul %120, %121, %cst_54 {dimension_numbers = #tpu.dot_dimension_numbers<[1], [0], [0], [1], [0, 0, 1, 1], [], []>} : vector<10x10xf32>, vector<10x16xf32>, vector<10x16xf32> -> vector<10x16xf32>
      %123 = vector.extract_strided_slice %75 {offsets = [0, 48], sizes = [10, 16], strides = [1, 1]} : vector<10x64xf32> to vector<10x16xf32>
      %124 = vector.extract_strided_slice %76 {offsets = [0, 48], sizes = [10, 16], strides = [1, 1]} : vector<10x64xf32> to vector<10x16xf32>
      %cst_55 = arith.constant dense<0.000000e+00> : vector<10x10xf32>
      %125 = tpu.matmul %123, %124, %cst_55 {dimension_numbers = #tpu.dot_dimension_numbers<[1], [1], [0], [0], [0, 0, 1, 0], [], []>} : vector<10x16xf32>, vector<10x16xf32>, vector<10x10xf32> -> vector<10x10xf32>
      %126 = arith.addf %125, %31 : vector<10x10xf32>
      %cst_56 = arith.constant dense<0xFF800000> : vector<10xf32>
      %127 = vector.multi_reduction <maximumf>, %126, %cst_56 [1] : vector<10x10xf32> to vector<10xf32>
      %128 = vector.shape_cast %127 : vector<10xf32> to vector<10x1xf32>
      %129 = vector.broadcast %128 : vector<10x1xf32> to vector<10x10xf32>
      %130 = arith.subf %126, %129 : vector<10x10xf32>
      %131 = math.exp %130 : vector<10x10xf32>
      %cst_57 = arith.constant dense<0.000000e+00> : vector<10xf32>
      %132 = vector.multi_reduction <add>, %131, %cst_57 [1] : vector<10x10xf32> to vector<10xf32>
      %133 = vector.shape_cast %132 : vector<10xf32> to vector<10x1xf32>
      %134 = vector.broadcast %133 : vector<10x1xf32> to vector<10x10xf32>
      %135 = arith.divf %131, %134 : vector<10x10xf32>
      %136 = vector.extract_strided_slice %77 {offsets = [0, 48], sizes = [10, 16], strides = [1, 1]} : vector<10x64xf32> to vector<10x16xf32>
      %cst_58 = arith.constant dense<0.000000e+00> : vector<10x16xf32>
      %137 = tpu.matmul %135, %136, %cst_58 {dimension_numbers = #tpu.dot_dimension_numbers<[1], [0], [0], [1], [0, 0, 1, 1], [], []>} : vector<10x10xf32>, vector<10x16xf32>, vector<10x16xf32> -> vector<10x16xf32>
      %138 = tpu.concatenate %92, %107, %122, %137 in 1 : vector<10x16xf32>, vector<10x16xf32>, vector<10x16xf32>, vector<10x16xf32> -> vector<10x64xf32>
      %cst_59 = arith.constant dense<0.000000e+00> : vector<10x64xf32>
      %139 = tpu.matmul %138, %45, %cst_59 {dimension_numbers = #tpu.dot_dimension_numbers<[1], [0], [0], [1], [0, 0, 1, 1], [], []>} : vector<10x64xf32>, vector<64x64xf32>, vector<10x64xf32> -> vector<10x64xf32>
      %140 = vector.broadcast %40 : vector<1x64xf32> to vector<10x64xf32>
      %141 = arith.addf %139, %140 : vector<10x64xf32>
      %142 = arith.addf %30, %141 : vector<10x64xf32>
      %cst_60 = arith.constant dense<0.000000e+00> : vector<10xf32>
      %143 = vector.multi_reduction <add>, %142, %cst_60 [1] : vector<10x64xf32> to vector<10xf32>
      %144 = vector.shape_cast %143 : vector<10xf32> to vector<10x1xf32>
      %cst_61 = arith.constant 6.400000e+01 : f32
      %145 = vector.broadcast %cst_61 : f32 to vector<10x1xf32>
      %146 = arith.divf %144, %145 : vector<10x1xf32>
      %147 = vector.broadcast %146 : vector<10x1xf32> to vector<10x64xf32>
      %148 = arith.subf %142, %147 : vector<10x64xf32>
      %149 = arith.mulf %148, %148 : vector<10x64xf32>
      %cst_62 = arith.constant dense<0.000000e+00> : vector<10xf32>
      %150 = vector.multi_reduction <add>, %149, %cst_62 [1] : vector<10x64xf32> to vector<10xf32>
      %151 = vector.shape_cast %150 : vector<10xf32> to vector<10x1xf32>
      %cst_63 = arith.constant 6.400000e+01 : f32
      %152 = vector.broadcast %cst_63 : f32 to vector<10x1xf32>
      %153 = arith.divf %151, %152 : vector<10x1xf32>
      %154 = vector.broadcast %146 : vector<10x1xf32> to vector<10x64xf32>
      %155 = arith.subf %142, %154 : vector<10x64xf32>
      %cst_64 = arith.constant 9.99999997E-7 : f32
      %156 = vector.broadcast %cst_64 : f32 to vector<10x1xf32>
      %157 = arith.addf %153, %156 : vector<10x1xf32>
      %158 = math.sqrt %157 : vector<10x1xf32>
      %159 = vector.broadcast %158 : vector<10x1xf32> to vector<10x64xf32>
      %160 = arith.divf %155, %159 : vector<10x64xf32>
      %161 = vector.broadcast %38 : vector<1x64xf32> to vector<10x64xf32>
      %162 = arith.mulf %160, %161 : vector<10x64xf32>
      %163 = vector.broadcast %39 : vector<1x64xf32> to vector<10x64xf32>
      %164 = arith.addf %162, %163 : vector<10x64xf32>
      %cst_65 = arith.constant dense<0.000000e+00> : vector<10x128xf32>
      %165 = tpu.matmul %164, %46, %cst_65 {dimension_numbers = #tpu.dot_dimension_numbers<[1], [0], [0], [1], [0, 0, 1, 1], [], []>} : vector<10x64xf32>, vector<64x128xf32>, vector<10x128xf32> -> vector<10x128xf32>
      %166 = vector.broadcast %42 : vector<1x128xf32> to vector<10x128xf32>
      %167 = arith.addf %165, %166 : vector<10x128xf32>
      %cst_66 = arith.constant 5.000000e-01 : f32
      %168 = vector.broadcast %cst_66 : f32 to vector<10x128xf32>
      %169 = arith.mulf %168, %167 : vector<10x128xf32>
      %cst_67 = arith.constant 0.707106769 : f32
      %170 = vector.broadcast %cst_67 : f32 to vector<10x128xf32>
      %171 = arith.mulf %167, %170 : vector<10x128xf32>
      %cst_68 = arith.constant -3.92572498 : f32
      %cst_69 = arith.constant 3.92572498 : f32
      %172 = vector.broadcast %cst_68 : f32 to vector<10x128xf32>
      %173 = arith.maximumf %172, %171 : vector<10x128xf32>
      %174 = vector.broadcast %cst_69 : f32 to vector<10x128xf32>
      %175 = arith.minimumf %174, %173 : vector<10x128xf32>
      %176 = arith.mulf %175, %175 : vector<10x128xf32>
      %cst_70 = arith.constant -2.72614237E-10 : f32
      %177 = vector.broadcast %cst_70 : f32 to vector<10x128xf32>
      %178 = arith.mulf %176, %177 : vector<10x128xf32>
      %cst_71 = arith.constant 2.77068146E-8 : f32
      %179 = vector.broadcast %cst_71 : f32 to vector<10x128xf32>
      %180 = arith.addf %178, %179 : vector<10x128xf32>
      %181 = arith.mulf %180, %176 : vector<10x128xf32>
      %cst_72 = arith.constant -2.10102394E-6 : f32
      %182 = vector.broadcast %cst_72 : f32 to vector<10x128xf32>
      %183 = arith.addf %181, %182 : vector<10x128xf32>
      %184 = arith.mulf %183, %176 : vector<10x128xf32>
      %cst_73 = arith.constant -5.69250624E-5 : f32
      %185 = vector.broadcast %cst_73 : f32 to vector<10x128xf32>
      %186 = arith.addf %184, %185 : vector<10x128xf32>
      %187 = arith.mulf %186, %176 : vector<10x128xf32>
      %cst_74 = arith.constant -7.34990637E-4 : f32
      %188 = vector.broadcast %cst_74 : f32 to vector<10x128xf32>
      %189 = arith.addf %187, %188 : vector<10x128xf32>
      %190 = arith.mulf %189, %176 : vector<10x128xf32>
      %cst_75 = arith.constant -2.954600e-03 : f32
      %191 = vector.broadcast %cst_75 : f32 to vector<10x128xf32>
      %192 = arith.addf %190, %191 : vector<10x128xf32>
      %193 = arith.mulf %192, %176 : vector<10x128xf32>
      %cst_76 = arith.constant -0.0160960332 : f32
      %194 = vector.broadcast %cst_76 : f32 to vector<10x128xf32>
      %195 = arith.addf %193, %194 : vector<10x128xf32>
      %196 = arith.mulf %195, %175 : vector<10x128xf32>
      %cst_77 = arith.constant -1.45660715E-5 : f32
      %197 = vector.broadcast %cst_77 : f32 to vector<10x128xf32>
      %198 = arith.mulf %176, %197 : vector<10x128xf32>
      %cst_78 = arith.constant -2.13374049E-4 : f32
      %199 = vector.broadcast %cst_78 : f32 to vector<10x128xf32>
      %200 = arith.addf %198, %199 : vector<10x128xf32>
      %201 = arith.mulf %200, %176 : vector<10x128xf32>
      %cst_79 = arith.constant -0.00168282702 : f32
      %202 = vector.broadcast %cst_79 : f32 to vector<10x128xf32>
      %203 = arith.addf %201, %202 : vector<10x128xf32>
      %204 = arith.mulf %203, %176 : vector<10x128xf32>
      %cst_80 = arith.constant -0.00737332925 : f32
      %205 = vector.broadcast %cst_80 : f32 to vector<10x128xf32>
      %206 = arith.addf %204, %205 : vector<10x128xf32>
      %207 = arith.mulf %206, %176 : vector<10x128xf32>
      %cst_81 = arith.constant -0.0142647391 : f32
      %208 = vector.broadcast %cst_81 : f32 to vector<10x128xf32>
      %209 = arith.addf %207, %208 : vector<10x128xf32>
      %210 = arith.divf %196, %209 : vector<10x128xf32>
      %cst_82 = arith.constant 1.000000e+00 : f32
      %211 = vector.broadcast %cst_82 : f32 to vector<10x128xf32>
      %212 = arith.addf %211, %210 : vector<10x128xf32>
      %213 = arith.mulf %169, %212 : vector<10x128xf32>
      %cst_83 = arith.constant dense<0.000000e+00> : vector<10x64xf32>
      %214 = tpu.matmul %213, %47, %cst_83 {dimension_numbers = #tpu.dot_dimension_numbers<[1], [1], [0], [0], [0, 0, 1, 0], [], []>} : vector<10x128xf32>, vector<64x128xf32>, vector<10x64xf32> -> vector<10x64xf32>
      %215 = vector.broadcast %41 : vector<1x64xf32> to vector<10x64xf32>
      %216 = arith.addf %214, %215 : vector<10x64xf32>
      %217 = arith.addf %142, %216 : vector<10x64xf32>
      %c1_84 = arith.constant 1 : index
      %c0_85 = arith.constant 0 : index
      %c0_86 = arith.constant 0 : index
      %218 = vector.load %arg6[%c1_84, %c0_85, %c0_86] : memref<2x64x512xf32, #tpu.memory_space<vmem>>, vector<1x64x512xf32>
      %219 = vector.shape_cast %218 : vector<1x64x512xf32> to vector<64x512xf32>
      %c1_87 = arith.constant 1 : index
      %c0_88 = arith.constant 0 : index
      %c0_89 = arith.constant 0 : index
      %220 = vector.load %arg7[%c1_87, %c0_88, %c0_89] : memref<2x8x192xf32, #tpu.memory_space<vmem>>, vector<1x8x192xf32>
      %221 = vector.shape_cast %220 : vector<1x8x192xf32> to vector<8x192xf32>
      %222 = vector.extract_strided_slice %221 {offsets = [0, 0], sizes = [1, 64], strides = [1, 1]} : vector<8x192xf32> to vector<1x64xf32>
      %223 = vector.extract_strided_slice %221 {offsets = [1, 0], sizes = [1, 64], strides = [1, 1]} : vector<8x192xf32> to vector<1x64xf32>
      %224 = vector.extract_strided_slice %221 {offsets = [2, 0], sizes = [1, 64], strides = [1, 1]} : vector<8x192xf32> to vector<1x64xf32>
      %225 = vector.extract_strided_slice %221 {offsets = [3, 0], sizes = [1, 64], strides = [1, 1]} : vector<8x192xf32> to vector<1x64xf32>
      %226 = vector.extract_strided_slice %221 {offsets = [4, 0], sizes = [1, 64], strides = [1, 1]} : vector<8x192xf32> to vector<1x64xf32>
      %227 = vector.extract_strided_slice %221 {offsets = [5, 0], sizes = [1, 64], strides = [1, 1]} : vector<8x192xf32> to vector<1x64xf32>
      %228 = vector.extract_strided_slice %221 {offsets = [6, 0], sizes = [1, 128], strides = [1, 1]} : vector<8x192xf32> to vector<1x128xf32>
      %229 = vector.extract_strided_slice %221 {offsets = [7, 0], sizes = [1, 192], strides = [1, 1]} : vector<8x192xf32> to vector<1x192xf32>
      %230 = vector.extract_strided_slice %219 {offsets = [0, 0], sizes = [64, 192], strides = [1, 1]} : vector<64x512xf32> to vector<64x192xf32>
      %231 = vector.extract_strided_slice %219 {offsets = [0, 192], sizes = [64, 64], strides = [1, 1]} : vector<64x512xf32> to vector<64x64xf32>
      %232 = vector.extract_strided_slice %219 {offsets = [0, 256], sizes = [64, 128], strides = [1, 1]} : vector<64x512xf32> to vector<64x128xf32>
      %233 = vector.extract_strided_slice %219 {offsets = [0, 384], sizes = [64, 128], strides = [1, 1]} : vector<64x512xf32> to vector<64x128xf32>
      %cst_90 = arith.constant dense<0.000000e+00> : vector<10xf32>
      %234 = vector.multi_reduction <add>, %217, %cst_90 [1] : vector<10x64xf32> to vector<10xf32>
      %235 = vector.shape_cast %234 : vector<10xf32> to vector<10x1xf32>
      %cst_91 = arith.constant 6.400000e+01 : f32
      %236 = vector.broadcast %cst_91 : f32 to vector<10x1xf32>
      %237 = arith.divf %235, %236 : vector<10x1xf32>
      %238 = vector.broadcast %237 : vector<10x1xf32> to vector<10x64xf32>
      %239 = arith.subf %217, %238 : vector<10x64xf32>
      %240 = arith.mulf %239, %239 : vector<10x64xf32>
      %cst_92 = arith.constant dense<0.000000e+00> : vector<10xf32>
      %241 = vector.multi_reduction <add>, %240, %cst_92 [1] : vector<10x64xf32> to vector<10xf32>
      %242 = vector.shape_cast %241 : vector<10xf32> to vector<10x1xf32>
      %cst_93 = arith.constant 6.400000e+01 : f32
      %243 = vector.broadcast %cst_93 : f32 to vector<10x1xf32>
      %244 = arith.divf %242, %243 : vector<10x1xf32>
      %245 = vector.broadcast %237 : vector<10x1xf32> to vector<10x64xf32>
      %246 = arith.subf %217, %245 : vector<10x64xf32>
      %cst_94 = arith.constant 9.99999997E-7 : f32
      %247 = vector.broadcast %cst_94 : f32 to vector<10x1xf32>
      %248 = arith.addf %244, %247 : vector<10x1xf32>
      %249 = math.sqrt %248 : vector<10x1xf32>
      %250 = vector.broadcast %249 : vector<10x1xf32> to vector<10x64xf32>
      %251 = arith.divf %246, %250 : vector<10x64xf32>
      %252 = vector.broadcast %222 : vector<1x64xf32> to vector<10x64xf32>
      %253 = arith.mulf %251, %252 : vector<10x64xf32>
      %254 = vector.broadcast %223 : vector<1x64xf32> to vector<10x64xf32>
      %255 = arith.addf %253, %254 : vector<10x64xf32>
      %cst_95 = arith.constant dense<0.000000e+00> : vector<10x192xf32>
      %256 = tpu.matmul %255, %230, %cst_95 {dimension_numbers = #tpu.dot_dimension_numbers<[1], [0], [0], [1], [0, 0, 1, 1], [], []>} : vector<10x64xf32>, vector<64x192xf32>, vector<10x192xf32> -> vector<10x192xf32>
      %257 = vector.broadcast %229 : vector<1x192xf32> to vector<10x192xf32>
      %258 = arith.addf %256, %257 : vector<10x192xf32>
      %259 = vector.extract_strided_slice %258 {offsets = [0, 0], sizes = [10, 64], strides = [1, 1]} : vector<10x192xf32> to vector<10x64xf32>
      %cst_96 = arith.constant 2.500000e-01 : f32
      %260 = vector.broadcast %cst_96 : f32 to vector<10x64xf32>
      %261 = arith.mulf %259, %260 : vector<10x64xf32>
      %262 = vector.extract_strided_slice %258 {offsets = [0, 64], sizes = [10, 64], strides = [1, 1]} : vector<10x192xf32> to vector<10x64xf32>
      %263 = vector.extract_strided_slice %258 {offsets = [0, 128], sizes = [10, 64], strides = [1, 1]} : vector<10x192xf32> to vector<10x64xf32>
      %264 = vector.extract_strided_slice %261 {offsets = [0, 0], sizes = [10, 16], strides = [1, 1]} : vector<10x64xf32> to vector<10x16xf32>
      %265 = vector.extract_strided_slice %262 {offsets = [0, 0], sizes = [10, 16], strides = [1, 1]} : vector<10x64xf32> to vector<10x16xf32>
      %cst_97 = arith.constant dense<0.000000e+00> : vector<10x10xf32>
      %266 = tpu.matmul %264, %265, %cst_97 {dimension_numbers = #tpu.dot_dimension_numbers<[1], [1], [0], [0], [0, 0, 1, 0], [], []>} : vector<10x16xf32>, vector<10x16xf32>, vector<10x10xf32> -> vector<10x10xf32>
      %267 = arith.addf %266, %31 : vector<10x10xf32>
      %cst_98 = arith.constant dense<0xFF800000> : vector<10xf32>
      %268 = vector.multi_reduction <maximumf>, %267, %cst_98 [1] : vector<10x10xf32> to vector<10xf32>
      %269 = vector.shape_cast %268 : vector<10xf32> to vector<10x1xf32>
      %270 = vector.broadcast %269 : vector<10x1xf32> to vector<10x10xf32>
      %271 = arith.subf %267, %270 : vector<10x10xf32>
      %272 = math.exp %271 : vector<10x10xf32>
      %cst_99 = arith.constant dense<0.000000e+00> : vector<10xf32>
      %273 = vector.multi_reduction <add>, %272, %cst_99 [1] : vector<10x10xf32> to vector<10xf32>
      %274 = vector.shape_cast %273 : vector<10xf32> to vector<10x1xf32>
      %275 = vector.broadcast %274 : vector<10x1xf32> to vector<10x10xf32>
      %276 = arith.divf %272, %275 : vector<10x10xf32>
      %277 = vector.extract_strided_slice %263 {offsets = [0, 0], sizes = [10, 16], strides = [1, 1]} : vector<10x64xf32> to vector<10x16xf32>
      %cst_100 = arith.constant dense<0.000000e+00> : vector<10x16xf32>
      %278 = tpu.matmul %276, %277, %cst_100 {dimension_numbers = #tpu.dot_dimension_numbers<[1], [0], [0], [1], [0, 0, 1, 1], [], []>} : vector<10x10xf32>, vector<10x16xf32>, vector<10x16xf32> -> vector<10x16xf32>
      %279 = vector.extract_strided_slice %261 {offsets = [0, 16], sizes = [10, 16], strides = [1, 1]} : vector<10x64xf32> to vector<10x16xf32>
      %280 = vector.extract_strided_slice %262 {offsets = [0, 16], sizes = [10, 16], strides = [1, 1]} : vector<10x64xf32> to vector<10x16xf32>
      %cst_101 = arith.constant dense<0.000000e+00> : vector<10x10xf32>
      %281 = tpu.matmul %279, %280, %cst_101 {dimension_numbers = #tpu.dot_dimension_numbers<[1], [1], [0], [0], [0, 0, 1, 0], [], []>} : vector<10x16xf32>, vector<10x16xf32>, vector<10x10xf32> -> vector<10x10xf32>
      %282 = arith.addf %281, %31 : vector<10x10xf32>
      %cst_102 = arith.constant dense<0xFF800000> : vector<10xf32>
      %283 = vector.multi_reduction <maximumf>, %282, %cst_102 [1] : vector<10x10xf32> to vector<10xf32>
      %284 = vector.shape_cast %283 : vector<10xf32> to vector<10x1xf32>
      %285 = vector.broadcast %284 : vector<10x1xf32> to vector<10x10xf32>
      %286 = arith.subf %282, %285 : vector<10x10xf32>
      %287 = math.exp %286 : vector<10x10xf32>
      %cst_103 = arith.constant dense<0.000000e+00> : vector<10xf32>
      %288 = vector.multi_reduction <add>, %287, %cst_103 [1] : vector<10x10xf32> to vector<10xf32>
      %289 = vector.shape_cast %288 : vector<10xf32> to vector<10x1xf32>
      %290 = vector.broadcast %289 : vector<10x1xf32> to vector<10x10xf32>
      %291 = arith.divf %287, %290 : vector<10x10xf32>
      %292 = vector.extract_strided_slice %263 {offsets = [0, 16], sizes = [10, 16], strides = [1, 1]} : vector<10x64xf32> to vector<10x16xf32>
      %cst_104 = arith.constant dense<0.000000e+00> : vector<10x16xf32>
      %293 = tpu.matmul %291, %292, %cst_104 {dimension_numbers = #tpu.dot_dimension_numbers<[1], [0], [0], [1], [0, 0, 1, 1], [], []>} : vector<10x10xf32>, vector<10x16xf32>, vector<10x16xf32> -> vector<10x16xf32>
      %294 = vector.extract_strided_slice %261 {offsets = [0, 32], sizes = [10, 16], strides = [1, 1]} : vector<10x64xf32> to vector<10x16xf32>
      %295 = vector.extract_strided_slice %262 {offsets = [0, 32], sizes = [10, 16], strides = [1, 1]} : vector<10x64xf32> to vector<10x16xf32>
      %cst_105 = arith.constant dense<0.000000e+00> : vector<10x10xf32>
      %296 = tpu.matmul %294, %295, %cst_105 {dimension_numbers = #tpu.dot_dimension_numbers<[1], [1], [0], [0], [0, 0, 1, 0], [], []>} : vector<10x16xf32>, vector<10x16xf32>, vector<10x10xf32> -> vector<10x10xf32>
      %297 = arith.addf %296, %31 : vector<10x10xf32>
      %cst_106 = arith.constant dense<0xFF800000> : vector<10xf32>
      %298 = vector.multi_reduction <maximumf>, %297, %cst_106 [1] : vector<10x10xf32> to vector<10xf32>
      %299 = vector.shape_cast %298 : vector<10xf32> to vector<10x1xf32>
      %300 = vector.broadcast %299 : vector<10x1xf32> to vector<10x10xf32>
      %301 = arith.subf %297, %300 : vector<10x10xf32>
      %302 = math.exp %301 : vector<10x10xf32>
      %cst_107 = arith.constant dense<0.000000e+00> : vector<10xf32>
      %303 = vector.multi_reduction <add>, %302, %cst_107 [1] : vector<10x10xf32> to vector<10xf32>
      %304 = vector.shape_cast %303 : vector<10xf32> to vector<10x1xf32>
      %305 = vector.broadcast %304 : vector<10x1xf32> to vector<10x10xf32>
      %306 = arith.divf %302, %305 : vector<10x10xf32>
      %307 = vector.extract_strided_slice %263 {offsets = [0, 32], sizes = [10, 16], strides = [1, 1]} : vector<10x64xf32> to vector<10x16xf32>
      %cst_108 = arith.constant dense<0.000000e+00> : vector<10x16xf32>
      %308 = tpu.matmul %306, %307, %cst_108 {dimension_numbers = #tpu.dot_dimension_numbers<[1], [0], [0], [1], [0, 0, 1, 1], [], []>} : vector<10x10xf32>, vector<10x16xf32>, vector<10x16xf32> -> vector<10x16xf32>
      %309 = vector.extract_strided_slice %261 {offsets = [0, 48], sizes = [10, 16], strides = [1, 1]} : vector<10x64xf32> to vector<10x16xf32>
      %310 = vector.extract_strided_slice %262 {offsets = [0, 48], sizes = [10, 16], strides = [1, 1]} : vector<10x64xf32> to vector<10x16xf32>
      %cst_109 = arith.constant dense<0.000000e+00> : vector<10x10xf32>
      %311 = tpu.matmul %309, %310, %cst_109 {dimension_numbers = #tpu.dot_dimension_numbers<[1], [1], [0], [0], [0, 0, 1, 0], [], []>} : vector<10x16xf32>, vector<10x16xf32>, vector<10x10xf32> -> vector<10x10xf32>
      %312 = arith.addf %311, %31 : vector<10x10xf32>
      %cst_110 = arith.constant dense<0xFF800000> : vector<10xf32>
      %313 = vector.multi_reduction <maximumf>, %312, %cst_110 [1] : vector<10x10xf32> to vector<10xf32>
      %314 = vector.shape_cast %313 : vector<10xf32> to vector<10x1xf32>
      %315 = vector.broadcast %314 : vector<10x1xf32> to vector<10x10xf32>
      %316 = arith.subf %312, %315 : vector<10x10xf32>
      %317 = math.exp %316 : vector<10x10xf32>
      %cst_111 = arith.constant dense<0.000000e+00> : vector<10xf32>
      %318 = vector.multi_reduction <add>, %317, %cst_111 [1] : vector<10x10xf32> to vector<10xf32>
      %319 = vector.shape_cast %318 : vector<10xf32> to vector<10x1xf32>
      %320 = vector.broadcast %319 : vector<10x1xf32> to vector<10x10xf32>
      %321 = arith.divf %317, %320 : vector<10x10xf32>
      %322 = vector.extract_strided_slice %263 {offsets = [0, 48], sizes = [10, 16], strides = [1, 1]} : vector<10x64xf32> to vector<10x16xf32>
      %cst_112 = arith.constant dense<0.000000e+00> : vector<10x16xf32>
      %323 = tpu.matmul %321, %322, %cst_112 {dimension_numbers = #tpu.dot_dimension_numbers<[1], [0], [0], [1], [0, 0, 1, 1], [], []>} : vector<10x10xf32>, vector<10x16xf32>, vector<10x16xf32> -> vector<10x16xf32>
      %324 = tpu.concatenate %278, %293, %308, %323 in 1 : vector<10x16xf32>, vector<10x16xf32>, vector<10x16xf32>, vector<10x16xf32> -> vector<10x64xf32>
      %cst_113 = arith.constant dense<0.000000e+00> : vector<10x64xf32>
      %325 = tpu.matmul %324, %231, %cst_113 {dimension_numbers = #tpu.dot_dimension_numbers<[1], [0], [0], [1], [0, 0, 1, 1], [], []>} : vector<10x64xf32>, vector<64x64xf32>, vector<10x64xf32> -> vector<10x64xf32>
      %326 = vector.broadcast %226 : vector<1x64xf32> to vector<10x64xf32>
      %327 = arith.addf %325, %326 : vector<10x64xf32>
      %328 = arith.addf %217, %327 : vector<10x64xf32>
      %cst_114 = arith.constant dense<0.000000e+00> : vector<10xf32>
      %329 = vector.multi_reduction <add>, %328, %cst_114 [1] : vector<10x64xf32> to vector<10xf32>
      %330 = vector.shape_cast %329 : vector<10xf32> to vector<10x1xf32>
      %cst_115 = arith.constant 6.400000e+01 : f32
      %331 = vector.broadcast %cst_115 : f32 to vector<10x1xf32>
      %332 = arith.divf %330, %331 : vector<10x1xf32>
      %333 = vector.broadcast %332 : vector<10x1xf32> to vector<10x64xf32>
      %334 = arith.subf %328, %333 : vector<10x64xf32>
      %335 = arith.mulf %334, %334 : vector<10x64xf32>
      %cst_116 = arith.constant dense<0.000000e+00> : vector<10xf32>
      %336 = vector.multi_reduction <add>, %335, %cst_116 [1] : vector<10x64xf32> to vector<10xf32>
      %337 = vector.shape_cast %336 : vector<10xf32> to vector<10x1xf32>
      %cst_117 = arith.constant 6.400000e+01 : f32
      %338 = vector.broadcast %cst_117 : f32 to vector<10x1xf32>
      %339 = arith.divf %337, %338 : vector<10x1xf32>
      %340 = vector.broadcast %332 : vector<10x1xf32> to vector<10x64xf32>
      %341 = arith.subf %328, %340 : vector<10x64xf32>
      %cst_118 = arith.constant 9.99999997E-7 : f32
      %342 = vector.broadcast %cst_118 : f32 to vector<10x1xf32>
      %343 = arith.addf %339, %342 : vector<10x1xf32>
      %344 = math.sqrt %343 : vector<10x1xf32>
      %345 = vector.broadcast %344 : vector<10x1xf32> to vector<10x64xf32>
      %346 = arith.divf %341, %345 : vector<10x64xf32>
      %347 = vector.broadcast %224 : vector<1x64xf32> to vector<10x64xf32>
      %348 = arith.mulf %346, %347 : vector<10x64xf32>
      %349 = vector.broadcast %225 : vector<1x64xf32> to vector<10x64xf32>
      %350 = arith.addf %348, %349 : vector<10x64xf32>
      %cst_119 = arith.constant dense<0.000000e+00> : vector<10x128xf32>
      %351 = tpu.matmul %350, %232, %cst_119 {dimension_numbers = #tpu.dot_dimension_numbers<[1], [0], [0], [1], [0, 0, 1, 1], [], []>} : vector<10x64xf32>, vector<64x128xf32>, vector<10x128xf32> -> vector<10x128xf32>
      %352 = vector.broadcast %228 : vector<1x128xf32> to vector<10x128xf32>
      %353 = arith.addf %351, %352 : vector<10x128xf32>
      %cst_120 = arith.constant 5.000000e-01 : f32
      %354 = vector.broadcast %cst_120 : f32 to vector<10x128xf32>
      %355 = arith.mulf %354, %353 : vector<10x128xf32>
      %cst_121 = arith.constant 0.707106769 : f32
      %356 = vector.broadcast %cst_121 : f32 to vector<10x128xf32>
      %357 = arith.mulf %353, %356 : vector<10x128xf32>
      %cst_122 = arith.constant -3.92572498 : f32
      %cst_123 = arith.constant 3.92572498 : f32
      %358 = vector.broadcast %cst_122 : f32 to vector<10x128xf32>
      %359 = arith.maximumf %358, %357 : vector<10x128xf32>
      %360 = vector.broadcast %cst_123 : f32 to vector<10x128xf32>
      %361 = arith.minimumf %360, %359 : vector<10x128xf32>
      %362 = arith.mulf %361, %361 : vector<10x128xf32>
      %cst_124 = arith.constant -2.72614237E-10 : f32
      %363 = vector.broadcast %cst_124 : f32 to vector<10x128xf32>
      %364 = arith.mulf %362, %363 : vector<10x128xf32>
      %cst_125 = arith.constant 2.77068146E-8 : f32
      %365 = vector.broadcast %cst_125 : f32 to vector<10x128xf32>
      %366 = arith.addf %364, %365 : vector<10x128xf32>
      %367 = arith.mulf %366, %362 : vector<10x128xf32>
      %cst_126 = arith.constant -2.10102394E-6 : f32
      %368 = vector.broadcast %cst_126 : f32 to vector<10x128xf32>
      %369 = arith.addf %367, %368 : vector<10x128xf32>
      %370 = arith.mulf %369, %362 : vector<10x128xf32>
      %cst_127 = arith.constant -5.69250624E-5 : f32
      %371 = vector.broadcast %cst_127 : f32 to vector<10x128xf32>
      %372 = arith.addf %370, %371 : vector<10x128xf32>
      %373 = arith.mulf %372, %362 : vector<10x128xf32>
      %cst_128 = arith.constant -7.34990637E-4 : f32
      %374 = vector.broadcast %cst_128 : f32 to vector<10x128xf32>
      %375 = arith.addf %373, %374 : vector<10x128xf32>
      %376 = arith.mulf %375, %362 : vector<10x128xf32>
      %cst_129 = arith.constant -2.954600e-03 : f32
      %377 = vector.broadcast %cst_129 : f32 to vector<10x128xf32>
      %378 = arith.addf %376, %377 : vector<10x128xf32>
      %379 = arith.mulf %378, %362 : vector<10x128xf32>
      %cst_130 = arith.constant -0.0160960332 : f32
      %380 = vector.broadcast %cst_130 : f32 to vector<10x128xf32>
      %381 = arith.addf %379, %380 : vector<10x128xf32>
      %382 = arith.mulf %381, %361 : vector<10x128xf32>
      %cst_131 = arith.constant -1.45660715E-5 : f32
      %383 = vector.broadcast %cst_131 : f32 to vector<10x128xf32>
      %384 = arith.mulf %362, %383 : vector<10x128xf32>
      %cst_132 = arith.constant -2.13374049E-4 : f32
      %385 = vector.broadcast %cst_132 : f32 to vector<10x128xf32>
      %386 = arith.addf %384, %385 : vector<10x128xf32>
      %387 = arith.mulf %386, %362 : vector<10x128xf32>
      %cst_133 = arith.constant -0.00168282702 : f32
      %388 = vector.broadcast %cst_133 : f32 to vector<10x128xf32>
      %389 = arith.addf %387, %388 : vector<10x128xf32>
      %390 = arith.mulf %389, %362 : vector<10x128xf32>
      %cst_134 = arith.constant -0.00737332925 : f32
      %391 = vector.broadcast %cst_134 : f32 to vector<10x128xf32>
      %392 = arith.addf %390, %391 : vector<10x128xf32>
      %393 = arith.mulf %392, %362 : vector<10x128xf32>
      %cst_135 = arith.constant -0.0142647391 : f32
      %394 = vector.broadcast %cst_135 : f32 to vector<10x128xf32>
      %395 = arith.addf %393, %394 : vector<10x128xf32>
      %396 = arith.divf %382, %395 : vector<10x128xf32>
      %cst_136 = arith.constant 1.000000e+00 : f32
      %397 = vector.broadcast %cst_136 : f32 to vector<10x128xf32>
      %398 = arith.addf %397, %396 : vector<10x128xf32>
      %399 = arith.mulf %355, %398 : vector<10x128xf32>
      %cst_137 = arith.constant dense<0.000000e+00> : vector<10x64xf32>
      %400 = tpu.matmul %399, %233, %cst_137 {dimension_numbers = #tpu.dot_dimension_numbers<[1], [1], [0], [0], [0, 0, 1, 0], [], []>} : vector<10x128xf32>, vector<64x128xf32>, vector<10x64xf32> -> vector<10x64xf32>
      %401 = vector.broadcast %227 : vector<1x64xf32> to vector<10x64xf32>
      %402 = arith.addf %400, %401 : vector<10x64xf32>
      %403 = arith.addf %328, %402 : vector<10x64xf32>
      %404 = vector.extract_strided_slice %12 {offsets = [1, 0], sizes = [1, 64], strides = [1, 1]} : vector<72x64xf32> to vector<1x64xf32>
      %405 = vector.extract_strided_slice %12 {offsets = [2, 0], sizes = [1, 64], strides = [1, 1]} : vector<72x64xf32> to vector<1x64xf32>
      %406 = vector.extract_strided_slice %12 {offsets = [3, 0], sizes = [1, 10], strides = [1, 1]} : vector<72x64xf32> to vector<1x10xf32>
      %407 = vector.extract_strided_slice %12 {offsets = [8, 0], sizes = [64, 10], strides = [1, 1]} : vector<72x64xf32> to vector<64x10xf32>
      %cst_138 = arith.constant dense<0.000000e+00> : vector<10xf32>
      %408 = vector.multi_reduction <add>, %403, %cst_138 [1] : vector<10x64xf32> to vector<10xf32>
      %409 = vector.shape_cast %408 : vector<10xf32> to vector<10x1xf32>
      %cst_139 = arith.constant 6.400000e+01 : f32
      %410 = vector.broadcast %cst_139 : f32 to vector<10x1xf32>
      %411 = arith.divf %409, %410 : vector<10x1xf32>
      %412 = vector.broadcast %411 : vector<10x1xf32> to vector<10x64xf32>
      %413 = arith.subf %403, %412 : vector<10x64xf32>
      %414 = arith.mulf %413, %413 : vector<10x64xf32>
      %cst_140 = arith.constant dense<0.000000e+00> : vector<10xf32>
      %415 = vector.multi_reduction <add>, %414, %cst_140 [1] : vector<10x64xf32> to vector<10xf32>
      %416 = vector.shape_cast %415 : vector<10xf32> to vector<10x1xf32>
      %cst_141 = arith.constant 6.400000e+01 : f32
      %417 = vector.broadcast %cst_141 : f32 to vector<10x1xf32>
      %418 = arith.divf %416, %417 : vector<10x1xf32>
      %419 = vector.broadcast %411 : vector<10x1xf32> to vector<10x64xf32>
      %420 = arith.subf %403, %419 : vector<10x64xf32>
      %cst_142 = arith.constant 9.99999997E-7 : f32
      %421 = vector.broadcast %cst_142 : f32 to vector<10x1xf32>
      %422 = arith.addf %418, %421 : vector<10x1xf32>
      %423 = math.sqrt %422 : vector<10x1xf32>
      %424 = vector.broadcast %423 : vector<10x1xf32> to vector<10x64xf32>
      %425 = arith.divf %420, %424 : vector<10x64xf32>
      %426 = vector.broadcast %404 : vector<1x64xf32> to vector<10x64xf32>
      %427 = arith.mulf %425, %426 : vector<10x64xf32>
      %428 = vector.broadcast %405 : vector<1x64xf32> to vector<10x64xf32>
      %429 = arith.addf %427, %428 : vector<10x64xf32>
      %cst_143 = arith.constant dense<0.000000e+00> : vector<10x10xf32>
      %430 = tpu.matmul %429, %407, %cst_143 {dimension_numbers = #tpu.dot_dimension_numbers<[1], [0], [0], [1], [0, 0, 1, 1], [], []>} : vector<10x64xf32>, vector<64x10xf32>, vector<10x10xf32> -> vector<10x10xf32>
      %431 = vector.broadcast %406 : vector<1x10xf32> to vector<10x10xf32>
      %432 = arith.addf %430, %431 : vector<10x10xf32>
      %433 = vector.extract_strided_slice %432 {offsets = [0, 0], sizes = [1, 10], strides = [1, 1]} : vector<10x10xf32> to vector<1x10xf32>
      %c0_144 = arith.constant 0 : index
      %c0_145 = arith.constant 0 : index
      %434 = vector.load %arg9[%c0_144, %c0_145] : memref<2x10xf32, #tpu.memory_space<vmem>>, vector<1x10xf32>
      tpu.vector_store %arg9[%c0_144, %c0_145], %433 {strides = array<i32>} : memref<2x10xf32, #tpu.memory_space<vmem>>, vector<1x10xf32>,
      %435 = vector.extract_strided_slice %432 {offsets = [5, 0], sizes = [1, 10], strides = [1, 1]} : vector<10x10xf32> to vector<1x10xf32>
      %c1_146 = arith.constant 1 : index
      %c0_147 = arith.constant 0 : index
      %436 = vector.load %arg9[%c1_146, %c0_147] : memref<2x10xf32, #tpu.memory_space<vmem>>, vector<1x10xf32>
      tpu.vector_store %arg9[%c1_146, %c0_147], %435 {strides = array<i32>} : memref<2x10xf32, #tpu.memory_space<vmem>>, vector<1x10xf32>,
    } else {
    }
    return
  }
  func.func @transform_0(%arg0: i32) -> (i32, i32) {
    %c0_i32 = arith.constant 0 : i32
    %c0_i32_0 = arith.constant 0 : i32
    return %c0_i32, %arg0 : i32, i32
  }
  func.func @transform_1(%arg0: i32) -> (i32, i32) {
    %c0_i32 = arith.constant 0 : i32
    %c0_i32_0 = arith.constant 0 : i32
    return %arg0, %c0_i32 : i32, i32
  }
  func.func @transform_2(%arg0: i32) -> (i32, i32) {
    %c0_i32 = arith.constant 0 : i32
    %c0_i32_0 = arith.constant 0 : i32
    %c0_i32_1 = arith.constant 0 : i32
    return %c0_i32, %c0_i32_0 : i32, i32
  }
  func.func @transform_3(%arg0: i32) -> (i32, i32) {
    %c0_i32 = arith.constant 0 : i32
    %c0_i32_0 = arith.constant 0 : i32
    %c0_i32_1 = arith.constant 0 : i32
    return %c0_i32, %c0_i32_0 : i32, i32
  }
  func.func @transform_4(%arg0: i32) -> (i32, i32) {
    %c0_i32 = arith.constant 0 : i32
    %c0_i32_0 = arith.constant 0 : i32
    %c0_i32_1 = arith.constant 0 : i32
    return %c0_i32, %c0_i32_0 : i32, i32
  }
  func.func @transform_5(%arg0: i32) -> (i32, i32, i32) {
    %c0_i32 = arith.constant 0 : i32
    %c0_i32_0 = arith.constant 0 : i32
    %c0_i32_1 = arith.constant 0 : i32
    %c0_i32_2 = arith.constant 0 : i32
    return %c0_i32, %c0_i32_0, %c0_i32_1 : i32, i32, i32
  }
  func.func @transform_6(%arg0: i32) -> (i32, i32, i32) {
    %c0_i32 = arith.constant 0 : i32
    %c0_i32_0 = arith.constant 0 : i32
    %c0_i32_1 = arith.constant 0 : i32
    %c0_i32_2 = arith.constant 0 : i32
    return %c0_i32, %c0_i32_0, %c0_i32_1 : i32, i32, i32
  }
  func.func @transform_7(%arg0: i32) -> (i32, i32) {
    %c0_i32 = arith.constant 0 : i32
    %c0_i32_0 = arith.constant 0 : i32
    %c0_i32_1 = arith.constant 0 : i32
    return %c0_i32, %c0_i32_0 : i32, i32
  }
  func.func @transform_8(%arg0: i32) -> (i32, i32) {
    %c0_i32 = arith.constant 0 : i32
    %c0_i32_0 = arith.constant 0 : i32
    %c0_i32_1 = arith.constant 0 : i32
    return %c0_i32, %c0_i32_0 : i32, i32
  }
}

</mosaic_0001>

<bundles_post_ra>
// kernel: tile.9
= control target key start
LH: loop header
LB: loop body
LE: loop exit
PB: predicated region body
PF: predicated region fallthrough
CT: control target
= control target key end

     0   :  { %vm3_vm0 = vcmask 523264   ;;  %s34_s0 = inlined_call_operand.vmem [shape: f32[2,5,64], index: 0, kind: input, shape index: {}]   ;;  %s35_s1 = inlined_call_operand.vmem [shape: f32[10,64], index: 1, kind: output, shape index: {}]  }
   0x1   :  { %v2_v0 = vld [vmem:[%s34_s0] sm:$0x1f]   ;;  %v10_v1 = vld [vmem:[%s34_s0 + $0x8] sm:$0x1f]  }
   0x2   :  { %4 = vst.msk [vmem:[%s35_s1] sm:$0x1f] %vm3_vm0, %v2_v0   ;;  %11 = vst.msk [vmem:[%s35_s1 + $0x5] sm:$0x1f] %vm3_vm0, %v10_v1  }

// kernel: eq.8
= control target key start
LH: loop header
LB: loop body
LE: loop exit
PB: predicated region body
PF: predicated region fallthrough
CT: control target
= control target key end

     0   :  { %vm8_vm0 = vcmask 39936   ;;  %vm14_vm1 = vcmask 80936   ;;  %s42_s0 = inlined_call_operand.vmem [shape: s32[2,5], index: 0, kind: input, shape index: {}]   ;;  %s43_s1 = inlined_call_operand.vmem [shape: s32[10], index: 1, kind: output, shape index: {}]  }
   0x1   :  { %v5_v0 = vld [vmem:[%s42_s0] sm:$0x3]  ;;  %s25_s0 = smov 5  }
   0x2   :  { %6 = vst [vmem:[#allocation1] sm:$0x3] %v5_v0 }
   0x9   :  { %v11_v1 = vld [vmem:[#allocation1 + $0x1] sm:$0x1]   ;;  %v7_v2 = vld [vmem:[#allocation1] sm:$0x1]  }
   0xa   :  { %12 = vrot.lane.b32.xlu0 %v11_v1, %s25_s0  ;;  %9 = vst.msk [vmem:[#allocation0] sm:$0x1] %vm8_vm0, %v7_v2  }
  0x7c   :  { %v13_v3 = vpop.permute.xlu0 %12  }
  0x7d   :  { %15 = vst.msk [vmem:[#allocation0] sm:$0x1] %vm14_vm1, %v13_v3  }
  0x84   :  { %v20_v4 = vld [vmem:[#allocation0] sm:$0x1] }
  0x85   :  { %23 = vst [vmem:[%s43_s1] sm:$0x1] %v20_v4 }

// kernel: vit_forward.1
= control target key start
LH: loop header
LB: loop body
LE: loop exit
PB: predicated region body
PF: predicated region fallthrough
CT: control target
= control target key end

     0   :  { %13 = vsyncpa [#allocation5], 0  ;;  %s11139_s0 = inlined_call_operand.vmem [shape: bf16[8,3072], index: 0, kind: input, shape index: {}]   ;;  %s11140_s1 = inlined_call_operand.hbm [shape: bf16[3072,1024], index: 1, kind: input, shape index: {}]   ;;  %s11141_s2 = inlined_call_operand.vmem [shape: bf16[1024,64], index: 2, kind: input, shape index: {}]   ;;  %s11142_s3 = inlined_call_operand.vmem [shape: f32[10,64], index: 3, kind: input, shape index: {}]   ;;  %s11143_s4 = inlined_call_operand.vmem [shape: f32[10,10], index: 4, kind: input, shape index: {}]   ;;  %s11144_s5 = inlined_call_operand.hbm [shape: f32[2,64,512], index: 5, kind: input, shape index: {}]   ;;  %s11145_s6 = inlined_call_operand.hbm [shape: f32[2,8,192], index: 6, kind: input, shape index: {}]   ;;  %s11146_s7 = inlined_call_operand.vmem [shape: f32[72,64], index: 7, kind: input, shape index: {}]   ;;  %s11147_s8 = inlined_call_operand.hbm [shape: f32[2,10], index: 8, kind: output, shape index: {}]  }
   0x1   :  { %15 = vsyncpa [#allocation5 + $0x1], 0 }
   0x2   :  { %16 = vsyncpa [#allocation8], 0 }
   0x3   :  { %17 = vsyncpa [#allocation6], 0  ;;  %s9563_s27 = smov 0   ;;  %s9565_s28 = smov 0  }
   0x4   :  { %s9567_s29 = smov 0   ;;  %s9569_s30 = smov 0  }
   0x5 LB: > { %s9582_s9 = sadd.s32 4294967295, %s9499_s30   ;;  %p69_p0 = scmp.ne.s32.totalorder %s9491_s28, %s9487_s27  ;;  %s9499_s30 = sphi %s9569_s30, %s11164_s30   ;;  %s9495_s29 = sphi %s9567_s29, %s11163_s29   ;;  %s9491_s28 = sphi %s9565_s28, %s11162_s28   ;;  %s9487_s27 = sphi %s9563_s27, %s11161_s27  }
   0x6   : > { %p11148_p1 = scmp.eq.s32.totalorder %s9582_s9, 0  ;;  %p7939_p2 = scmp.ge.s32.totalorder %s9499_s30, 1 }
   0x7   : > { %p227_p3 = scmp.lt.s32.totalorder %s9499_s30, 4  ;;  %s9501_s12 = smov [#allocation7]  }
   0x8   : > { %p9591_p5 = por %p11148_p1, %p69_p0  ;;  %s248_s13 = sshll.u32 %s9501_s12, 4  ;;  %s249_s13 = int_to_ptr.vmem [resolvable:$true] %s248_s13 }
   0x9   : > { %p9595_p6 = pnand %p7939_p2, %p227_p3  ;;  %s9502_s15 = smov [#allocation9]  }
   0xa   : > { %s11151_s10 = scalar_select %p9591_p5, 1, 0 }
   0xb   : > { %s11152_s11 = scalar_select %p9595_p6, 1, 0 }
   0xc   : > { %p9100_p7 = pneg %p9595_p6  ;;  %s261_s16 = sshll.u32 %s9502_s15, 4  ;;  %s262_s16 = int_to_ptr.vmem [resolvable:$true] %s261_s16 }
   0xd   : > { %s9364_s17 = scalar_lea.vmem %s249_s13, 8192  ;;  %p9372_p13 = scmp.lt.s32.totalorder %s249_s13, %s249_s13 }
   0xe   : > { %p9603_p8 = pnand %p9100_p7, %p11148_p1  ;;  %p9365_p10 = scmp.ne.s32.totalorder %s249_s13, %s9364_s17 }
   0xf   : > { %p9373_p0 = scmp.lt.s32.totalorder %s9364_s17, %s9364_s17 }
  0x10   : > { %p9355_p9 = pneg %p9603_p8 }
  0x11   : > { %p9374_p2 = por %p9373_p0, %p9372_p13 }
  0x12   : > { %p9367_p11 = pnand %p9365_p10, %p9355_p9 }
  0x14   : > { %p9368_p12 = pneg %p9367_p11 }
  0x16   : > { %p9375_p3 = pnand %p9374_p2, %p9368_p12 }
  0x18   : > { %9378 = shalt.err (!%p9375_p3)
}
  0x19   : > { %s9503_s18 = smov 512   ;;  %s9504_s19 = smov 32  }
  0x1a   : > { %9103 = dma.hbm_to_vmem [thread:$0]  (!%p9603_p8), %s11144_s5, 8192, %s249_s13, [#allocation8], %s9503_s18, %s9503_s18, %s9504_s19  }
  0x1b   : > { %s9390_s22 = scalar_lea.vmem %s262_s16, 512  ;;  %p9398_p12 = scmp.lt.s32.totalorder %s262_s16, %s262_s16 }
  0x1c   : > { %p9391_p7 = scmp.ne.s32.totalorder %s262_s16, %s9390_s22  ;;  %p9399_p13 = scmp.lt.s32.totalorder %s9390_s22, %s9390_s22 }
  0x1e   : > { %p9393_p10 = pnand %p9391_p7, %p9355_p9  ;;  %p9400_p0 = por %p9399_p13, %p9398_p12 }
  0x20   : > { %p9394_p11 = pneg %p9393_p10 }
  0x22   : > { %p9401_p2 = pnand %p9400_p0, %p9394_p11 }
  0x24   : > { %9404 = shalt.err (!%p9401_p2)
}
  0x25   : > { %s9505_s23 = smov 256   ;;  %s9506_s24 = smov 16  }
  0x26   : > { %9106 = dma.hbm_to_vmem [thread:$0]  (!%p9603_p8), %s11145_s6, 512, %s262_s16, [#allocation8], %s9505_s23, %s9505_s23, %s9506_s24  }
  0x27   : > { %s9629_s27 = sadd.s32 1, %s9499_s30   ;;  %s56_s13 = sadd.s32 1, %s9495_s29 }
  0x28   : > { %s53_s12 = ssub.s32 %s9499_s30, %s9629_s27  ;;  %p63_p3 = scmp.ne.s32.totalorder %s9495_s29, %s9491_s28 }
  0x29   : > { %p54_p9 = scmp.eq.s32.totalorder %s53_s12, 0  ;;  %p64_p7 = scmp.eq.s32.totalorder %s9499_s30, 0 }
  0x2a   : > { %p9113_p11 = scmp.lt.s32.totalorder %s9499_s30, 3  ;;  %s287_s17 = sand.u32 1, %s9495_s29  }
  0x2b   : > { %s9638_s15 = scalar_select %p54_p9, %s9495_s29, %s56_s13  }
  0x2c   : > { %p65_p10 = por %p64_p7, %p63_p3  ;;  %s8618_s20 = sshll.u32 %s9499_s30, 16 }
  0x2d   : > { %s7943_s21 = sshll.u32 %s287_s17, 12  ;;  %s9646_s25 = scalar_lea.hbm %s11140_s1, %s8618_s20 }
  0x2e   : > { %s291_s16 = scalar_lea.vmem [#allocation4], %s7943_s21  ;;  %p9648_p8 = pnand %p9113_p11, %p65_p10 }
  0x2f   : > { %s299_s23 = sshll.u32 %s291_s16, 4  ;;  %s9654_s26 = scalar_lea.sflag [#allocation5], %s287_s17  ;;  %s9652_s23 = int_to_ptr.vmem [resolvable:$true] %s299_s23 }
  0x30   : > { %s9405_s30 = scalar_lea.hbm %s9646_s25, 65536  ;;  %p9407_p13 = pneg %p9648_p8 }
  0x31   : > { %p9406_p12 = scmp.ne.s32.totalorder %s9646_s25, %s9405_s30  ;;  %s9410_s20 = scalar_lea.hbm %s11140_s1, 196608 }
  0x32   : > { %p9411_p9 = scmp.lt.s32.totalorder %s9646_s25, %s11140_s1  ;;  %p9412_p3 = scmp.lt.s32.totalorder %s9410_s20, %s9405_s30 }
  0x33   : > { %p9408_p0 = pnand %p9407_p13, %p9406_p12 }
  0x34   : > { %p9413_p7 = por %p9412_p3, %p9411_p9 }
  0x35   : > { %p9409_p2 = pneg %p9408_p0 }
  0x37   : > { %p9414_p10 = pnand %p9413_p7, %p9409_p2 }
  0x39   : > { %9417 = shalt.err (!%p9414_p10)
}
  0x3a   : > { %s9418_s17 = scalar_lea.vmem %s9652_s23, 65536  ;;  %s9507_s22 = smov [#allocation4]  }
  0x3b   : > { %p9419_p11 = scmp.ne.s32.totalorder %s9652_s23, %s9418_s17  ;;  %s9423_s16 = sshll.u32 %s9507_s22, 4  ;;  %s9424_s16 = int_to_ptr.vmem [resolvable:$false] %s9423_s16 }
  0x3c   : > { %s9425_s12 = scalar_lea.vmem %s9424_s16, 131072  ;;  %p9426_p0 = scmp.lt.s32.totalorder %s9652_s23, %s9424_s16 }
  0x3d   : > { %p9421_p4 = pnand %p9419_p11, %p9407_p13  ;;  %p9427_p1 = scmp.lt.s32.totalorder %s9425_s12, %s9418_s17 }
  0x3f   : > { %p9422_p12 = pneg %p9421_p4  ;;  %p9428_p5 = por %p9427_p1, %p9426_p0 }
  0x41   : > { %p9429_p6 = pnand %p9428_p5, %p9422_p12 }
  0x43   : > { %9432 = shalt.err (!%p9429_p6)
}
  0x44   : > { %9110 = dma.hbm_to_vmem [thread:$0]  (!%p9648_p8), %s9646_s25, 65536, %s9652_s23, %s9654_s26, %s9503_s18, %s9503_s18, %s9504_s19  }
  0x45   : > { %p11155_p4 = scmp.ne.s32.totalorder %s11152_s11, 0 }
  0x46   : > { %s313_s30 = sand.u32 (!%p11155_p4), 1, %s9491_s28   ;;  %p11156_p1 = scmp.ne.s32.totalorder (!%p11155_p4), %s11151_s10, 0 }
  0x47   : > { %311 = sbr.rel (%p11155_p4) target bundleno = 9150 (0x23be), region = 52  ;;  %s7948_s13 = sshll.u32 (!%p11155_p4), %s313_s30, 12 }
  0x48   : > { %s314_s20 = scalar_lea.sflag (!%p11155_p4), [#allocation5], %s313_s30  ;;  %s9681_s21 = scalar_lea.vmem (!%p11155_p4), [#allocation4], %s7948_s13 }
  0x4c   : > { %9474 = dma.done.wait (%p11156_p1), %s314_s20, 65536  }
  0x4d   : > { %9476 = vsyncadd (%p11156_p1), %s314_s20, 4294901760  ;;  %p11157_p5 = scmp.eq.s32.totalorder %s9582_s9, 0 }
  0x4f   : > { %9478 = dma.done.wait (%p11157_p5), [#allocation8], 8704   ;;  %p11158_p6 = pmov %p11157_p5 }
  0x50   : > { %s7951_s11 = sshll.u32 %s9582_s9, 3  ;;  %p11159_p13 = scmp.ne.s32.totalorder %s9582_s9, 0 }
  0x51   : > { %9480 = vsyncadd (%p11158_p6), [#allocation8], 4294958592  ;;  %p359_p8 = scmp.lt.s32.totalorder %s7951_s11, 23 }
  0x52   : > { %369 = sbr.rel (%p11159_p13) target bundleno = 92 (0x5c), region = 68 }
  0x53   : > { %s11166_s11 = smov (!%p359_p8, %s7951_s11), 23 }
  0x54   : > { %s7952_s18 = sshll.u32 %s11166_s11, 2 }
  0x55   : > { %s9695_s23 = scalar_lea.vmem %s11139_s0, %s7952_s18 }
  0x57   : > { %v9508_v0 = vmov 0.0  }
  0x58   : > { %370 = vst [vmem:[#allocation2 + $0x30] sm:$0xff] %v9508_v0  ;;  %371 = vst [vmem:[#allocation2] sm:$0xff] %v9508_v0 }
  0x59   : > { %372 = vst [vmem:[#allocation2 + $0x18] sm:$0xff] %v9508_v0  ;;  %373 = vst [vmem:[#allocation2 + $0x10] sm:$0xff] %v9508_v0 }
  0x5a   : > { %374 = vst [vmem:[#allocation2 + $0x8] sm:$0xff] %v9508_v0  ;;  %375 = vst [vmem:[#allocation2 + $0x20] sm:$0xff] %v9508_v0 }
  0x5b   : > { %376 = vst [vmem:[#allocation2 + $0x28] sm:$0xff] %v9508_v0  ;;  %377 = vst [vmem:[#allocation2 + $0x38] sm:$0xff] %v9508_v0 }
  0x5c PF: > { %v446_v1 = vld [vmem:[%s9681_s21 + $0x1c0] sm:$0xff]  ;;  %v9728_v54 = vld [vmem:[%s9695_s23] sm:$0xff]  ;;  %v9731_v55 = vld [vmem:[%s9695_s23 + $0x8] sm:$0xff]  ;;  %p8474_p2 = scmp.ne.s32.totalorder %s9582_s9, 2 }
  0x5d   : > { %v450_v2 = vld [vmem:[%s9681_s21 + $0x1e0] sm:$0xff]  ;;  %v9737_v59 = vcombine.high %v9728_v54, %v9728_v54  ;;  %v9741_v60 = vcombine.high %v9731_v55, %v9731_v55  ;;  %s9510_s26 = smov (!%p8474_p2), 64   ;;  %s9511_s12 = smov (!%p8474_p2), 48  }
  0x5e   : > { %v574_v3 = vld [vmem:[%s9681_s21 + $0x5c0] sm:$0xff]  ;;  %v8019_v4 = vcombine.high %v446_v1, %v450_v2  ;;  %v8018_v6 = vcombine.low %v446_v1, %v450_v2  ;;  %s9512_s30 = smov (!%p8474_p2), 32   ;;  %s9513_s13 = smov (!%p8474_p2), 112  }
  0x5f   : > { %v578_v5 = vld [vmem:[%s9681_s21 + $0x5e0] sm:$0xff]  ;;  %3522 = vmatprep.mubr.bf16.mxu0 %v9737_v59  ;;  %3563 = vmatprep.mubr.bf16.mxu1 %v9741_v60  ;;  %s9514_s20 = smov (!%p8474_p2), 96   ;;  %s9516_s11 = smov (!%p8474_p2), 80  }
  0x60   : > { %v438_v7 = vld [vmem:[%s9681_s21 + $0x180] sm:$0xff]  ;;  %v8147_v9 = vcombine.high %v574_v3, %v578_v5  ;;  %v8146_v10 = vcombine.low %v574_v3, %v578_v5  ;;  %3490 = vmatprep.subr.bf16.mxu0 %v8019_v4 }
  0x61   : > { %v442_v8 = vld [vmem:[%s9681_s21 + $0x1a0] sm:$0xff]  ;;  %3491 = vmatpush1.bf16.msra.mxu0 %v8018_v6 }
  0x62   : > { %v8011_v11 = vcombine.high %v438_v7, %v442_v8  ;;  %v566_v12 = vld [vmem:[%s9681_s21 + $0x580] sm:$0xff]  ;;  %3531 = vmatprep.subr.bf16.mxu1 %v8147_v9  ;;  %v8010_v19 = vcombine.low %v438_v7, %v442_v8 }
  0x63   : > { %v570_v13 = vld [vmem:[%s9681_s21 + $0x5a0] sm:$0xff]  ;;  %3532 = vmatpush1.bf16.msra.mxu1 %v8146_v10 }
  0x64   : > { %v430_v14 = vld [vmem:[%s9681_s21 + $0x140] sm:$0xff]  ;;  %v8139_v15 = vcombine.high %v566_v12, %v570_v13  ;;  %3492 = vmatprep.subr.bf16.mxu0 %v8011_v11  ;;  %v8138_v20 = vcombine.low %v566_v12, %v570_v13 }
  0x65   : > { %v434_v16 = vld [vmem:[%s9681_s21 + $0x160] sm:$0xff]  ;;  %3493 = vmatpush1.bf16.msra.mxu0 %v8010_v19 }
  0x66   : > { %v558_v17 = vld [vmem:[%s9681_s21 + $0x540] sm:$0xff]  ;;  %v8003_v21 = vcombine.high %v430_v14, %v434_v16  ;;  %3533 = vmatprep.subr.bf16.mxu1 %v8139_v15  ;;  %v8002_v27 = vcombine.low %v430_v14, %v434_v16 }
  0x67   : > { %v562_v18 = vld [vmem:[%s9681_s21 + $0x560] sm:$0xff]  ;;  %3534 = vmatpush1.bf16.msra.mxu1 %v8138_v20 }
  0x68   : > { %v8131_v22 = vcombine.high %v558_v17, %v562_v18  ;;  %v422_v23 = vld [vmem:[%s9681_s21 + $0x100] sm:$0xff]  ;;  %3494 = vmatprep.subr.bf16.mxu0 %v8003_v21  ;;  %v8130_v28 = vcombine.low %v558_v17, %v562_v18 }
  0x69   : > { %v426_v24 = vld [vmem:[%s9681_s21 + $0x120] sm:$0xff]  ;;  %3495 = vmatpush1.bf16.msra.mxu0 %v8002_v27 }
  0x6a   : > { %v550_v25 = vld [vmem:[%s9681_s21 + $0x500] sm:$0xff]  ;;  %v7995_v29 = vcombine.high %v422_v23, %v426_v24  ;;  %3535 = vmatprep.subr.bf16.mxu1 %v8131_v22  ;;  %v7994_v35 = vcombine.low %v422_v23, %v426_v24 }
  0x6b   : > { %v554_v26 = vld [vmem:[%s9681_s21 + $0x520] sm:$0xff]  ;;  %3536 = vmatpush1.bf16.msra.mxu1 %v8130_v28 }
  0x6c   : > { %v8123_v30 = vcombine.high %v550_v25, %v554_v26  ;;  %v414_v31 = vld [vmem:[%s9681_s21 + $0xc0] sm:$0xff]  ;;  %3496 = vmatprep.subr.bf16.mxu0 %v7995_v29  ;;  %v8122_v36 = vcombine.low %v550_v25, %v554_v26 }
  0x6d   : > { %v418_v32 = vld [vmem:[%s9681_s21 + $0xe0] sm:$0xff]  ;;  %3497 = vmatpush1.bf16.msra.mxu0 %v7994_v35 }
  0x6e   : > { %v542_v33 = vld [vmem:[%s9681_s21 + $0x4c0] sm:$0xff]  ;;  %v7987_v37 = vcombine.high %v414_v31, %v418_v32  ;;  %3537 = vmatprep.subr.bf16.mxu1 %v8123_v30  ;;  %v7986_v43 = vcombine.low %v414_v31, %v418_v32 }
  0x6f   : > { %v546_v34 = vld [vmem:[%s9681_s21 + $0x4e0] sm:$0xff]  ;;  %3538 = vmatpush1.bf16.msra.mxu1 %v8122_v36 }
  0x70   : > { %v8115_v38 = vcombine.high %v542_v33, %v546_v34  ;;  %v406_v39 = vld [vmem:[%s9681_s21 + $0x80] sm:$0xff]  ;;  %3498 = vmatprep.subr.bf16.mxu0 %v7987_v37  ;;  %v8114_v44 = vcombine.low %v542_v33, %v546_v34 }
  0x71   : > { %v410_v40 = vld [vmem:[%s9681_s21 + $0xa0] sm:$0xff]  ;;  %3499 = vmatpush1.bf16.msra.mxu0 %v7986_v43 }
  0x72   : > { %v534_v41 = vld [vmem:[%s9681_s21 + $0x480] sm:$0xff]  ;;  %v7979_v45 = vcombine.high %v406_v39, %v410_v40  ;;  %3539 = vmatprep.subr.bf16.mxu1 %v8115_v38  ;;  %v7978_v51 = vcombine.low %v406_v39, %v410_v40 }
  0x73   : > { %v538_v42 = vld [vmem:[%s9681_s21 + $0x4a0] sm:$0xff]  ;;  %3540 = vmatpush1.bf16.msra.mxu1 %v8114_v44 }
  0x74   : > { %v8107_v46 = vcombine.high %v534_v41, %v538_v42  ;;  %v398_v47 = vld [vmem:[%s9681_s21 + $0x40] sm:$0xff]  ;;  %3500 = vmatprep.subr.bf16.mxu0 %v7979_v45  ;;  %v8106_v52 = vcombine.low %v534_v41, %v538_v42 }
  0x75   : > { %v402_v48 = vld [vmem:[%s9681_s21 + $0x60] sm:$0xff]  ;;  %3501 = vmatpush1.bf16.msra.mxu0 %v7978_v51 }
  0x76   : > { %v526_v49 = vld [vmem:[%s9681_s21 + $0x440] sm:$0xff]  ;;  %v7971_v53 = vcombine.high %v398_v47, %v402_v48  ;;  %3541 = vmatprep.subr.bf16.mxu1 %v8107_v46  ;;  %v7970_v63 = vcombine.low %v398_v47, %v402_v48 }
  0x77   : > { %v530_v50 = vld [vmem:[%s9681_s21 + $0x460] sm:$0xff]  ;;  %3542 = vmatpush1.bf16.msra.mxu1 %v8106_v52 }
  0x78   : > { %v8099_v56 = vcombine.high %v526_v49, %v530_v50  ;;  %v390_v57 = vld [vmem:[%s9681_s21] sm:$0xff]  ;;  %3502 = vmatprep.subr.bf16.mxu0 %v7971_v53  ;;  %v8098_v0 = vcombine.low %v526_v49, %v530_v50 }
  0x79   : > { %v394_v58 = vld [vmem:[%s9681_s21 + $0x20] sm:$0xff]  ;;  %3503 = vmatpush1.bf16.msra.mxu0 %v7970_v63 }
  0x7a   : > { %v518_v61 = vld [vmem:[%s9681_s21 + $0x400] sm:$0xff]  ;;  %v7963_v1 = vcombine.high %v390_v57, %v394_v58  ;;  %3543 = vmatprep.subr.bf16.mxu1 %v8099_v56  ;;  %v7962_v7 = vcombine.low %v390_v57, %v394_v58 }
  0x7b   : > { %v522_v62 = vld [vmem:[%s9681_s21 + $0x420] sm:$0xff]  ;;  %3544 = vmatpush1.bf16.msra.mxu1 %v8098_v0 }
  0x7c   : > { %v8091_v2 = vcombine.high %v518_v61, %v522_v62  ;;  %v510_v3 = vld [vmem:[%s9681_s21 + $0x3c0] sm:$0xff]  ;;  %3504 = vmatprep.subr.bf16.mxu0 %v7963_v1  ;;  %v8090_v8 = vcombine.low %v518_v61, %v522_v62 }
  0x7d   : > { %v514_v4 = vld [vmem:[%s9681_s21 + $0x3e0] sm:$0xff]  ;;  %3505 = vmatpush1.bf16.msra.mxu0 %v7962_v7 }
  0x7e   : > { %v638_v5 = vld [vmem:[%s9681_s21 + $0x7c0] sm:$0xff]  ;;  %v8083_v9 = vcombine.high %v510_v3, %v514_v4  ;;  %3545 = vmatprep.subr.bf16.mxu1 %v8091_v2  ;;  %v8082_v15 = vcombine.low %v510_v3, %v514_v4 }
  0x7f   : > { %v642_v6 = vld [vmem:[%s9681_s21 + $0x7e0] sm:$0xff]  ;;  %3546 = vmatpush1.bf16.msra.mxu1 %v8090_v8 }
  0x80   : > { %v8211_v10 = vcombine.high %v638_v5, %v642_v6  ;;  %v502_v11 = vld [vmem:[%s9681_s21 + $0x380] sm:$0xff]  ;;  %3506 = vmatprep.subr.bf16.mxu0 %v8083_v9  ;;  %v8210_v16 = vcombine.low %v638_v5, %v642_v6 }
  0x81   : > { %v506_v12 = vld [vmem:[%s9681_s21 + $0x3a0] sm:$0xff]  ;;  %3507 = vmatpush2.bf16.msra.mxu0 %v8082_v15 }
  0x82   : > { %v630_v13 = vld [vmem:[%s9681_s21 + $0x780] sm:$0xff]  ;;  %v8075_v17 = vcombine.high %v502_v11, %v506_v12  ;;  %3547 = vmatprep.subr.bf16.mxu1 %v8211_v10  ;;  %v8074_v23 = vcombine.low %v502_v11, %v506_v12 }
  0x83   : > { %v634_v14 = vld [vmem:[%s9681_s21 + $0x7a0] sm:$0xff]  ;;  %3548 = vmatpush2.bf16.msra.mxu1 %v8210_v16 }
  0x84   : > { %v8203_v18 = vcombine.high %v630_v13, %v634_v14  ;;  %v494_v19 = vld [vmem:[%s9681_s21 + $0x340] sm:$0xff]  ;;  %3508 = vmatprep.subr.bf16.mxu0 %v8075_v17  ;;  %v8202_v24 = vcombine.low %v630_v13, %v634_v14  ;;  %v9787_v17 = vcombine.low %v9728_v54, %v9728_v54 }
  0x85   : > { %v498_v20 = vld [vmem:[%s9681_s21 + $0x360] sm:$0xff]  ;;  %3509 = vmatpush2.bf16.msra.mxu0 %v8074_v23  ;;  %v9799_v23 = vld [vmem:[%s9695_s23 + $0x18] sm:$0xff] }
  0x86   : > { %v622_v21 = vld [vmem:[%s9681_s21 + $0x740] sm:$0xff]  ;;  %v8067_v25 = vcombine.high %v494_v19, %v498_v20  ;;  %3549 = vmatprep.subr.bf16.mxu1 %v8203_v18  ;;  %v8066_v31 = vcombine.low %v494_v19, %v498_v20 }
  0x87   : > { %v626_v22 = vld [vmem:[%s9681_s21 + $0x760] sm:$0xff]  ;;  %3550 = vmatpush2.bf16.msra.mxu1 %v8202_v24 }
  0x88   : > { %v8195_v26 = vcombine.high %v622_v21, %v626_v22  ;;  %v486_v27 = vld [vmem:[%s9681_s21 + $0x300] sm:$0xff]  ;;  %3510 = vmatprep.subr.bf16.mxu0 %v8067_v25  ;;  %v8194_v32 = vcombine.low %v622_v21, %v626_v22  ;;  %v9796_v21 = vcombine.low %v9731_v55, %v9731_v55 }
  0x89   : > { %v490_v28 = vld [vmem:[%s9681_s21 + $0x320] sm:$0xff]  ;;  %3511 = vmatpush2.bf16.msra.mxu0 %v8066_v31 }
  0x8a   : > { %v614_v29 = vld [vmem:[%s9681_s21 + $0x700] sm:$0xff]  ;;  %v8059_v33 = vcombine.high %v486_v27, %v490_v28  ;;  %3551 = vmatprep.subr.bf16.mxu1 %v8195_v26  ;;  %v8058_v39 = vcombine.low %v486_v27, %v490_v28 }
  0x8b   : > { %v618_v30 = vld [vmem:[%s9681_s21 + $0x720] sm:$0xff]  ;;  %3552 = vmatpush2.bf16.msra.mxu1 %v8194_v32 }
  0x8c   : > { %v8187_v34 = vcombine.high %v614_v29, %v618_v30  ;;  %v478_v35 = vld [vmem:[%s9681_s21 + $0x2c0] sm:$0xff]  ;;  %3512 = vmatprep.subr.bf16.mxu0 %v8059_v33  ;;  %v8186_v40 = vcombine.low %v614_v29, %v618_v30  ;;  %v9812_v30 = vcombine.high %v9799_v23, %v9799_v23 }
  0x8d   : > { %v482_v36 = vld [vmem:[%s9681_s21 + $0x2e0] sm:$0xff]  ;;  %3513 = vmatpush2.bf16.msra.mxu0 %v8058_v39 }
  0x8e   : > { %v606_v37 = vld [vmem:[%s9681_s21 + $0x6c0] sm:$0xff]  ;;  %v8051_v41 = vcombine.high %v478_v35, %v482_v36  ;;  %3553 = vmatprep.subr.bf16.mxu1 %v8187_v34  ;;  %v8050_v47 = vcombine.low %v478_v35, %v482_v36 }
  0x8f   : > { %v610_v38 = vld [vmem:[%s9681_s21 + $0x6e0] sm:$0xff]  ;;  %3554 = vmatpush2.bf16.msra.mxu1 %v8186_v40 }
  0x90   : > { %v8179_v42 = vcombine.high %v606_v37, %v610_v38  ;;  %v470_v43 = vld [vmem:[%s9681_s21 + $0x280] sm:$0xff]  ;;  %3514 = vmatprep.subr.bf16.mxu0 %v8051_v41  ;;  %v8178_v48 = vcombine.low %v606_v37, %v610_v38 }
  0x91   : > { %v474_v44 = vld [vmem:[%s9681_s21 + $0x2a0] sm:$0xff]  ;;  %3515 = vmatpush2.bf16.msra.mxu0 %v8050_v47 }
  0x92   : > { %v598_v45 = vld [vmem:[%s9681_s21 + $0x680] sm:$0xff]  ;;  %v8043_v49 = vcombine.high %v470_v43, %v474_v44  ;;  %3555 = vmatprep.subr.bf16.mxu1 %v8179_v42  ;;  %v8042_v57 = vcombine.low %v470_v43, %v474_v44 }
  0x93   : > { %v602_v46 = vld [vmem:[%s9681_s21 + $0x6a0] sm:$0xff]  ;;  %3556 = vmatpush2.bf16.msra.mxu1 %v8178_v48 }
  0x94   : > { %v8171_v50 = vcombine.high %v598_v45, %v602_v46  ;;  %v462_v51 = vld [vmem:[%s9681_s21 + $0x240] sm:$0xff]  ;;  %3516 = vmatprep.subr.bf16.mxu0 %v8043_v49  ;;  %v8170_v58 = vcombine.low %v598_v45, %v602_v46 }
  0x95   : > { %v466_v52 = vld [vmem:[%s9681_s21 + $0x260] sm:$0xff]  ;;  %3517 = vmatpush2.bf16.msra.mxu0 %v8042_v57 }
  0x96   : > { %v590_v53 = vld [vmem:[%s9681_s21 + $0x640] sm:$0xff]  ;;  %v8035_v61 = vcombine.high %v462_v51, %v466_v52  ;;  %3557 = vmatprep.subr.bf16.mxu1 %v8171_v50  ;;  %v8034_v3 = vcombine.low %v462_v51, %v466_v52 }
  0x97   : > { %v594_v56 = vld [vmem:[%s9681_s21 + $0x660] sm:$0xff]  ;;  %3558 = vmatpush2.bf16.msra.mxu1 %v8170_v58 }
  0x98   : > { %v8163_v62 = vcombine.high %v590_v53, %v594_v56  ;;  %v454_v63 = vld [vmem:[%s9681_s21 + $0x200] sm:$0xff]  ;;  %3518 = vmatprep.subr.bf16.mxu0 %v8035_v61  ;;  %v8162_v4 = vcombine.low %v590_v53, %v594_v56 }
  0x99   : > { %v458_v0 = vld [vmem:[%s9681_s21 + $0x220] sm:$0xff]  ;;  %3519 = vmatpush2.bf16.msra.mxu0 %v8034_v3 }
  0x9a   : > { %v582_v1 = vld [vmem:[%s9681_s21 + $0x600] sm:$0xff]  ;;  %v8027_v5 = vcombine.high %v454_v63, %v458_v0  ;;  %3559 = vmatprep.subr.bf16.mxu1 %v8163_v62  ;;  %v8026_v11 = vcombine.low %v454_v63, %v458_v0 }
  0x9b   : > { %v586_v2 = vld [vmem:[%s9681_s21 + $0x620] sm:$0xff]  ;;  %3560 = vmatpush2.bf16.msra.mxu1 %v8162_v4 }
  0x9c   : > { %v8155_v6 = vcombine.high %v582_v1, %v586_v2  ;;  %v702_v7 = vld [vmem:[%s9681_s21 + $0x9c0] sm:$0xff]  ;;  %3520 = vmatprep.subr.bf16.mxu0 %v8027_v5  ;;  %v8154_v12 = vcombine.low %v582_v1, %v586_v2 }
  0x9d   : > { %v706_v8 = vld [vmem:[%s9681_s21 + $0x9e0] sm:$0xff]  ;;  %3521 = vmatpush2.bf16.msra.mxu0 %v8026_v11 }
  0x9e   : > { %v830_v9 = vld [vmem:[%s9681_s21 + $0xdc0] sm:$0xff]  ;;  %v8275_v13 = vcombine.high %v702_v7, %v706_v8  ;;  %3561 = vmatprep.subr.bf16.mxu1 %v8155_v6  ;;  %v8274_v22 = vcombine.low %v702_v7, %v706_v8 }
  0x9f   : > { %v834_v10 = vld [vmem:[%s9681_s21 + $0xde0] sm:$0xff]  ;;  %3562 = vmatpush2.bf16.msra.mxu1 %v8154_v12 }
  0xa0   : > { %v8403_v14 = vcombine.high %v830_v9, %v834_v10  ;;  %v694_v15 = vld [vmem:[%s9681_s21 + $0x980] sm:$0xff]  ;;  %3572 = vmatprep.subr.bf16.mxu0 %v8275_v13  ;;  %v8402_v24 = vcombine.low %v830_v9, %v834_v10  ;;  %3523 = vmatmul.mubr.bf16.vlgmr.msra.gmra.mxu0 %v9787_v17 }
  0xa1   : > { %v698_v16 = vld [vmem:[%s9681_s21 + $0x9a0] sm:$0xff]  ;;  %3573 = vmatpush1.bf16.msra.mxu0 %v8274_v22 }
  0xa2   : > { %v822_v18 = vld [vmem:[%s9681_s21 + $0xd80] sm:$0xff]  ;;  %v8267_v25 = vcombine.high %v694_v15, %v698_v16  ;;  %3613 = vmatprep.subr.bf16.mxu1 %v8403_v14  ;;  %3564 = vmatmul.mubr.bf16.vlgmr.msra.gmra.mxu1 %v9796_v21  ;;  %v8266_v31 = vcombine.low %v694_v15, %v698_v16 }
  0xa3   : > { %v826_v19 = vld [vmem:[%s9681_s21 + $0xda0] sm:$0xff]  ;;  %3614 = vmatpush1.bf16.msra.mxu1 %v8402_v24  ;;  %3645 = vmatprep.mubr.bf16.mxu1 %v9812_v30 }
  0xa4   : > { %v9792_v20 = vld [vmem:[%s9695_s23 + $0x10] sm:$0xff]  ;;  %v8395_v54 = vcombine.high %v822_v18, %v826_v19  ;;  %3574 = vmatprep.subr.bf16.mxu0 %v8267_v25  ;;  %v8394_v32 = vcombine.low %v822_v18, %v826_v19 }
  0xa5   : > { %v686_v26 = vld [vmem:[%s9681_s21 + $0x940] sm:$0xff]  ;;  %v9805_v28 = vcombine.high %v9792_v20, %v9792_v20  ;;  %3575 = vmatpush1.bf16.msra.mxu0 %v8266_v31 }
  0xa6   : > { %v690_v27 = vld [vmem:[%s9681_s21 + $0x960] sm:$0xff]  ;;  %3615 = vmatprep.subr.bf16.mxu1 %v8395_v54 }
  0xa7   : > { %v814_v55 = vld [vmem:[%s9681_s21 + $0xd40] sm:$0xff]  ;;  %v8259_v33 = vcombine.high %v686_v26, %v690_v27  ;;  %3604 = vmatprep.mubr.bf16.mxu0 %v9805_v28  ;;  %v8258_v39 = vcombine.low %v686_v26, %v690_v27  ;;  %3616 = vmatpush1.bf16.msra.mxu1 %v8394_v32 }
  0xa8   : > { %v818_v29 = vld [vmem:[%s9681_s21 + $0xd60] sm:$0xff] }
  0xa9   : > { %v8387_v34 = vcombine.high %v814_v55, %v818_v29  ;;  %v678_v35 = vld [vmem:[%s9681_s21 + $0x900] sm:$0xff]  ;;  %3576 = vmatprep.subr.bf16.mxu0 %v8259_v33  ;;  %v8386_v40 = vcombine.low %v814_v55, %v818_v29 }
  0xaa   : > { %v682_v36 = vld [vmem:[%s9681_s21 + $0x920] sm:$0xff]  ;;  %3577 = vmatpush1.bf16.msra.mxu0 %v8258_v39 }
  0xab   : > { %v806_v37 = vld [vmem:[%s9681_s21 + $0xd00] sm:$0xff]  ;;  %v8251_v41 = vcombine.high %v678_v35, %v682_v36  ;;  %3617 = vmatprep.subr.bf16.mxu1 %v8387_v34  ;;  %v8250_v47 = vcombine.low %v678_v35, %v682_v36 }
  0xac   : > { %v810_v38 = vld [vmem:[%s9681_s21 + $0xd20] sm:$0xff]  ;;  %3618 = vmatpush1.bf16.msra.mxu1 %v8386_v40 }
  0xad   : > { %v8379_v42 = vcombine.high %v806_v37, %v810_v38  ;;  %v670_v43 = vld [vmem:[%s9681_s21 + $0x8c0] sm:$0xff]  ;;  %3578 = vmatprep.subr.bf16.mxu0 %v8251_v41  ;;  %v8378_v48 = vcombine.low %v806_v37, %v810_v38 }
  0xae   : > { %v674_v44 = vld [vmem:[%s9681_s21 + $0x8e0] sm:$0xff]  ;;  %3579 = vmatpush1.bf16.msra.mxu0 %v8250_v47 }
  0xaf   : > { %v798_v45 = vld [vmem:[%s9681_s21 + $0xcc0] sm:$0xff]  ;;  %v8243_v49 = vcombine.high %v670_v43, %v674_v44  ;;  %3619 = vmatprep.subr.bf16.mxu1 %v8379_v42  ;;  %v8242_v57 = vcombine.low %v670_v43, %v674_v44 }
  0xb0   : > { %v802_v46 = vld [vmem:[%s9681_s21 + $0xce0] sm:$0xff]  ;;  %3620 = vmatpush1.bf16.msra.mxu1 %v8378_v48 }
  0xb1   : > { %v8371_v50 = vcombine.high %v798_v45, %v802_v46  ;;  %v662_v51 = vld [vmem:[%s9681_s21 + $0x880] sm:$0xff]  ;;  %3580 = vmatprep.subr.bf16.mxu0 %v8243_v49  ;;  %v8370_v58 = vcombine.low %v798_v45, %v802_v46 }
  0xb2   : > { %v666_v52 = vld [vmem:[%s9681_s21 + $0x8a0] sm:$0xff]  ;;  %3581 = vmatpush1.bf16.msra.mxu0 %v8242_v57 }
  0xb3   : > { %v790_v53 = vld [vmem:[%s9681_s21 + $0xc80] sm:$0xff]  ;;  %v8235_v61 = vcombine.high %v662_v51, %v666_v52  ;;  %3621 = vmatprep.subr.bf16.mxu1 %v8371_v50  ;;  %v8234_v3 = vcombine.low %v662_v51, %v666_v52 }
  0xb4   : > { %v794_v56 = vld [vmem:[%s9681_s21 + $0xca0] sm:$0xff]  ;;  %3622 = vmatpush1.bf16.msra.mxu1 %v8370_v58 }
  0xb5   : > { %v8363_v62 = vcombine.high %v790_v53, %v794_v56  ;;  %v654_v63 = vld [vmem:[%s9681_s21 + $0x840] sm:$0xff]  ;;  %3582 = vmatprep.subr.bf16.mxu0 %v8235_v61  ;;  %v8362_v4 = vcombine.low %v790_v53, %v794_v56 }
  0xb6   : > { %v658_v0 = vld [vmem:[%s9681_s21 + $0x860] sm:$0xff]  ;;  %3583 = vmatpush1.bf16.msra.mxu0 %v8234_v3 }
  0xb7   : > { %v782_v1 = vld [vmem:[%s9681_s21 + $0xc40] sm:$0xff]  ;;  %v8227_v5 = vcombine.high %v654_v63, %v658_v0  ;;  %3623 = vmatprep.subr.bf16.mxu1 %v8363_v62  ;;  %v8226_v11 = vcombine.low %v654_v63, %v658_v0 }
  0xb8   : > { %v786_v2 = vld [vmem:[%s9681_s21 + $0xc60] sm:$0xff]  ;;  %3624 = vmatpush1.bf16.msra.mxu1 %v8362_v4 }
  0xb9   : > { %v8355_v6 = vcombine.high %v782_v1, %v786_v2  ;;  %v646_v7 = vld [vmem:[%s9681_s21 + $0x800] sm:$0xff]  ;;  %3584 = vmatprep.subr.bf16.mxu0 %v8227_v5  ;;  %v8354_v12 = vcombine.low %v782_v1, %v786_v2 }
  0xba   : > { %v650_v8 = vld [vmem:[%s9681_s21 + $0x820] sm:$0xff]  ;;  %3585 = vmatpush1.bf16.msra.mxu0 %v8226_v11 }
  0xbb   : > { %v774_v9 = vld [vmem:[%s9681_s21 + $0xc00] sm:$0xff]  ;;  %v8219_v13 = vcombine.high %v646_v7, %v650_v8  ;;  %3625 = vmatprep.subr.bf16.mxu1 %v8355_v6  ;;  %v8218_v22 = vcombine.low %v646_v7, %v650_v8 }
  0xbc   : > { %v778_v10 = vld [vmem:[%s9681_s21 + $0xc20] sm:$0xff]  ;;  %3626 = vmatpush1.bf16.msra.mxu1 %v8354_v12 }
  0xbd   : > { %v8347_v14 = vcombine.high %v774_v9, %v778_v10  ;;  %v766_v15 = vld [vmem:[%s9681_s21 + $0xbc0] sm:$0xff]  ;;  %3586 = vmatprep.subr.bf16.mxu0 %v8219_v13  ;;  %v8346_v24 = vcombine.low %v774_v9, %v778_v10 }
  0xbe   : > { %v770_v16 = vld [vmem:[%s9681_s21 + $0xbe0] sm:$0xff]  ;;  %3587 = vmatpush1.bf16.msra.mxu0 %v8218_v22 }
  0xbf   : > { %v894_v18 = vld [vmem:[%s9681_s21 + $0xfc0] sm:$0xff]  ;;  %v8339_v25 = vcombine.high %v766_v15, %v770_v16  ;;  %3627 = vmatprep.subr.bf16.mxu1 %v8347_v14  ;;  %v8338_v31 = vcombine.low %v766_v15, %v770_v16 }
  0xc0   : > { %v898_v19 = vld [vmem:[%s9681_s21 + $0xfe0] sm:$0xff]  ;;  %3628 = vmatpush1.bf16.msra.mxu1 %v8346_v24 }
  0xc1   : > { %v8467_v54 = vcombine.high %v894_v18, %v898_v19  ;;  %v758_v26 = vld [vmem:[%s9681_s21 + $0xb80] sm:$0xff]  ;;  %3588 = vmatprep.subr.bf16.mxu0 %v8339_v25  ;;  %v8466_v32 = vcombine.low %v894_v18, %v898_v19 }
  0xc2   : > { %v762_v27 = vld [vmem:[%s9681_s21 + $0xba0] sm:$0xff]  ;;  %3589 = vmatpush2.bf16.msra.mxu0 %v8338_v31 }
  0xc3   : > { %v886_v55 = vld [vmem:[%s9681_s21 + $0xf80] sm:$0xff]  ;;  %v8331_v33 = vcombine.high %v758_v26, %v762_v27  ;;  %3629 = vmatprep.subr.bf16.mxu1 %v8467_v54  ;;  %v8330_v39 = vcombine.low %v758_v26, %v762_v27  ;;  %v447_v26 = vld [vmem:[%s9681_s21 + $0x1c8] sm:$0xff] }
  0xc4   : > { %v890_v29 = vld [vmem:[%s9681_s21 + $0xfa0] sm:$0xff]  ;;  %3630 = vmatpush2.bf16.msra.mxu1 %v8466_v32  ;;  %v451_v27 = vld [vmem:[%s9681_s21 + $0x1e8] sm:$0xff] }
  0xc5   : > { %v8459_v34 = vcombine.high %v886_v55, %v890_v29  ;;  %v750_v35 = vld [vmem:[%s9681_s21 + $0xb40] sm:$0xff]  ;;  %3590 = vmatprep.subr.bf16.mxu0 %v8331_v33  ;;  %v8458_v40 = vcombine.low %v886_v55, %v890_v29  ;;  %v575_v55 = vld [vmem:[%s9681_s21 + $0x5c8] sm:$0xff]  ;;  %v8021_v33 = vcombine.high %v447_v26, %v451_v27 }
  0xc6   : > { %v754_v36 = vld [vmem:[%s9681_s21 + $0xb60] sm:$0xff]  ;;  %3591 = vmatpush2.bf16.msra.mxu0 %v8330_v39  ;;  %v579_v29 = vld [vmem:[%s9681_s21 + $0x5e8] sm:$0xff] }
  0xc7   : > { %v878_v37 = vld [vmem:[%s9681_s21 + $0xf40] sm:$0xff]  ;;  %v8323_v41 = vcombine.high %v750_v35, %v754_v36  ;;  %3631 = vmatprep.subr.bf16.mxu1 %v8459_v34  ;;  %v8322_v47 = vcombine.low %v750_v35, %v754_v36  ;;  %v8149_v34 = vcombine.high %v575_v55, %v579_v29  ;;  %v439_v35 = vld [vmem:[%s9681_s21 + $0x188] sm:$0xff] }
  0xc8   : > { %v882_v38 = vld [vmem:[%s9681_s21 + $0xf60] sm:$0xff]  ;;  %3632 = vmatpush2.bf16.msra.mxu1 %v8458_v40  ;;  %v443_v36 = vld [vmem:[%s9681_s21 + $0x1a8] sm:$0xff]  ;;  %v9883_v40 = vcombine.low %v9799_v23, %v9799_v23 }
  0xc9   : > { %v8451_v42 = vcombine.high %v878_v37, %v882_v38  ;;  %v742_v43 = vld [vmem:[%s9681_s21 + $0xb00] sm:$0xff]  ;;  %3592 = vmatprep.subr.bf16.mxu0 %v8323_v41  ;;  %v8450_v48 = vcombine.low %v878_v37, %v882_v38  ;;  %v9877_v37 = vcombine.low %v9792_v20, %v9792_v20  ;;  %v567_v38 = vld [vmem:[%s9681_s21 + $0x588] sm:$0xff]  ;;  %v8020_v41 = vcombine.low %v447_v26, %v451_v27 }
  0xca   : > { %v746_v44 = vld [vmem:[%s9681_s21 + $0xb20] sm:$0xff]  ;;  %3593 = vmatpush2.bf16.msra.mxu0 %v8322_v47  ;;  %v571_v39 = vld [vmem:[%s9681_s21 + $0x5a8] sm:$0xff]  ;;  %v8012_v23 = vcombine.low %v439_v35, %v443_v36 }
  0xcb   : > { %v870_v45 = vld [vmem:[%s9681_s21 + $0xf00] sm:$0xff]  ;;  %v8315_v49 = vcombine.high %v742_v43, %v746_v44  ;;  %3633 = vmatprep.subr.bf16.mxu1 %v8451_v42  ;;  %v8314_v57 = vcombine.low %v742_v43, %v746_v44  ;;  %v8148_v42 = vcombine.low %v575_v55, %v579_v29  ;;  %v8013_v43 = vcombine.high %v439_v35, %v443_v36  ;;  %v435_v20 = vld [vmem:[%s9681_s21 + $0x168] sm:$0xff] }
  0xcc   : > { %v874_v46 = vld [vmem:[%s9681_s21 + $0xf20] sm:$0xff]  ;;  %3634 = vmatpush2.bf16.msra.mxu1 %v8450_v48  ;;  %v8141_v44 = vcombine.high %v567_v38, %v571_v39  ;;  %v563_v47 = vld [vmem:[%s9681_s21 + $0x568] sm:$0xff]  ;;  %v8140_v48 = vcombine.low %v567_v38, %v571_v39 }
  0xcd   : > { %v8443_v50 = vcombine.high %v870_v45, %v874_v46  ;;  %v734_v51 = vld [vmem:[%s9681_s21 + $0xac0] sm:$0xff]  ;;  %3594 = vmatprep.subr.bf16.mxu0 %v8315_v49  ;;  %v8442_v58 = vcombine.low %v870_v45, %v874_v46  ;;  %v431_v45 = vld [vmem:[%s9681_s21 + $0x148] sm:$0xff] }
  0xce   : > { %v738_v52 = vld [vmem:[%s9681_s21 + $0xae0] sm:$0xff]  ;;  %3595 = vmatpush2.bf16.msra.mxu0 %v8314_v57  ;;  %v559_v46 = vld [vmem:[%s9681_s21 + $0x548] sm:$0xff]  ;;  %v8005_v49 = vcombine.high %v431_v45, %v435_v20  ;;  %v8004_v57 = vcombine.low %v431_v45, %v435_v20 }
  0xcf   : > { %v862_v53 = vld [vmem:[%s9681_s21 + $0xec0] sm:$0xff]  ;;  %v8307_v61 = vcombine.high %v734_v51, %v738_v52  ;;  %3635 = vmatprep.subr.bf16.mxu1 %v8443_v50  ;;  %v8306_v3 = vcombine.low %v734_v51, %v738_v52  ;;  %v8133_v50 = vcombine.high %v559_v46, %v563_v47  ;;  %v423_v51 = vld [vmem:[%s9681_s21 + $0x108] sm:$0xff] }
  0xd0   : > { %v866_v56 = vld [vmem:[%s9681_s21 + $0xee0] sm:$0xff]  ;;  %3636 = vmatpush2.bf16.msra.mxu1 %v8442_v58  ;;  %v427_v52 = vld [vmem:[%s9681_s21 + $0x128] sm:$0xff]  ;;  %v8132_v58 = vcombine.low %v559_v46, %v563_v47 }
  0xd1   : > { %v8435_v62 = vcombine.high %v862_v53, %v866_v56  ;;  %v726_v63 = vld [vmem:[%s9681_s21 + $0xa80] sm:$0xff]  ;;  %3596 = vmatprep.subr.bf16.mxu0 %v8307_v61  ;;  %v8434_v4 = vcombine.low %v862_v53, %v866_v56  ;;  %v551_v53 = vld [vmem:[%s9681_s21 + $0x508] sm:$0xff]  ;;  %v7997_v61 = vcombine.high %v423_v51, %v427_v52 }
  0xd2   : > { %v730_v0 = vld [vmem:[%s9681_s21 + $0xaa0] sm:$0xff]  ;;  %3597 = vmatpush2.bf16.msra.mxu0 %v8306_v3  ;;  %v555_v56 = vld [vmem:[%s9681_s21 + $0x528] sm:$0xff]  ;;  %v7996_v3 = vcombine.low %v423_v51, %v427_v52 }
  0xd3   : > { %v854_v1 = vld [vmem:[%s9681_s21 + $0xe80] sm:$0xff]  ;;  %v8299_v5 = vcombine.high %v726_v63, %v730_v0  ;;  %3637 = vmatprep.subr.bf16.mxu1 %v8435_v62  ;;  %v8298_v11 = vcombine.low %v726_v63, %v730_v0  ;;  %v8125_v62 = vcombine.high %v551_v53, %v555_v56  ;;  %v415_v63 = vld [vmem:[%s9681_s21 + $0xc8] sm:$0xff] }
  0xd4   : > { %v858_v2 = vld [vmem:[%s9681_s21 + $0xea0] sm:$0xff]  ;;  %3638 = vmatpush2.bf16.msra.mxu1 %v8434_v4  ;;  %v419_v0 = vld [vmem:[%s9681_s21 + $0xe8] sm:$0xff]  ;;  %v8124_v4 = vcombine.low %v551_v53, %v555_v56 }
  0xd5   : > { %v8427_v6 = vcombine.high %v854_v1, %v858_v2  ;;  %v718_v7 = vld [vmem:[%s9681_s21 + $0xa40] sm:$0xff]  ;;  %3598 = vmatprep.subr.bf16.mxu0 %v8299_v5  ;;  %v8426_v12 = vcombine.low %v854_v1, %v858_v2  ;;  %v543_v1 = vld [vmem:[%s9681_s21 + $0x4c8] sm:$0xff]  ;;  %v7989_v5 = vcombine.high %v415_v63, %v419_v0 }
  0xd6   : > { %v722_v8 = vld [vmem:[%s9681_s21 + $0xa60] sm:$0xff]  ;;  %3599 = vmatpush2.bf16.msra.mxu0 %v8298_v11  ;;  %v547_v2 = vld [vmem:[%s9681_s21 + $0x4e8] sm:$0xff]  ;;  %v7988_v11 = vcombine.low %v415_v63, %v419_v0 }
  0xd7   : > { %v846_v9 = vld [vmem:[%s9681_s21 + $0xe40] sm:$0xff]  ;;  %v8291_v13 = vcombine.high %v718_v7, %v722_v8  ;;  %3639 = vmatprep.subr.bf16.mxu1 %v8427_v6  ;;  %v8290_v22 = vcombine.low %v718_v7, %v722_v8  ;;  %v8117_v6 = vcombine.high %v543_v1, %v547_v2  ;;  %v407_v7 = vld [vmem:[%s9681_s21 + $0x88] sm:$0xff] }
  0xd8   : > { %v850_v10 = vld [vmem:[%s9681_s21 + $0xe60] sm:$0xff]  ;;  %3640 = vmatpush2.bf16.msra.mxu1 %v8426_v12  ;;  %v411_v8 = vld [vmem:[%s9681_s21 + $0xa8] sm:$0xff]  ;;  %v8116_v12 = vcombine.low %v543_v1, %v547_v2 }
  0xd9   : > { %v8419_v14 = vcombine.high %v846_v9, %v850_v10  ;;  %v710_v15 = vld [vmem:[%s9681_s21 + $0xa00] sm:$0xff]  ;;  %3600 = vmatprep.subr.bf16.mxu0 %v8291_v13  ;;  %v8418_v24 = vcombine.low %v846_v9, %v850_v10  ;;  %v535_v9 = vld [vmem:[%s9681_s21 + $0x488] sm:$0xff]  ;;  %v7981_v13 = vcombine.high %v407_v7, %v411_v8 }
  0xda   : > { %v714_v16 = vld [vmem:[%s9681_s21 + $0xa20] sm:$0xff]  ;;  %3601 = vmatpush2.bf16.msra.mxu0 %v8290_v22  ;;  %v539_v10 = vld [vmem:[%s9681_s21 + $0x4a8] sm:$0xff]  ;;  %v7980_v22 = vcombine.low %v407_v7, %v411_v8 }
  0xdb   : > { %v838_v18 = vld [vmem:[%s9681_s21 + $0xe00] sm:$0xff]  ;;  %v8283_v25 = vcombine.high %v710_v15, %v714_v16  ;;  %3641 = vmatprep.subr.bf16.mxu1 %v8419_v14  ;;  %v8282_v31 = vcombine.low %v710_v15, %v714_v16  ;;  %v8109_v14 = vcombine.high %v535_v9, %v539_v10  ;;  %v399_v15 = vld [vmem:[%s9681_s21 + $0x48] sm:$0xff] }
  0xdc   : > { %v842_v19 = vld [vmem:[%s9681_s21 + $0xe20] sm:$0xff]  ;;  %3642 = vmatpush2.bf16.msra.mxu1 %v8418_v24  ;;  %v403_v16 = vld [vmem:[%s9681_s21 + $0x68] sm:$0xff]  ;;  %v8108_v24 = vcombine.low %v535_v9, %v539_v10 }
  0xdd   : > { %v8411_v54 = vcombine.high %v838_v18, %v842_v19  ;;  %3602 = vmatprep.subr.bf16.mxu0 %v8283_v25  ;;  %v8410_v32 = vcombine.low %v838_v18, %v842_v19  ;;  %v527_v18 = vld [vmem:[%s9681_s21 + $0x448] sm:$0xff]  ;;  %v7973_v25 = vcombine.high %v399_v15, %v403_v16 }
  0xde   : > { %3603 = vmatpush2.bf16.msra.mxu0 %v8282_v31  ;;  %v531_v19 = vld [vmem:[%s9681_s21 + $0x468] sm:$0xff]  ;;  %v7972_v31 = vcombine.low %v399_v15, %v403_v16 }
  0xdf   : > { %3643 = vmatprep.subr.bf16.mxu1 %v8411_v54  ;;  %3654 = vmatprep.subr.bf16.mxu0 %v8021_v33  ;;  %v8101_v54 = vcombine.high %v527_v18, %v531_v19  ;;  %v391_v26 = vld [vmem:[%s9681_s21 + $0x8] sm:$0xff] }
  0xe0   : > { %3644 = vmatpush2.bf16.msra.mxu1 %v8410_v32  ;;  %v395_v27 = vld [vmem:[%s9681_s21 + $0x28] sm:$0xff]  ;;  %v8100_v32 = vcombine.low %v527_v18, %v531_v19 }
  0xe1   : > { %3695 = vmatprep.subr.bf16.mxu1 %v8149_v34  ;;  %3605 = vmatmul.mubr.bf16.vlgmr.msra.gmra.mxu0 %v9877_v37  ;;  %v519_v55 = vld [vmem:[%s9681_s21 + $0x408] sm:$0xff]  ;;  %v7965_v33 = vcombine.high %v391_v26, %v395_v27 }
  0xe2   : > { %3655 = vmatpush1.bf16.msra.mxu0 %v8020_v41  ;;  %3686 = vmatprep.mubr.bf16.mxu0 %v9737_v59  ;;  %v523_v29 = vld [vmem:[%s9681_s21 + $0x428] sm:$0xff]  ;;  %v7964_v41 = vcombine.low %v391_v26, %v395_v27 }
  0xe3   : > { %3646 = vmatmul.mubr.bf16.vlgmr.msra.gmra.mxu1 %v9883_v40  ;;  %3656 = vmatprep.subr.bf16.mxu0 %v8013_v43  ;;  %v8093_v34 = vcombine.high %v519_v55, %v523_v29  ;;  %v511_v35 = vld [vmem:[%s9681_s21 + $0x3c8] sm:$0xff] }
  0xe4   : > { %3696 = vmatpush1.bf16.msra.mxu1 %v8148_v42  ;;  %3727 = vmatprep.mubr.bf16.mxu1 %v9741_v60  ;;  %v515_v36 = vld [vmem:[%s9681_s21 + $0x3e8] sm:$0xff]  ;;  %v8092_v42 = vcombine.low %v519_v55, %v523_v29 }
  0xe5   : > { %3697 = vmatprep.subr.bf16.mxu1 %v8141_v44  ;;  %v639_v38 = vld [vmem:[%s9681_s21 + $0x7c8] sm:$0xff]  ;;  %v8085_v43 = vcombine.high %v511_v35, %v515_v36 }
  0xe6   : > { %3657 = vmatpush1.bf16.msra.mxu0 %v8012_v23  ;;  %v643_v39 = vld [vmem:[%s9681_s21 + $0x7e8] sm:$0xff]  ;;  %v8084_v23 = vcombine.low %v511_v35, %v515_v36 }
  0xe7   : > { %3658 = vmatprep.subr.bf16.mxu0 %v8005_v49  ;;  %v8213_v44 = vcombine.high %v639_v38, %v643_v39  ;;  %v503_v45 = vld [vmem:[%s9681_s21 + $0x388] sm:$0xff] }
  0xe8   : > { %3698 = vmatpush1.bf16.msra.mxu1 %v8140_v48  ;;  %v507_v20 = vld [vmem:[%s9681_s21 + $0x3a8] sm:$0xff]  ;;  %v8212_v48 = vcombine.low %v639_v38, %v643_v39 }
  0xe9   : > { %3699 = vmatprep.subr.bf16.mxu1 %v8133_v50  ;;  %v631_v46 = vld [vmem:[%s9681_s21 + $0x788] sm:$0xff]  ;;  %v8077_v49 = vcombine.high %v503_v45, %v507_v20 }
  0xea   : > { %3659 = vmatpush1.bf16.msra.mxu0 %v8004_v57  ;;  %v635_v47 = vld [vmem:[%s9681_s21 + $0x7a8] sm:$0xff]  ;;  %v8076_v57 = vcombine.low %v503_v45, %v507_v20 }
  0xeb   : > { %3660 = vmatprep.subr.bf16.mxu0 %v7997_v61  ;;  %v8205_v50 = vcombine.high %v631_v46, %v635_v47  ;;  %v495_v51 = vld [vmem:[%s9681_s21 + $0x348] sm:$0xff] }
  0xec   : > { %3700 = vmatpush1.bf16.msra.mxu1 %v8132_v58  ;;  %v499_v52 = vld [vmem:[%s9681_s21 + $0x368] sm:$0xff]  ;;  %v8204_v58 = vcombine.low %v631_v46, %v635_v47 }
  0xed   : > { %3701 = vmatprep.subr.bf16.mxu1 %v8125_v62  ;;  %v623_v53 = vld [vmem:[%s9681_s21 + $0x748] sm:$0xff]  ;;  %v8069_v61 = vcombine.high %v495_v51, %v499_v52 }
  0xee   : > { %3661 = vmatpush1.bf16.msra.mxu0 %v7996_v3  ;;  %v627_v56 = vld [vmem:[%s9681_s21 + $0x768] sm:$0xff]  ;;  %v8068_v3 = vcombine.low %v495_v51, %v499_v52 }
  0xef   : > { %3662 = vmatprep.subr.bf16.mxu0 %v7989_v5  ;;  %v8197_v62 = vcombine.high %v623_v53, %v627_v56  ;;  %v487_v63 = vld [vmem:[%s9681_s21 + $0x308] sm:$0xff] }
  0xf0   : > { %3702 = vmatpush1.bf16.msra.mxu1 %v8124_v4  ;;  %v491_v0 = vld [vmem:[%s9681_s21 + $0x328] sm:$0xff]  ;;  %v8196_v4 = vcombine.low %v623_v53, %v627_v56 }
  0xf1   : > { %3703 = vmatprep.subr.bf16.mxu1 %v8117_v6  ;;  %v615_v1 = vld [vmem:[%s9681_s21 + $0x708] sm:$0xff]  ;;  %v8061_v5 = vcombine.high %v487_v63, %v491_v0 }
  0xf2   : > { %3663 = vmatpush1.bf16.msra.mxu0 %v7988_v11  ;;  %v619_v2 = vld [vmem:[%s9681_s21 + $0x728] sm:$0xff]  ;;  %v8060_v11 = vcombine.low %v487_v63, %v491_v0 }
  0xf3   : > { %3664 = vmatprep.subr.bf16.mxu0 %v7981_v13  ;;  %v8189_v6 = vcombine.high %v615_v1, %v619_v2  ;;  %v479_v7 = vld [vmem:[%s9681_s21 + $0x2c8] sm:$0xff] }
  0xf4   : > { %3704 = vmatpush1.bf16.msra.mxu1 %v8116_v12  ;;  %v483_v8 = vld [vmem:[%s9681_s21 + $0x2e8] sm:$0xff]  ;;  %v8188_v12 = vcombine.low %v615_v1, %v619_v2 }
  0xf5   : > { %3705 = vmatprep.subr.bf16.mxu1 %v8109_v14  ;;  %v607_v9 = vld [vmem:[%s9681_s21 + $0x6c8] sm:$0xff]  ;;  %v8053_v13 = vcombine.high %v479_v7, %v483_v8 }
  0xf6   : > { %3665 = vmatpush1.bf16.msra.mxu0 %v7980_v22  ;;  %v611_v10 = vld [vmem:[%s9681_s21 + $0x6e8] sm:$0xff]  ;;  %v8052_v22 = vcombine.low %v479_v7, %v483_v8 }
  0xf7   : > { %3666 = vmatprep.subr.bf16.mxu0 %v7973_v25  ;;  %v8181_v14 = vcombine.high %v607_v9, %v611_v10  ;;  %v471_v15 = vld [vmem:[%s9681_s21 + $0x288] sm:$0xff] }
  0xf8   : > { %3706 = vmatpush1.bf16.msra.mxu1 %v8108_v24  ;;  %v475_v16 = vld [vmem:[%s9681_s21 + $0x2a8] sm:$0xff]  ;;  %v8180_v24 = vcombine.low %v607_v9, %v611_v10 }
  0xf9   : > { %3707 = vmatprep.subr.bf16.mxu1 %v8101_v54  ;;  %v599_v18 = vld [vmem:[%s9681_s21 + $0x688] sm:$0xff]  ;;  %v8045_v25 = vcombine.high %v471_v15, %v475_v16 }
  0xfa   : > { %3667 = vmatpush1.bf16.msra.mxu0 %v7972_v31  ;;  %v603_v19 = vld [vmem:[%s9681_s21 + $0x6a8] sm:$0xff]  ;;  %v8044_v31 = vcombine.low %v471_v15, %v475_v16 }
  0xfb   : > { %3668 = vmatprep.subr.bf16.mxu0 %v7965_v33  ;;  %v8173_v54 = vcombine.high %v599_v18, %v603_v19  ;;  %v463_v26 = vld [vmem:[%s9681_s21 + $0x248] sm:$0xff] }
  0xfc   : > { %3708 = vmatpush1.bf16.msra.mxu1 %v8100_v32  ;;  %v467_v27 = vld [vmem:[%s9681_s21 + $0x268] sm:$0xff]  ;;  %v8172_v32 = vcombine.low %v599_v18, %v603_v19 }
  0xfd   : > { %3709 = vmatprep.subr.bf16.mxu1 %v8093_v34  ;;  %v591_v55 = vld [vmem:[%s9681_s21 + $0x648] sm:$0xff]  ;;  %v8037_v33 = vcombine.high %v463_v26, %v467_v27 }
  0xfe   : > { %3669 = vmatpush1.bf16.msra.mxu0 %v7964_v41  ;;  %v595_v29 = vld [vmem:[%s9681_s21 + $0x668] sm:$0xff]  ;;  %v8036_v41 = vcombine.low %v463_v26, %v467_v27 }
  0xff   : > { %3670 = vmatprep.subr.bf16.mxu0 %v8085_v43  ;;  %v8165_v34 = vcombine.high %v591_v55, %v595_v29  ;;  %v455_v35 = vld [vmem:[%s9681_s21 + $0x208] sm:$0xff] }
 0x100   : > { %3710 = vmatpush1.bf16.msra.mxu1 %v8092_v42  ;;  %v459_v36 = vld [vmem:[%s9681_s21 + $0x228] sm:$0xff]  ;;  %v8164_v42 = vcombine.low %v591_v55, %v595_v29 }
 0x101   : > { %3711 = vmatprep.subr.bf16.mxu1 %v8213_v44  ;;  %v583_v38 = vld [vmem:[%s9681_s21 + $0x608] sm:$0xff]  ;;  %v8029_v43 = vcombine.high %v455_v35, %v459_v36 }
 0x102   : > { %3671 = vmatpush2.bf16.msra.mxu0 %v8084_v23  ;;  %v587_v39 = vld [vmem:[%s9681_s21 + $0x628] sm:$0xff]  ;;  %v8028_v23 = vcombine.low %v455_v35, %v459_v36 }
 0x103   : > { %3672 = vmatprep.subr.bf16.mxu0 %v8077_v49  ;;  %v8157_v44 = vcombine.high %v583_v38, %v587_v39  ;;  %v703_v45 = vld [vmem:[%s9681_s21 + $0x9c8] sm:$0xff] }
 0x104   : > { %3712 = vmatpush2.bf16.msra.mxu1 %v8212_v48  ;;  %v707_v20 = vld [vmem:[%s9681_s21 + $0x9e8] sm:$0xff]  ;;  %v8156_v48 = vcombine.low %v583_v38, %v587_v39 }
 0x105   : > { %3713 = vmatprep.subr.bf16.mxu1 %v8205_v50  ;;  %v831_v46 = vld [vmem:[%s9681_s21 + $0xdc8] sm:$0xff]  ;;  %v8277_v49 = vcombine.high %v703_v45, %v707_v20 }
 0x106   : > { %3673 = vmatpush2.bf16.msra.mxu0 %v8076_v57  ;;  %v835_v47 = vld [vmem:[%s9681_s21 + $0xde8] sm:$0xff]  ;;  %v8276_v57 = vcombine.low %v703_v45, %v707_v20 }
 0x107   : > { %3674 = vmatprep.subr.bf16.mxu0 %v8069_v61  ;;  %v8405_v50 = vcombine.high %v831_v46, %v835_v47  ;;  %v695_v51 = vld [vmem:[%s9681_s21 + $0x988] sm:$0xff] }
 0x108   : > { %3714 = vmatpush2.bf16.msra.mxu1 %v8204_v58  ;;  %v699_v52 = vld [vmem:[%s9681_s21 + $0x9a8] sm:$0xff]  ;;  %v8404_v58 = vcombine.low %v831_v46, %v835_v47 }
 0x109   : > { %3715 = vmatprep.subr.bf16.mxu1 %v8197_v62  ;;  %v823_v53 = vld [vmem:[%s9681_s21 + $0xd88] sm:$0xff]  ;;  %v8269_v61 = vcombine.high %v695_v51, %v699_v52 }
 0x10a   : > { %3675 = vmatpush2.bf16.msra.mxu0 %v8068_v3  ;;  %v827_v56 = vld [vmem:[%s9681_s21 + $0xda8] sm:$0xff]  ;;  %v8268_v3 = vcombine.low %v695_v51, %v699_v52 }
 0x10b   : > { %3676 = vmatprep.subr.bf16.mxu0 %v8061_v5  ;;  %v8397_v62 = vcombine.high %v823_v53, %v827_v56  ;;  %v687_v63 = vld [vmem:[%s9681_s21 + $0x948] sm:$0xff] }
 0x10c   : > { %3716 = vmatpush2.bf16.msra.mxu1 %v8196_v4  ;;  %v691_v0 = vld [vmem:[%s9681_s21 + $0x968] sm:$0xff]  ;;  %v8396_v4 = vcombine.low %v823_v53, %v827_v56 }
 0x10d   : > { %3717 = vmatprep.subr.bf16.mxu1 %v8189_v6  ;;  %v815_v1 = vld [vmem:[%s9681_s21 + $0xd48] sm:$0xff]  ;;  %v8261_v5 = vcombine.high %v687_v63, %v691_v0 }
 0x10e   : > { %3677 = vmatpush2.bf16.msra.mxu0 %v8060_v11  ;;  %v819_v2 = vld [vmem:[%s9681_s21 + $0xd68] sm:$0xff]  ;;  %v8260_v11 = vcombine.low %v687_v63, %v691_v0 }
 0x10f   : > { %3678 = vmatprep.subr.bf16.mxu0 %v8053_v13  ;;  %v8389_v6 = vcombine.high %v815_v1, %v819_v2  ;;  %v679_v7 = vld [vmem:[%s9681_s21 + $0x908] sm:$0xff] }
 0x110   : > { %3718 = vmatpush2.bf16.msra.mxu1 %v8188_v12  ;;  %v683_v8 = vld [vmem:[%s9681_s21 + $0x928] sm:$0xff]  ;;  %v8388_v12 = vcombine.low %v815_v1, %v819_v2 }
 0x111   : > { %3719 = vmatprep.subr.bf16.mxu1 %v8181_v14  ;;  %v807_v9 = vld [vmem:[%s9681_s21 + $0xd08] sm:$0xff]  ;;  %v8253_v13 = vcombine.high %v679_v7, %v683_v8 }
 0x112   : > { %3679 = vmatpush2.bf16.msra.mxu0 %v8052_v22  ;;  %v811_v10 = vld [vmem:[%s9681_s21 + $0xd28] sm:$0xff]  ;;  %v8252_v22 = vcombine.low %v679_v7, %v683_v8 }
 0x113   : > { %3680 = vmatprep.subr.bf16.mxu0 %v8045_v25  ;;  %v8381_v14 = vcombine.high %v807_v9, %v811_v10  ;;  %v671_v15 = vld [vmem:[%s9681_s21 + $0x8c8] sm:$0xff] }
 0x114   : > { %3720 = vmatpush2.bf16.msra.mxu1 %v8180_v24  ;;  %v675_v16 = vld [vmem:[%s9681_s21 + $0x8e8] sm:$0xff]  ;;  %v8380_v24 = vcombine.low %v807_v9, %v811_v10 }
 0x115   : > { %3721 = vmatprep.subr.bf16.mxu1 %v8173_v54  ;;  %v799_v18 = vld [vmem:[%s9681_s21 + $0xcc8] sm:$0xff]  ;;  %v8245_v25 = vcombine.high %v671_v15, %v675_v16 }
 0x116   : > { %3681 = vmatpush2.bf16.msra.mxu0 %v8044_v31  ;;  %v803_v19 = vld [vmem:[%s9681_s21 + $0xce8] sm:$0xff]  ;;  %v8244_v31 = vcombine.low %v671_v15, %v675_v16 }
 0x117   : > { %3682 = vmatprep.subr.bf16.mxu0 %v8037_v33  ;;  %v8373_v54 = vcombine.high %v799_v18, %v803_v19  ;;  %v663_v26 = vld [vmem:[%s9681_s21 + $0x888] sm:$0xff] }
 0x118   : > { %3722 = vmatpush2.bf16.msra.mxu1 %v8172_v32  ;;  %v667_v27 = vld [vmem:[%s9681_s21 + $0x8a8] sm:$0xff]  ;;  %v8372_v32 = vcombine.low %v799_v18, %v803_v19 }
 0x119   : > { %3723 = vmatprep.subr.bf16.mxu1 %v8165_v34  ;;  %v791_v55 = vld [vmem:[%s9681_s21 + $0xc88] sm:$0xff]  ;;  %v8237_v33 = vcombine.high %v663_v26, %v667_v27 }
 0x11a   : > { %3683 = vmatpush2.bf16.msra.mxu0 %v8036_v41  ;;  %v795_v29 = vld [vmem:[%s9681_s21 + $0xca8] sm:$0xff]  ;;  %v8236_v41 = vcombine.low %v663_v26, %v667_v27 }
 0x11b   : > { %3684 = vmatprep.subr.bf16.mxu0 %v8029_v43  ;;  %v8365_v34 = vcombine.high %v791_v55, %v795_v29  ;;  %v655_v35 = vld [vmem:[%s9681_s21 + $0x848] sm:$0xff] }
 0x11c   : > { %3724 = vmatpush2.bf16.msra.mxu1 %v8164_v42  ;;  %v659_v36 = vld [vmem:[%s9681_s21 + $0x868] sm:$0xff]  ;;  %v8364_v42 = vcombine.low %v791_v55, %v795_v29 }
 0x11d   : > { %3725 = vmatprep.subr.bf16.mxu1 %v8157_v44  ;;  %v783_v38 = vld [vmem:[%s9681_s21 + $0xc48] sm:$0xff]  ;;  %v8229_v43 = vcombine.high %v655_v35, %v659_v36 }
 0x11e   : > { %3685 = vmatpush2.bf16.msra.mxu0 %v8028_v23  ;;  %v787_v39 = vld [vmem:[%s9681_s21 + $0xc68] sm:$0xff]  ;;  %v8228_v23 = vcombine.low %v655_v35, %v659_v36 }
 0x11f   : > { %3736 = vmatprep.subr.bf16.mxu0 %v8277_v49  ;;  %v8357_v44 = vcombine.high %v783_v38, %v787_v39  ;;  %v647_v45 = vld [vmem:[%s9681_s21 + $0x808] sm:$0xff] }
 0x120   : > { %3726 = vmatpush2.bf16.msra.mxu1 %v8156_v48  ;;  %v651_v20 = vld [vmem:[%s9681_s21 + $0x828] sm:$0xff]  ;;  %v8356_v48 = vcombine.low %v783_v38, %v787_v39 }
 0x121   : > { %3777 = vmatprep.subr.bf16.mxu1 %v8405_v50  ;;  %3687 = vmatmul.mubr.bf16.vlgmr.msra.gmra.mxu0 %v9787_v17  ;;  %v775_v46 = vld [vmem:[%s9681_s21 + $0xc08] sm:$0xff]  ;;  %v8221_v49 = vcombine.high %v647_v45, %v651_v20 }
 0x122   : > { %3737 = vmatpush1.bf16.msra.mxu0 %v8276_v57  ;;  %3768 = vmatprep.mubr.bf16.mxu0 %v9805_v28  ;;  %v779_v47 = vld [vmem:[%s9681_s21 + $0xc28] sm:$0xff]  ;;  %v8220_v57 = vcombine.low %v647_v45, %v651_v20 }
 0x123   : > { %3728 = vmatmul.mubr.bf16.vlgmr.msra.gmra.mxu1 %v9796_v21  ;;  %3738 = vmatprep.subr.bf16.mxu0 %v8269_v61  ;;  %v8349_v50 = vcombine.high %v775_v46, %v779_v47  ;;  %v767_v51 = vld [vmem:[%s9681_s21 + $0xbc8] sm:$0xff] }
 0x124   : > { %3778 = vmatpush1.bf16.msra.mxu1 %v8404_v58  ;;  %3809 = vmatprep.mubr.bf16.mxu1 %v9812_v30  ;;  %v771_v52 = vld [vmem:[%s9681_s21 + $0xbe8] sm:$0xff]  ;;  %v8348_v58 = vcombine.low %v775_v46, %v779_v47 }
 0x125   : > { %3779 = vmatprep.subr.bf16.mxu1 %v8397_v62  ;;  %v895_v53 = vld [vmem:[%s9681_s21 + $0xfc8] sm:$0xff]  ;;  %v8341_v61 = vcombine.high %v767_v51, %v771_v52 }
 0x126   : > { %3739 = vmatpush1.bf16.msra.mxu0 %v8268_v3  ;;  %v899_v56 = vld [vmem:[%s9681_s21 + $0xfe8] sm:$0xff]  ;;  %v8340_v3 = vcombine.low %v767_v51, %v771_v52 }
 0x127   : > { %3740 = vmatprep.subr.bf16.mxu0 %v8261_v5  ;;  %v8469_v62 = vcombine.high %v895_v53, %v899_v56  ;;  %v759_v63 = vld [vmem:[%s9681_s21 + $0xb88] sm:$0xff] }
 0x128   : > { %3780 = vmatpush1.bf16.msra.mxu1 %v8396_v4  ;;  %v763_v0 = vld [vmem:[%s9681_s21 + $0xba8] sm:$0xff]  ;;  %v8468_v4 = vcombine.low %v895_v53, %v899_v56 }
 0x129   : > { %3781 = vmatprep.subr.bf16.mxu1 %v8389_v6  ;;  %v887_v1 = vld [vmem:[%s9681_s21 + $0xf88] sm:$0xff]  ;;  %v8333_v5 = vcombine.high %v759_v63, %v763_v0 }
 0x12a   : > { %3741 = vmatpush1.bf16.msra.mxu0 %v8260_v11  ;;  %v891_v2 = vld [vmem:[%s9681_s21 + $0xfa8] sm:$0xff]  ;;  %v8332_v11 = vcombine.low %v759_v63, %v763_v0  ;;  %v448_v63 = vld [vmem:[%s9681_s21 + $0x1d0] sm:$0xff] }
 0x12b   : > { %3742 = vmatprep.subr.bf16.mxu0 %v8253_v13  ;;  %v8461_v6 = vcombine.high %v887_v1, %v891_v2  ;;  %v751_v7 = vld [vmem:[%s9681_s21 + $0xb48] sm:$0xff]  ;;  %v452_v0 = vld [vmem:[%s9681_s21 + $0x1f0] sm:$0xff] }
 0x12c   : > { %3782 = vmatpush1.bf16.msra.mxu1 %v8388_v12  ;;  %v755_v8 = vld [vmem:[%s9681_s21 + $0xb68] sm:$0xff]  ;;  %v8460_v12 = vcombine.low %v887_v1, %v891_v2  ;;  %v576_v1 = vld [vmem:[%s9681_s21 + $0x5d0] sm:$0xff] }
 0x12d   : > { %3783 = vmatprep.subr.bf16.mxu1 %v8381_v14  ;;  %v879_v9 = vld [vmem:[%s9681_s21 + $0xf48] sm:$0xff]  ;;  %v8325_v13 = vcombine.high %v751_v7, %v755_v8  ;;  %v580_v2 = vld [vmem:[%s9681_s21 + $0x5f0] sm:$0xff] }
 0x12e   : > { %3743 = vmatpush1.bf16.msra.mxu0 %v8252_v22  ;;  %v883_v10 = vld [vmem:[%s9681_s21 + $0xf68] sm:$0xff]  ;;  %v8324_v22 = vcombine.low %v751_v7, %v755_v8  ;;  %v440_v7 = vld [vmem:[%s9681_s21 + $0x190] sm:$0xff] }
 0x12f   : > { %3744 = vmatprep.subr.bf16.mxu0 %v8245_v25  ;;  %v8453_v14 = vcombine.high %v879_v9, %v883_v10  ;;  %v743_v15 = vld [vmem:[%s9681_s21 + $0xb08] sm:$0xff]  ;;  %v444_v8 = vld [vmem:[%s9681_s21 + $0x1b0] sm:$0xff] }
 0x130   : > { %3784 = vmatpush1.bf16.msra.mxu1 %v8380_v24  ;;  %v747_v16 = vld [vmem:[%s9681_s21 + $0xb28] sm:$0xff]  ;;  %v8452_v24 = vcombine.low %v879_v9, %v883_v10  ;;  %v568_v9 = vld [vmem:[%s9681_s21 + $0x590] sm:$0xff] }
 0x131   : > { %3785 = vmatprep.subr.bf16.mxu1 %v8373_v54  ;;  %v871_v18 = vld [vmem:[%s9681_s21 + $0xf08] sm:$0xff]  ;;  %v8317_v25 = vcombine.high %v743_v15, %v747_v16  ;;  %v572_v10 = vld [vmem:[%s9681_s21 + $0x5b0] sm:$0xff] }
 0x132   : > { %3745 = vmatpush1.bf16.msra.mxu0 %v8244_v31  ;;  %v875_v19 = vld [vmem:[%s9681_s21 + $0xf28] sm:$0xff]  ;;  %v8316_v31 = vcombine.low %v743_v15, %v747_v16  ;;  %v432_v15 = vld [vmem:[%s9681_s21 + $0x150] sm:$0xff] }
 0x133   : > { %3746 = vmatprep.subr.bf16.mxu0 %v8237_v33  ;;  %v8445_v54 = vcombine.high %v871_v18, %v875_v19  ;;  %v735_v26 = vld [vmem:[%s9681_s21 + $0xac8] sm:$0xff]  ;;  %v436_v16 = vld [vmem:[%s9681_s21 + $0x170] sm:$0xff] }
 0x134   : > { %3786 = vmatpush1.bf16.msra.mxu1 %v8372_v32  ;;  %v739_v27 = vld [vmem:[%s9681_s21 + $0xae8] sm:$0xff]  ;;  %v8444_v32 = vcombine.low %v871_v18, %v875_v19  ;;  %v560_v19 = vld [vmem:[%s9681_s21 + $0x550] sm:$0xff] }
 0x135   : > { %3787 = vmatprep.subr.bf16.mxu1 %v8365_v34  ;;  %v863_v55 = vld [vmem:[%s9681_s21 + $0xec8] sm:$0xff]  ;;  %v8309_v33 = vcombine.high %v735_v26, %v739_v27 }
 0x136   : > { %3747 = vmatpush1.bf16.msra.mxu0 %v8236_v41  ;;  %v867_v29 = vld [vmem:[%s9681_s21 + $0xee8] sm:$0xff]  ;;  %v8308_v41 = vcombine.low %v735_v26, %v739_v27  ;;  %v8142_v26 = vcombine.low %v568_v9, %v572_v10  ;;  %v8007_v27 = vcombine.high %v432_v15, %v436_v16 }
 0x137   : > { %3748 = vmatprep.subr.bf16.mxu0 %v8229_v43  ;;  %v8437_v34 = vcombine.high %v863_v55, %v867_v29  ;;  %v727_v35 = vld [vmem:[%s9681_s21 + $0xa88] sm:$0xff] }
 0x138   : > { %3788 = vmatpush1.bf16.msra.mxu1 %v8364_v42  ;;  %v731_v36 = vld [vmem:[%s9681_s21 + $0xaa8] sm:$0xff]  ;;  %v8436_v42 = vcombine.low %v863_v55, %v867_v29 }
 0x139   : > { %3789 = vmatprep.subr.bf16.mxu1 %v8357_v44  ;;  %v855_v38 = vld [vmem:[%s9681_s21 + $0xe88] sm:$0xff]  ;;  %v8301_v43 = vcombine.high %v727_v35, %v731_v36 }
 0x13a   : > { %3749 = vmatpush1.bf16.msra.mxu0 %v8228_v23  ;;  %v859_v39 = vld [vmem:[%s9681_s21 + $0xea8] sm:$0xff]  ;;  %v8300_v23 = vcombine.low %v727_v35, %v731_v36  ;;  %v556_v35 = vld [vmem:[%s9681_s21 + $0x530] sm:$0xff] }
 0x13b   : > { %3750 = vmatprep.subr.bf16.mxu0 %v8221_v49  ;;  %v8429_v44 = vcombine.high %v855_v38, %v859_v39  ;;  %v719_v45 = vld [vmem:[%s9681_s21 + $0xa48] sm:$0xff] }
 0x13c   : > { %3790 = vmatpush1.bf16.msra.mxu1 %v8356_v48  ;;  %v723_v20 = vld [vmem:[%s9681_s21 + $0xa68] sm:$0xff]  ;;  %v8428_v48 = vcombine.low %v855_v38, %v859_v39  ;;  %v8006_v38 = vcombine.low %v432_v15, %v436_v16  ;;  %v512_v15 = vld [vmem:[%s9681_s21 + $0x3d0] sm:$0xff] }
 0x13d   : > { %3791 = vmatprep.subr.bf16.mxu1 %v8349_v50  ;;  %v847_v46 = vld [vmem:[%s9681_s21 + $0xe48] sm:$0xff]  ;;  %v8293_v49 = vcombine.high %v719_v45, %v723_v20  ;;  %v516_v16 = vld [vmem:[%s9681_s21 + $0x3f0] sm:$0xff] }
 0x13e   : > { %3751 = vmatpush1.bf16.msra.mxu0 %v8220_v57  ;;  %v851_v47 = vld [vmem:[%s9681_s21 + $0xe68] sm:$0xff]  ;;  %v8292_v57 = vcombine.low %v719_v45, %v723_v20  ;;  %v416_v45 = vld [vmem:[%s9681_s21 + $0xd0] sm:$0xff] }
 0x13f   : > { %3752 = vmatprep.subr.bf16.mxu0 %v8341_v61  ;;  %v8421_v50 = vcombine.high %v847_v46, %v851_v47  ;;  %v711_v51 = vld [vmem:[%s9681_s21 + $0xa08] sm:$0xff]  ;;  %v420_v20 = vld [vmem:[%s9681_s21 + $0xf0] sm:$0xff] }
 0x140   : > { %3792 = vmatpush1.bf16.msra.mxu1 %v8348_v58  ;;  %v715_v52 = vld [vmem:[%s9681_s21 + $0xa28] sm:$0xff]  ;;  %v8420_v58 = vcombine.low %v847_v46, %v851_v47  ;;  %v544_v46 = vld [vmem:[%s9681_s21 + $0x4d0] sm:$0xff] }
 0x141   : > { %3793 = vmatprep.subr.bf16.mxu1 %v8469_v62  ;;  %v839_v53 = vld [vmem:[%s9681_s21 + $0xe08] sm:$0xff]  ;;  %v8285_v61 = vcombine.high %v711_v51, %v715_v52  ;;  %v548_v47 = vld [vmem:[%s9681_s21 + $0x4f0] sm:$0xff] }
 0x142   : > { %3753 = vmatpush2.bf16.msra.mxu0 %v8340_v3  ;;  %v843_v56 = vld [vmem:[%s9681_s21 + $0xe28] sm:$0xff]  ;;  %v8284_v3 = vcombine.low %v711_v51, %v715_v52  ;;  %v408_v51 = vld [vmem:[%s9681_s21 + $0x90] sm:$0xff] }
 0x143   : > { %3754 = vmatprep.subr.bf16.mxu0 %v8333_v5  ;;  %v8413_v62 = vcombine.high %v839_v53, %v843_v56  ;;  %v8023_v5 = vcombine.high %v448_v63, %v452_v0  ;;  %v412_v52 = vld [vmem:[%s9681_s21 + $0xb0] sm:$0xff] }
 0x144   : > { %3794 = vmatpush2.bf16.msra.mxu1 %v8468_v4  ;;  %v8412_v4 = vcombine.low %v839_v53, %v843_v56  ;;  %v536_v53 = vld [vmem:[%s9681_s21 + $0x490] sm:$0xff] }
 0x145   : > { %3795 = vmatprep.subr.bf16.mxu1 %v8461_v6  ;;  %v8151_v6 = vcombine.high %v576_v1, %v580_v2  ;;  %v540_v56 = vld [vmem:[%s9681_s21 + $0x4b0] sm:$0xff] }
 0x146   : > { %3755 = vmatpush2.bf16.msra.mxu0 %v8332_v11  ;;  %v8022_v11 = vcombine.low %v448_v63, %v452_v0  ;;  %v400_v63 = vld [vmem:[%s9681_s21 + $0x50] sm:$0xff] }
 0x147   : > { %3756 = vmatprep.subr.bf16.mxu0 %v8325_v13  ;;  %v8015_v13 = vcombine.high %v440_v7, %v444_v8  ;;  %v404_v0 = vld [vmem:[%s9681_s21 + $0x70] sm:$0xff] }
 0x148   : > { %3796 = vmatpush2.bf16.msra.mxu1 %v8460_v12  ;;  %v8150_v12 = vcombine.low %v576_v1, %v580_v2  ;;  %v528_v1 = vld [vmem:[%s9681_s21 + $0x450] sm:$0xff] }
 0x149   : > { %3797 = vmatprep.subr.bf16.mxu1 %v8453_v14  ;;  %v8143_v14 = vcombine.high %v568_v9, %v572_v10  ;;  %v532_v2 = vld [vmem:[%s9681_s21 + $0x470] sm:$0xff] }
 0x14a   : > { %3757 = vmatpush2.bf16.msra.mxu0 %v8324_v22  ;;  %v564_v22 = vld [vmem:[%s9681_s21 + $0x570] sm:$0xff] }
 0x14b   : > { %3758 = vmatprep.subr.bf16.mxu0 %v8317_v25  ;;  %v8014_v25 = vcombine.low %v440_v7, %v444_v8  ;;  %v8135_v29 = vcombine.high %v560_v19, %v564_v22  ;;  %v392_v7 = vld [vmem:[%s9681_s21 + $0x10] sm:$0xff] }
 0x14c   : > { %3798 = vmatpush2.bf16.msra.mxu1 %v8452_v24  ;;  %v396_v8 = vld [vmem:[%s9681_s21 + $0x30] sm:$0xff] }
 0x14d   : > { %3799 = vmatprep.subr.bf16.mxu1 %v8445_v54  ;;  %v520_v9 = vld [vmem:[%s9681_s21 + $0x410] sm:$0xff] }
 0x14e   : > { %3759 = vmatpush2.bf16.msra.mxu0 %v8316_v31  ;;  %v424_v31 = vld [vmem:[%s9681_s21 + $0x110] sm:$0xff] }
 0x14f   : > { %3760 = vmatprep.subr.bf16.mxu0 %v8309_v33  ;;  %v524_v10 = vld [vmem:[%s9681_s21 + $0x430] sm:$0xff] }
 0x150   : > { %3800 = vmatpush2.bf16.msra.mxu1 %v8444_v32  ;;  %v428_v32 = vld [vmem:[%s9681_s21 + $0x130] sm:$0xff] }
 0x151   : > { %3801 = vmatprep.subr.bf16.mxu1 %v8437_v34  ;;  %v552_v34 = vld [vmem:[%s9681_s21 + $0x510] sm:$0xff] }
 0x152   : > { %3761 = vmatpush2.bf16.msra.mxu0 %v8308_v41  ;;  %v8134_v41 = vcombine.low %v560_v19, %v564_v22  ;;  %v640_v19 = vld [vmem:[%s9681_s21 + $0x7d0] sm:$0xff] }
 0x153   : > { %3762 = vmatprep.subr.bf16.mxu0 %v8301_v43  ;;  %v644_v22 = vld [vmem:[%s9681_s21 + $0x7f0] sm:$0xff] }
 0x154   : > { %3802 = vmatpush2.bf16.msra.mxu1 %v8436_v42  ;;  %v7999_v42 = vcombine.high %v424_v31, %v428_v32 }
 0x155   : > { %3803 = vmatprep.subr.bf16.mxu1 %v8429_v44  ;;  %v8127_v44 = vcombine.high %v552_v34, %v556_v35 }
 0x156   : > { %3763 = vmatpush2.bf16.msra.mxu0 %v8300_v23  ;;  %v7998_v23 = vcombine.low %v424_v31, %v428_v32  ;;  %v504_v31 = vld [vmem:[%s9681_s21 + $0x390] sm:$0xff] }
 0x157   : > { %3764 = vmatprep.subr.bf16.mxu0 %v8293_v49  ;;  %v7991_v49 = vcombine.high %v416_v45, %v420_v20  ;;  %v508_v32 = vld [vmem:[%s9681_s21 + $0x3b0] sm:$0xff] }
 0x158   : > { %3804 = vmatpush2.bf16.msra.mxu1 %v8428_v48  ;;  %v8126_v48 = vcombine.low %v552_v34, %v556_v35  ;;  %v636_v34 = vld [vmem:[%s9681_s21 + $0x7b0] sm:$0xff]  ;;  %v8086_v35 = vcombine.low %v512_v15, %v516_v16 }
 0x159   : > { %3805 = vmatprep.subr.bf16.mxu1 %v8421_v50  ;;  %v8119_v50 = vcombine.high %v544_v46, %v548_v47 }
 0x15a   : > { %3765 = vmatpush2.bf16.msra.mxu0 %v8292_v57  ;;  %v7990_v57 = vcombine.low %v416_v45, %v420_v20  ;;  %v8078_v45 = vcombine.low %v504_v31, %v508_v32 }
 0x15b   : > { %3766 = vmatprep.subr.bf16.mxu0 %v8285_v61  ;;  %v7983_v61 = vcombine.high %v408_v51, %v412_v52 }
 0x15c   : > { %3806 = vmatpush2.bf16.msra.mxu1 %v8420_v58  ;;  %v8118_v58 = vcombine.low %v544_v46, %v548_v47 }
 0x15d   : > { %3807 = vmatprep.subr.bf16.mxu1 %v8413_v62  ;;  %v8111_v62 = vcombine.high %v536_v53, %v540_v56 }
 0x15e   : > { %3767 = vmatpush2.bf16.msra.mxu0 %v8284_v3  ;;  %v7982_v3 = vcombine.low %v408_v51, %v412_v52 }
 0x15f   : > { %3818 = vmatprep.subr.bf16.mxu0 %v8023_v5  ;;  %v7975_v5 = vcombine.high %v400_v63, %v404_v0 }
 0x160   : > { %3808 = vmatpush2.bf16.msra.mxu1 %v8412_v4  ;;  %v10023_v18 = vpop.f32.mrf.mxu0  ;;  %v8110_v4 = vcombine.low %v536_v53, %v540_v56 }
 0x161   : > { %3859 = vmatprep.subr.bf16.mxu1 %v8151_v6  ;;  %3769 = vmatmul.mubr.bf16.vlgmr.msra.gmra.mxu0 %v9877_v37  ;;  %v8103_v6 = vcombine.high %v528_v1, %v532_v2 }
 0x162   : > { %v10028_v24 = vpop.f32.mrf.mxu1  ;;  %3819 = vmatpush1.bf16.msra.mxu0 %v8022_v11  ;;  %v10031_v54 = vpop.f32.mrf.mxu0  ;;  %3850 = vmatprep.mubr.bf16.mxu0 %v9737_v59  ;;  %v7974_v11 = vcombine.low %v400_v63, %v404_v0 }
 0x163   : > { %3810 = vmatmul.mubr.bf16.vlgmr.msra.gmra.mxu1 %v9883_v40  ;;  %3820 = vmatprep.subr.bf16.mxu0 %v8015_v13  ;;  %v7967_v13 = vcombine.high %v392_v7, %v396_v8 }
 0x164   : > { %3860 = vmatpush1.bf16.msra.mxu1 %v8150_v12  ;;  %v10033_v55 = vpop.f32.mrf.mxu1  ;;  %v3528_v33 = vpop.f32.mrf.mxu0  ;;  %3891 = vmatprep.mubr.bf16.mxu1 %v9741_v60  ;;  %v8102_v12 = vcombine.low %v528_v1, %v532_v2 }
 0x165   : > { %3861 = vmatprep.subr.bf16.mxu1 %v8143_v14  ;;  %v8095_v14 = vcombine.high %v520_v9, %v524_v10  ;;  %v632_v33 = vld [vmem:[%s9681_s21 + $0x790] sm:$0xff] }
 0x166   : > { %v3569_v36 = vpop.f32.mrf.mxu1  ;;  %3821 = vmatpush1.bf16.msra.mxu0 %v8014_v25  ;;  %v3529_v39 = vpop.f32.mrf.mxu0  ;;  %v7966_v25 = vcombine.low %v392_v7, %v396_v8  ;;  %v8206_v20 = vcombine.low %v632_v33, %v636_v34 }
 0x167   : > { %3822 = vmatprep.subr.bf16.mxu0 %v8007_v27  ;;  %v8087_v27 = vcombine.high %v512_v15, %v516_v16  ;;  %v8214_v36 = vcombine.low %v640_v19, %v644_v22  ;;  %v8207_v39 = vcombine.high %v632_v33, %v636_v34 }
 0x168   : > { %3862 = vmatpush1.bf16.msra.mxu1 %v8142_v26  ;;  %v3570_v43 = vpop.f32.mrf.mxu1  ;;  %v8094_v26 = vcombine.low %v520_v9, %v524_v10 }
 0x169   : > { %3863 = vmatprep.subr.bf16.mxu1 %v8135_v29  ;;  %v8215_v29 = vcombine.high %v640_v19, %v644_v22  ;;  %v624_v43 = vld [vmem:[%s9681_s21 + $0x750] sm:$0xff] }
 0x16a   : > { %3823 = vmatpush1.bf16.msra.mxu0 %v8006_v38  ;;  %v8079_v38 = vcombine.high %v504_v31, %v508_v32 }
 0x16b   : > { %3824 = vmatprep.subr.bf16.mxu0 %v7999_v42  ;;  %v500_v42 = vld [vmem:[%s9681_s21 + $0x370] sm:$0xff] }
 0x16c   : > { %3864 = vmatpush1.bf16.msra.mxu1 %v8134_v41  ;;  %v496_v41 = vld [vmem:[%s9681_s21 + $0x350] sm:$0xff] }
 0x16d   : > { %3865 = vmatprep.subr.bf16.mxu1 %v8127_v44  ;;  %v628_v44 = vld [vmem:[%s9681_s21 + $0x770] sm:$0xff]  ;;  %v8071_v46 = vcombine.high %v496_v41, %v500_v42  ;;  %v8070_v51 = vcombine.low %v496_v41, %v500_v42 }
 0x16e   : > { %3825 = vmatpush1.bf16.msra.mxu0 %v7998_v23  ;;  %v8199_v47 = vcombine.high %v624_v43, %v628_v44  ;;  %v488_v23 = vld [vmem:[%s9681_s21 + $0x310] sm:$0xff]  ;;  %v8198_v52 = vcombine.low %v624_v43, %v628_v44 }
 0x16f   : > { %3826 = vmatprep.subr.bf16.mxu0 %v7991_v49  ;;  %v616_v49 = vld [vmem:[%s9681_s21 + $0x710] sm:$0xff] }
 0x170   : > { %3866 = vmatpush1.bf16.msra.mxu1 %v8126_v48  ;;  %v492_v48 = vld [vmem:[%s9681_s21 + $0x330] sm:$0xff] }
 0x171   : > { %3867 = vmatprep.subr.bf16.mxu1 %v8119_v50  ;;  %v620_v50 = vld [vmem:[%s9681_s21 + $0x730] sm:$0xff]  ;;  %v8063_v53 = vcombine.high %v488_v23, %v492_v48  ;;  %v8062_v63 = vcombine.low %v488_v23, %v492_v48 }
 0x172   : > { %3827 = vmatpush1.bf16.msra.mxu0 %v7990_v57  ;;  %v8191_v56 = vcombine.high %v616_v49, %v620_v50  ;;  %v480_v57 = vld [vmem:[%s9681_s21 + $0x2d0] sm:$0xff]  ;;  %v8190_v0 = vcombine.low %v616_v49, %v620_v50  ;;  %v3566_v50 = vadd.f32 %v10028_v24, %v10023_v18  ;;  %v378_v24 = vld [vmem:[#allocation2 + $0x30] sm:$0xff] }
 0x173   : > { %3828 = vmatprep.subr.bf16.mxu0 %v7983_v61  ;;  %v608_v61 = vld [vmem:[%s9681_s21 + $0x6d0] sm:$0xff] }
 0x174   : > { %3868 = vmatpush1.bf16.msra.mxu1 %v8118_v58  ;;  %v484_v58 = vld [vmem:[%s9681_s21 + $0x2f0] sm:$0xff] }
 0x175   : > { %3869 = vmatprep.subr.bf16.mxu1 %v8111_v62  ;;  %v612_v62 = vld [vmem:[%s9681_s21 + $0x6f0] sm:$0xff]  ;;  %v8055_v1 = vcombine.high %v480_v57, %v484_v58  ;;  %v8054_v7 = vcombine.low %v480_v57, %v484_v58 }
 0x176   : > { %3829 = vmatpush1.bf16.msra.mxu0 %v7982_v3  ;;  %v8183_v2 = vcombine.high %v608_v61, %v612_v62  ;;  %v472_v3 = vld [vmem:[%s9681_s21 + $0x290] sm:$0xff]  ;;  %v8182_v8 = vcombine.low %v608_v61, %v612_v62  ;;  %v3568_v61 = vadd.f32 %v10033_v55, %v10031_v54 }
 0x177   : > { %3830 = vmatprep.subr.bf16.mxu0 %v7975_v5  ;;  %v600_v5 = vld [vmem:[%s9681_s21 + $0x690] sm:$0xff] }
 0x178   : > { %3870 = vmatpush1.bf16.msra.mxu1 %v8110_v4  ;;  %v476_v4 = vld [vmem:[%s9681_s21 + $0x2b0] sm:$0xff] }
 0x179   : > { %3871 = vmatprep.subr.bf16.mxu1 %v8103_v6  ;;  %v604_v6 = vld [vmem:[%s9681_s21 + $0x6b0] sm:$0xff]  ;;  %v8047_v9 = vcombine.high %v472_v3, %v476_v4  ;;  %v8046_v15 = vcombine.low %v472_v3, %v476_v4 }
 0x17a   : > { %3831 = vmatpush1.bf16.msra.mxu0 %v7974_v11  ;;  %v8175_v10 = vcombine.high %v600_v5, %v604_v6  ;;  %v464_v11 = vld [vmem:[%s9681_s21 + $0x250] sm:$0xff]  ;;  %v8174_v16 = vcombine.low %v600_v5, %v604_v6 }
 0x17b   : > { %3832 = vmatprep.subr.bf16.mxu0 %v7967_v13  ;;  %v592_v13 = vld [vmem:[%s9681_s21 + $0x650] sm:$0xff] }
 0x17c   : > { %3872 = vmatpush1.bf16.msra.mxu1 %v8102_v12  ;;  %v468_v12 = vld [vmem:[%s9681_s21 + $0x270] sm:$0xff] }
 0x17d   : > { %3873 = vmatprep.subr.bf16.mxu1 %v8095_v14  ;;  %v596_v14 = vld [vmem:[%s9681_s21 + $0x670] sm:$0xff]  ;;  %v8039_v19 = vcombine.high %v464_v11, %v468_v12  ;;  %v8038_v31 = vcombine.low %v464_v11, %v468_v12 }
 0x17e   : > { %3833 = vmatpush1.bf16.msra.mxu0 %v7966_v25  ;;  %v8167_v22 = vcombine.high %v592_v13, %v596_v14  ;;  %v456_v25 = vld [vmem:[%s9681_s21 + $0x210] sm:$0xff]  ;;  %v8166_v32 = vcombine.low %v592_v13, %v596_v14 }
 0x17f   : > { %3834 = vmatprep.subr.bf16.mxu0 %v8087_v27  ;;  %v584_v27 = vld [vmem:[%s9681_s21 + $0x610] sm:$0xff] }
 0x180   : > { %3874 = vmatpush1.bf16.msra.mxu1 %v8094_v26  ;;  %v460_v26 = vld [vmem:[%s9681_s21 + $0x230] sm:$0xff] }
 0x181   : > { %3875 = vmatprep.subr.bf16.mxu1 %v8215_v29  ;;  %v588_v29 = vld [vmem:[%s9681_s21 + $0x630] sm:$0xff]  ;;  %v8031_v33 = vcombine.high %v456_v25, %v460_v26  ;;  %v8030_v41 = vcombine.low %v456_v25, %v460_v26 }
 0x182   : > { %3835 = vmatpush2.bf16.msra.mxu0 %v8086_v35  ;;  %v8159_v34 = vcombine.high %v584_v27, %v588_v29  ;;  %v704_v35 = vld [vmem:[%s9681_s21 + $0x9d0] sm:$0xff]  ;;  %v8158_v42 = vcombine.low %v584_v27, %v588_v29 }
 0x183   : > { %3836 = vmatprep.subr.bf16.mxu0 %v8079_v38  ;;  %v832_v38 = vld [vmem:[%s9681_s21 + $0xdd0] sm:$0xff] }
 0x184   : > { %3876 = vmatpush2.bf16.msra.mxu1 %v8214_v36  ;;  %v708_v36 = vld [vmem:[%s9681_s21 + $0x9f0] sm:$0xff] }
 0x185   : > { %3877 = vmatprep.subr.bf16.mxu1 %v8207_v39  ;;  %v836_v39 = vld [vmem:[%s9681_s21 + $0xdf0] sm:$0xff]  ;;  %v8279_v43 = vcombine.high %v704_v35, %v708_v36  ;;  %v8278_v23 = vcombine.low %v704_v35, %v708_v36 }
 0x186   : > { %3837 = vmatpush2.bf16.msra.mxu0 %v8078_v45  ;;  %v8407_v44 = vcombine.high %v832_v38, %v836_v39  ;;  %v696_v45 = vld [vmem:[%s9681_s21 + $0x990] sm:$0xff]  ;;  %v8406_v48 = vcombine.low %v832_v38, %v836_v39 }
 0x187   : > { %3838 = vmatprep.subr.bf16.mxu0 %v8071_v46  ;;  %v824_v46 = vld [vmem:[%s9681_s21 + $0xd90] sm:$0xff] }
 0x188   : > { %3878 = vmatpush2.bf16.msra.mxu1 %v8206_v20  ;;  %v700_v20 = vld [vmem:[%s9681_s21 + $0x9b0] sm:$0xff] }
 0x189   : > { %3879 = vmatprep.subr.bf16.mxu1 %v8199_v47  ;;  %v828_v47 = vld [vmem:[%s9681_s21 + $0xdb0] sm:$0xff]  ;;  %v8271_v49 = vcombine.high %v696_v45, %v700_v20  ;;  %v8270_v18 = vcombine.low %v696_v45, %v700_v20 }
 0x18a   : > { %3839 = vmatpush2.bf16.msra.mxu0 %v8070_v51  ;;  %v8399_v51 = vcombine.high %v824_v46, %v828_v47  ;;  %v816_v57 = vld [vmem:[%s9681_s21 + $0xd50] sm:$0xff] }
 0x18b   : > { %3840 = vmatprep.subr.bf16.mxu0 %v8063_v53  ;;  %v692_v53 = vld [vmem:[%s9681_s21 + $0x970] sm:$0xff] }
 0x18c   : > { %3880 = vmatpush2.bf16.msra.mxu1 %v8198_v52  ;;  %v688_v52 = vld [vmem:[%s9681_s21 + $0x950] sm:$0xff] }
 0x18d   : > { %3881 = vmatprep.subr.bf16.mxu1 %v8191_v56  ;;  %v820_v58 = vld [vmem:[%s9681_s21 + $0xd70] sm:$0xff]  ;;  %v8262_v14 = vcombine.low %v688_v52, %v692_v53 }
 0x18e   : > { %3841 = vmatpush2.bf16.msra.mxu0 %v8062_v63  ;;  %v8391_v54 = vcombine.high %v816_v57, %v820_v58  ;;  %v680_v55 = vld [vmem:[%s9681_s21 + $0x910] sm:$0xff] }
 0x18f   : > { %3842 = vmatprep.subr.bf16.mxu0 %v8055_v1  ;;  %v8398_v1 = vcombine.low %v824_v46, %v828_v47  ;;  %v684_v6 = vld [vmem:[%s9681_s21 + $0x930] sm:$0xff] }
 0x190   : > { %3882 = vmatpush2.bf16.msra.mxu1 %v8190_v0  ;;  %v672_v27 = vld [vmem:[%s9681_s21 + $0x8d0] sm:$0xff] }
 0x191   : > { %3883 = vmatprep.subr.bf16.mxu1 %v8183_v2  ;;  %v8263_v2 = vcombine.high %v688_v52, %v692_v53  ;;  %v676_v29 = vld [vmem:[%s9681_s21 + $0x8f0] sm:$0xff] }
 0x192   : > { %3843 = vmatpush2.bf16.msra.mxu0 %v8054_v7  ;;  %v379_v7 = vld [vmem:[#allocation2] sm:$0xff]  ;;  %v8247_v35 = vcombine.high %v672_v27, %v676_v29 }
 0x193   : > { %3844 = vmatprep.subr.bf16.mxu0 %v8047_v9  ;;  %v808_v9 = vld [vmem:[%s9681_s21 + $0xd10] sm:$0xff] }
 0x194   : > { %3884 = vmatpush2.bf16.msra.mxu1 %v8182_v8  ;;  %v664_v38 = vld [vmem:[%s9681_s21 + $0x890] sm:$0xff] }
 0x195   : > { %3885 = vmatprep.subr.bf16.mxu1 %v8175_v10  ;;  %v812_v10 = vld [vmem:[%s9681_s21 + $0xd30] sm:$0xff] }
 0x196   : > { %3845 = vmatpush2.bf16.msra.mxu0 %v8046_v15  ;;  %v8383_v26 = vcombine.high %v808_v9, %v812_v10  ;;  %v668_v39 = vld [vmem:[%s9681_s21 + $0x8b0] sm:$0xff] }
 0x197   : > { %3846 = vmatprep.subr.bf16.mxu0 %v8039_v19  ;;  %v8255_v19 = vcombine.high %v680_v55, %v684_v6  ;;  %v8239_v45 = vcombine.high %v664_v38, %v668_v39  ;;  %v656_v46 = vld [vmem:[%s9681_s21 + $0x850] sm:$0xff] }
 0x198   : > { %3886 = vmatpush2.bf16.msra.mxu1 %v8174_v16  ;;  %v8390_v16 = vcombine.low %v816_v57, %v820_v58  ;;  %v660_v47 = vld [vmem:[%s9681_s21 + $0x870] sm:$0xff] }
 0x199   : > { %3887 = vmatprep.subr.bf16.mxu1 %v8167_v22  ;;  %v648_v53 = vld [vmem:[%s9681_s21 + $0x810] sm:$0xff] }
 0x19a   : > { %3847 = vmatpush2.bf16.msra.mxu0 %v8038_v31  ;;  %v800_v31 = vld [vmem:[%s9681_s21 + $0xcd0] sm:$0xff] }
 0x19b   : > { %3848 = vmatprep.subr.bf16.mxu0 %v8031_v33  ;;  %v8254_v33 = vcombine.low %v680_v55, %v684_v6  ;;  %v776_v57 = vld [vmem:[%s9681_s21 + $0xc10] sm:$0xff] }
 0x19c   : > { %3888 = vmatpush2.bf16.msra.mxu1 %v8166_v32  ;;  %v804_v32 = vld [vmem:[%s9681_s21 + $0xcf0] sm:$0xff] }
 0x19d   : > { %3889 = vmatprep.subr.bf16.mxu1 %v8159_v34  ;;  %v8382_v34 = vcombine.low %v808_v9, %v812_v10  ;;  %v8375_v36 = vcombine.high %v800_v31, %v804_v32  ;;  %v780_v58 = vld [vmem:[%s9681_s21 + $0xc30] sm:$0xff] }
 0x19e   : > { %3849 = vmatpush2.bf16.msra.mxu0 %v8030_v41  ;;  %v792_v41 = vld [vmem:[%s9681_s21 + $0xc90] sm:$0xff] }
 0x19f   : > { %3900 = vmatprep.subr.bf16.mxu0 %v8279_v43  ;;  %v8246_v43 = vcombine.low %v672_v27, %v676_v29  ;;  %v760_v55 = vld [vmem:[%s9681_s21 + $0xb90] sm:$0xff] }
 0x1a0   : > { %3890 = vmatpush2.bf16.msra.mxu1 %v8158_v42  ;;  %v796_v42 = vld [vmem:[%s9681_s21 + $0xcb0] sm:$0xff] }
 0x1a1   : > { %3941 = vmatprep.subr.bf16.mxu1 %v8407_v44  ;;  %v3606_v56 = vpop.f32.mrf.mxu0  ;;  %3851 = vmatmul.mubr.bf16.vlgmr.msra.gmra.mxu0 %v9787_v17  ;;  %v8374_v44 = vcombine.low %v800_v31, %v804_v32  ;;  %v8367_v20 = vcombine.high %v792_v41, %v796_v42  ;;  %v764_v6 = vld [vmem:[%s9681_s21 + $0xbb0] sm:$0xff] }
 0x1a2   : > { %v3607_v62 = vadd.f32 %v3606_v56, %v3566_v50  ;;  %3901 = vmatpush1.bf16.msra.mxu0 %v8278_v23  ;;  %3932 = vmatprep.mubr.bf16.mxu0 %v9805_v28  ;;  %v784_v23 = vld [vmem:[%s9681_s21 + $0xc50] sm:$0xff]  ;;  %v8366_v50 = vcombine.low %v792_v41, %v796_v42 }
 0x1a3   : > { %v3647_v63 = vpop.f32.mrf.mxu1  ;;  %3892 = vmatmul.mubr.bf16.vlgmr.msra.gmra.mxu1 %v9796_v21  ;;  %v3608_v0 = vpop.f32.mrf.mxu0  ;;  %3902 = vmatprep.subr.bf16.mxu0 %v8271_v49  ;;  %v8238_v49 = vcombine.low %v664_v38, %v668_v39  ;;  %v652_v56 = vld [vmem:[%s9681_s21 + $0x830] sm:$0xff] }
 0x1a4   : > { %3942 = vmatpush1.bf16.msra.mxu1 %v8406_v48  ;;  %v3648_v3 = vadd.f32 %v3647_v63, %v3607_v62  ;;  %v3609_v4 = vadd.f32 %v3608_v0, %v3568_v61  ;;  %3973 = vmatprep.mubr.bf16.mxu1 %v9812_v30  ;;  %v788_v48 = vld [vmem:[%s9681_s21 + $0xc70] sm:$0xff]  ;;  %v8230_v61 = vcombine.low %v656_v46, %v660_v47 }
 0x1a5   : > { %v3649_v5 = vpop.f32.mrf.mxu1  ;;  %3943 = vmatprep.subr.bf16.mxu1 %v8399_v51  ;;  %v3610_v8 = vpop.f32.mrf.mxu0  ;;  %v8231_v51 = vcombine.high %v656_v46, %v660_v47  ;;  %v8359_v52 = vcombine.high %v784_v23, %v788_v48  ;;  %v8358_v62 = vcombine.low %v784_v23, %v788_v48  ;;  %v8223_v63 = vcombine.high %v648_v53, %v652_v56  ;;  %v772_v0 = vld [vmem:[%s9681_s21 + $0xbf0] sm:$0xff] }
 0x1a6   : > { %v4146_v11 = vadd.f32 %v3648_v3, %v378_v24  ;;  %v3650_v12 = vadd.f32 %v3649_v5, %v3609_v4  ;;  %3903 = vmatpush1.bf16.msra.mxu0 %v8270_v18  ;;  %v8351_v18 = vcombine.high %v776_v57, %v780_v58  ;;  %v768_v24 = vld [vmem:[%s9681_s21 + $0xbd0] sm:$0xff]  ;;  %v8222_v3 = vcombine.low %v648_v53, %v652_v56 }
 0x1a7   : > { %v3651_v13 = vpop.f32.mrf.mxu1  ;;  %v3611_v15 = vpop.f32.mrf.mxu0  ;;  %3904 = vmatprep.subr.bf16.mxu0 %v8263_v2  ;;  %v900_v2 = vld [vmem:[%s9681_s21 + $0xff0] sm:$0xff]  ;;  %v8350_v4 = vcombine.low %v776_v57, %v780_v58  ;;  %v8343_v5 = vcombine.high %v768_v24, %v772_v0  ;;  %v8342_v9 = vcombine.low %v768_v24, %v772_v0 }
 0x1a8   : > { %3944 = vmatpush1.bf16.msra.mxu1 %v8398_v1  ;;  %4154 = vst [vmem:[#allocation2 + $0x30] sm:$0xff] %v4146_v11  ;;  %v4147_v22 = vadd.f32 %v3650_v12, %v379_v7  ;;  %v896_v1 = vld [vmem:[%s9681_s21 + $0xfd0] sm:$0xff]  ;;  %v8335_v11 = vcombine.high %v760_v55, %v764_v6 }
 0x1a9   : > { %v3652_v25 = vpop.f32.mrf.mxu1  ;;  %3945 = vmatprep.subr.bf16.mxu1 %v8391_v54  ;;  %v8471_v54 = vcombine.high %v896_v1, %v900_v2  ;;  %v888_v7 = vld [vmem:[%s9681_s21 + $0xf90] sm:$0xff]  ;;  %v8470_v10 = vcombine.low %v896_v1, %v900_v2 }
 0x1aa   : > { %4155 = vst [vmem:[#allocation2] sm:$0xff] %v4147_v22  ;;  %3905 = vmatpush1.bf16.msra.mxu0 %v8262_v14  ;;  %v892_v8 = vld [vmem:[%s9681_s21 + $0xfb0] sm:$0xff] }
 0x1ab   : > { %3906 = vmatprep.subr.bf16.mxu0 %v8255_v19  ;;  %v8463_v12 = vcombine.high %v888_v7, %v892_v8  ;;  %v752_v13 = vld [vmem:[%s9681_s21 + $0xb50] sm:$0xff]  ;;  %v8334_v19 = vcombine.low %v760_v55, %v764_v6  ;;  %v8462_v22 = vcombine.low %v888_v7, %v892_v8  ;;  %v449_v55 = vld [vmem:[%s9681_s21 + $0x1d8] sm:$0xff] }
 0x1ac   : > { %3946 = vmatpush1.bf16.msra.mxu1 %v8390_v16  ;;  %v756_v14 = vld [vmem:[%s9681_s21 + $0xb70] sm:$0xff]  ;;  %v453_v6 = vld [vmem:[%s9681_s21 + $0x1f8] sm:$0xff] }
 0x1ad   : > { %3947 = vmatprep.subr.bf16.mxu1 %v8383_v26  ;;  %v880_v15 = vld [vmem:[%s9681_s21 + $0xf50] sm:$0xff]  ;;  %v8327_v25 = vcombine.high %v752_v13, %v756_v14  ;;  %v577_v7 = vld [vmem:[%s9681_s21 + $0x5d8] sm:$0xff] }
 0x1ae   : > { %3907 = vmatpush1.bf16.msra.mxu0 %v8254_v33  ;;  %v884_v16 = vld [vmem:[%s9681_s21 + $0xf70] sm:$0xff]  ;;  %v8326_v33 = vcombine.low %v752_v13, %v756_v14  ;;  %v581_v8 = vld [vmem:[%s9681_s21 + $0x5f8] sm:$0xff] }
 0x1af   : > { %3908 = vmatprep.subr.bf16.mxu0 %v8247_v35  ;;  %v8455_v26 = vcombine.high %v880_v15, %v884_v16  ;;  %v744_v27 = vld [vmem:[%s9681_s21 + $0xb10] sm:$0xff]  ;;  %v441_v13 = vld [vmem:[%s9681_s21 + $0x198] sm:$0xff] }
 0x1b0   : > { %3948 = vmatpush1.bf16.msra.mxu1 %v8382_v34  ;;  %v748_v29 = vld [vmem:[%s9681_s21 + $0xb30] sm:$0xff]  ;;  %v8454_v34 = vcombine.low %v880_v15, %v884_v16  ;;  %v445_v14 = vld [vmem:[%s9681_s21 + $0x1b8] sm:$0xff] }
 0x1b1   : > { %3949 = vmatprep.subr.bf16.mxu1 %v8375_v36  ;;  %v872_v31 = vld [vmem:[%s9681_s21 + $0xf10] sm:$0xff]  ;;  %v8319_v35 = vcombine.high %v744_v27, %v748_v29  ;;  %v569_v15 = vld [vmem:[%s9681_s21 + $0x598] sm:$0xff] }
 0x1b2   : > { %3909 = vmatpush1.bf16.msra.mxu0 %v8246_v43  ;;  %v876_v32 = vld [vmem:[%s9681_s21 + $0xf30] sm:$0xff]  ;;  %v8318_v43 = vcombine.low %v744_v27, %v748_v29  ;;  %v573_v16 = vld [vmem:[%s9681_s21 + $0x5b8] sm:$0xff] }
 0x1b3   : > { %3910 = vmatprep.subr.bf16.mxu0 %v8239_v45  ;;  %v8447_v36 = vcombine.high %v872_v31, %v876_v32  ;;  %v736_v38 = vld [vmem:[%s9681_s21 + $0xad0] sm:$0xff]  ;;  %v433_v27 = vld [vmem:[%s9681_s21 + $0x158] sm:$0xff] }
 0x1b4   : > { %3950 = vmatpush1.bf16.msra.mxu1 %v8374_v44  ;;  %v740_v39 = vld [vmem:[%s9681_s21 + $0xaf0] sm:$0xff]  ;;  %v8446_v44 = vcombine.low %v872_v31, %v876_v32  ;;  %v437_v29 = vld [vmem:[%s9681_s21 + $0x178] sm:$0xff] }
 0x1b5   : > { %3951 = vmatprep.subr.bf16.mxu1 %v8367_v20  ;;  %v864_v41 = vld [vmem:[%s9681_s21 + $0xed0] sm:$0xff]  ;;  %v8311_v45 = vcombine.high %v736_v38, %v740_v39  ;;  %v561_v32 = vld [vmem:[%s9681_s21 + $0x558] sm:$0xff] }
 0x1b6   : > { %3911 = vmatpush1.bf16.msra.mxu0 %v8238_v49  ;;  %v868_v42 = vld [vmem:[%s9681_s21 + $0xef0] sm:$0xff]  ;;  %v8310_v49 = vcombine.low %v736_v38, %v740_v39  ;;  %v8144_v38 = vcombine.low %v569_v15, %v573_v16  ;;  %v8009_v39 = vcombine.high %v433_v27, %v437_v29 }
 0x1b7   : > { %3912 = vmatprep.subr.bf16.mxu0 %v8231_v51  ;;  %v8439_v20 = vcombine.high %v864_v41, %v868_v42  ;;  %v728_v46 = vld [vmem:[%s9681_s21 + $0xa90] sm:$0xff] }
 0x1b8   : > { %3952 = vmatpush1.bf16.msra.mxu1 %v8366_v50  ;;  %v732_v47 = vld [vmem:[%s9681_s21 + $0xab0] sm:$0xff]  ;;  %v8438_v50 = vcombine.low %v864_v41, %v868_v42 }
 0x1b9   : > { %3953 = vmatprep.subr.bf16.mxu1 %v8359_v52  ;;  %v856_v23 = vld [vmem:[%s9681_s21 + $0xe90] sm:$0xff]  ;;  %v8303_v51 = vcombine.high %v728_v46, %v732_v47 }
 0x1ba   : > { %3913 = vmatpush1.bf16.msra.mxu0 %v8230_v61  ;;  %v860_v48 = vld [vmem:[%s9681_s21 + $0xeb0] sm:$0xff]  ;;  %v8302_v61 = vcombine.low %v728_v46, %v732_v47  ;;  %v557_v46 = vld [vmem:[%s9681_s21 + $0x538] sm:$0xff] }
 0x1bb   : > { %3914 = vmatprep.subr.bf16.mxu0 %v8223_v63  ;;  %v8431_v52 = vcombine.high %v856_v23, %v860_v48  ;;  %v720_v53 = vld [vmem:[%s9681_s21 + $0xa50] sm:$0xff] }
 0x1bc   : > { %3954 = vmatpush1.bf16.msra.mxu1 %v8358_v62  ;;  %v724_v56 = vld [vmem:[%s9681_s21 + $0xa70] sm:$0xff]  ;;  %v8430_v62 = vcombine.low %v856_v23, %v860_v48  ;;  %v8008_v23 = vcombine.low %v433_v27, %v437_v29  ;;  %v641_v27 = vld [vmem:[%s9681_s21 + $0x7d8] sm:$0xff] }
 0x1bd   : > { %3955 = vmatprep.subr.bf16.mxu1 %v8351_v18  ;;  %v848_v57 = vld [vmem:[%s9681_s21 + $0xe50] sm:$0xff]  ;;  %v8295_v63 = vcombine.high %v720_v53, %v724_v56  ;;  %v645_v29 = vld [vmem:[%s9681_s21 + $0x7f8] sm:$0xff] }
 0x1be   : > { %3915 = vmatpush1.bf16.msra.mxu0 %v8222_v3  ;;  %v852_v58 = vld [vmem:[%s9681_s21 + $0xe70] sm:$0xff]  ;;  %v8294_v3 = vcombine.low %v720_v53, %v724_v56  ;;  %v421_v53 = vld [vmem:[%s9681_s21 + $0xf8] sm:$0xff] }
 0x1bf   : > { %3916 = vmatprep.subr.bf16.mxu0 %v8343_v5  ;;  %v8423_v18 = vcombine.high %v848_v57, %v852_v58  ;;  %v712_v24 = vld [vmem:[%s9681_s21 + $0xa10] sm:$0xff]  ;;  %v545_v56 = vld [vmem:[%s9681_s21 + $0x4d8] sm:$0xff] }
 0x1c0   : > { %3956 = vmatpush1.bf16.msra.mxu1 %v8350_v4  ;;  %v716_v0 = vld [vmem:[%s9681_s21 + $0xa30] sm:$0xff]  ;;  %v8422_v4 = vcombine.low %v848_v57, %v852_v58  ;;  %v549_v57 = vld [vmem:[%s9681_s21 + $0x4f8] sm:$0xff] }
 0x1c1   : > { %3957 = vmatprep.subr.bf16.mxu1 %v8471_v54  ;;  %v840_v1 = vld [vmem:[%s9681_s21 + $0xe10] sm:$0xff]  ;;  %v8287_v5 = vcombine.high %v712_v24, %v716_v0 }
 0x1c2   : > { %3917 = vmatpush2.bf16.msra.mxu0 %v8342_v9  ;;  %v844_v2 = vld [vmem:[%s9681_s21 + $0xe30] sm:$0xff]  ;;  %v8286_v9 = vcombine.low %v712_v24, %v716_v0  ;;  %v537_v24 = vld [vmem:[%s9681_s21 + $0x498] sm:$0xff] }
 0x1c3   : > { %3918 = vmatprep.subr.bf16.mxu0 %v8335_v11  ;;  %v8415_v54 = vcombine.high %v840_v1, %v844_v2  ;;  %v8025_v11 = vcombine.high %v449_v55, %v453_v6  ;;  %v541_v0 = vld [vmem:[%s9681_s21 + $0x4b8] sm:$0xff] }
 0x1c4   : > { %3958 = vmatpush2.bf16.msra.mxu1 %v8470_v10  ;;  %v8414_v10 = vcombine.low %v840_v1, %v844_v2  ;;  %v8120_v2 = vcombine.low %v545_v56, %v549_v57 }
 0x1c5   : > { %3959 = vmatprep.subr.bf16.mxu1 %v8463_v12  ;;  %v8153_v12 = vcombine.high %v577_v7, %v581_v8 }
 0x1c6   : > { %3919 = vmatpush2.bf16.msra.mxu0 %v8334_v19  ;;  %v8024_v19 = vcombine.low %v449_v55, %v453_v6  ;;  %v529_v55 = vld [vmem:[%s9681_s21 + $0x458] sm:$0xff] }
 0x1c7   : > { %3920 = vmatprep.subr.bf16.mxu0 %v8327_v25  ;;  %v8017_v25 = vcombine.high %v441_v13, %v445_v14  ;;  %v533_v6 = vld [vmem:[%s9681_s21 + $0x478] sm:$0xff] }
 0x1c8   : > { %3960 = vmatpush2.bf16.msra.mxu1 %v8462_v22  ;;  %v8152_v22 = vcombine.low %v577_v7, %v581_v8  ;;  %v8112_v8 = vcombine.low %v537_v24, %v541_v0 }
 0x1c9   : > { %3961 = vmatprep.subr.bf16.mxu1 %v8455_v26  ;;  %v8145_v26 = vcombine.high %v569_v15, %v573_v16  ;;  %v8104_v16 = vcombine.low %v529_v55, %v533_v6 }
 0x1ca   : > { %3921 = vmatpush2.bf16.msra.mxu0 %v8326_v33  ;;  %v565_v33 = vld [vmem:[%s9681_s21 + $0x578] sm:$0xff] }
 0x1cb   : > { %3922 = vmatprep.subr.bf16.mxu0 %v8319_v35  ;;  %v8016_v35 = vcombine.low %v441_v13, %v445_v14  ;;  %v8137_v42 = vcombine.high %v561_v32, %v565_v33  ;;  %v521_v13 = vld [vmem:[%s9681_s21 + $0x418] sm:$0xff] }
 0x1cc   : > { %3962 = vmatpush2.bf16.msra.mxu1 %v8454_v34  ;;  %v525_v14 = vld [vmem:[%s9681_s21 + $0x438] sm:$0xff] }
 0x1cd   : > { %3963 = vmatprep.subr.bf16.mxu1 %v8447_v36 }
 0x1ce   : > { %3923 = vmatpush2.bf16.msra.mxu0 %v8318_v43  ;;  %v425_v43 = vld [vmem:[%s9681_s21 + $0x118] sm:$0xff] }
 0x1cf   : > { %3924 = vmatprep.subr.bf16.mxu0 %v8311_v45 }
 0x1d0   : > { %3964 = vmatpush2.bf16.msra.mxu1 %v8446_v44  ;;  %v429_v44 = vld [vmem:[%s9681_s21 + $0x138] sm:$0xff] }
 0x1d1   : > { %3965 = vmatprep.subr.bf16.mxu1 %v8439_v20  ;;  %v553_v20 = vld [vmem:[%s9681_s21 + $0x518] sm:$0xff] }
 0x1d2   : > { %3925 = vmatpush2.bf16.msra.mxu0 %v8310_v49  ;;  %v8136_v49 = vcombine.low %v561_v32, %v565_v33  ;;  %v8128_v58 = vcombine.low %v553_v20, %v557_v46  ;;  %v8096_v33 = vcombine.low %v521_v13, %v525_v14 }
 0x1d3   : > { %3926 = vmatprep.subr.bf16.mxu0 %v8303_v51 }
 0x1d4   : > { %3966 = vmatpush2.bf16.msra.mxu1 %v8438_v50  ;;  %v8001_v50 = vcombine.high %v425_v43, %v429_v44 }
 0x1d5   : > { %3967 = vmatprep.subr.bf16.mxu1 %v8431_v52  ;;  %v417_v52 = vld [vmem:[%s9681_s21 + $0xd8] sm:$0xff] }
 0x1d6   : > { %3927 = vmatpush2.bf16.msra.mxu0 %v8302_v61  ;;  %v7993_v61 = vcombine.high %v417_v52, %v421_v53  ;;  %v7992_v1 = vcombine.low %v417_v52, %v421_v53 }
 0x1d7   : > { %3928 = vmatprep.subr.bf16.mxu0 %v8295_v63  ;;  %v409_v63 = vld [vmem:[%s9681_s21 + $0x98] sm:$0xff] }
 0x1d8   : > { %3968 = vmatpush2.bf16.msra.mxu1 %v8430_v62  ;;  %v8121_v62 = vcombine.high %v545_v56, %v549_v57  ;;  %v489_v56 = vld [vmem:[%s9681_s21 + $0x318] sm:$0xff] }
 0x1d9   : > { %3969 = vmatprep.subr.bf16.mxu1 %v8423_v18  ;;  %v413_v18 = vld [vmem:[%s9681_s21 + $0xb8] sm:$0xff] }
 0x1da   : > { %3929 = vmatpush2.bf16.msra.mxu0 %v8294_v3  ;;  %v7985_v3 = vcombine.high %v409_v63, %v413_v18  ;;  %v7984_v7 = vcombine.low %v409_v63, %v413_v18  ;;  %v493_v57 = vld [vmem:[%s9681_s21 + $0x338] sm:$0xff] }
 0x1db   : > { %3930 = vmatprep.subr.bf16.mxu0 %v8287_v5  ;;  %v401_v5 = vld [vmem:[%s9681_s21 + $0x58] sm:$0xff]  ;;  %v8065_v63 = vcombine.high %v489_v56, %v493_v57 }
 0x1dc   : > { %3970 = vmatpush2.bf16.msra.mxu1 %v8422_v4  ;;  %v8113_v4 = vcombine.high %v537_v24, %v541_v0  ;;  %v481_v24 = vld [vmem:[%s9681_s21 + $0x2d8] sm:$0xff] }
 0x1dd   : > { %3971 = vmatprep.subr.bf16.mxu1 %v8415_v54  ;;  %v405_v54 = vld [vmem:[%s9681_s21 + $0x78] sm:$0xff] }
 0x1de   : > { %3931 = vmatpush2.bf16.msra.mxu0 %v8286_v9  ;;  %v7977_v9 = vcombine.high %v401_v5, %v405_v54  ;;  %v7976_v15 = vcombine.low %v401_v5, %v405_v54  ;;  %v485_v0 = vld [vmem:[%s9681_s21 + $0x2f8] sm:$0xff] }
 0x1df   : > { %3982 = vmatprep.subr.bf16.mxu0 %v8025_v11  ;;  %v393_v11 = vld [vmem:[%s9681_s21 + $0x18] sm:$0xff]  ;;  %v8057_v5 = vcombine.high %v481_v24, %v485_v0 }
 0x1e0   : > { %3972 = vmatpush2.bf16.msra.mxu1 %v8414_v10  ;;  %v8105_v10 = vcombine.high %v529_v55, %v533_v6  ;;  %v473_v55 = vld [vmem:[%s9681_s21 + $0x298] sm:$0xff] }
 0x1e1   : > { %4023 = vmatprep.subr.bf16.mxu1 %v8153_v12  ;;  %v10171_v31 = vpop.f32.mrf.mxu0  ;;  %3933 = vmatmul.mubr.bf16.vlgmr.msra.gmra.mxu0 %v9877_v37  ;;  %v397_v12 = vld [vmem:[%s9681_s21 + $0x38] sm:$0xff] }
 0x1e2   : > { %3983 = vmatpush1.bf16.msra.mxu0 %v8024_v19  ;;  %4014 = vmatprep.mubr.bf16.mxu0 %v9737_v59  ;;  %v8129_v59 = vcombine.high %v553_v20, %v557_v46  ;;  %v7969_v19 = vcombine.high %v393_v11, %v397_v12  ;;  %v7968_v32 = vcombine.low %v393_v11, %v397_v12  ;;  %v477_v6 = vld [vmem:[%s9681_s21 + $0x2b8] sm:$0xff] }
 0x1e3   : > { %v10176_v34 = vpop.f32.mrf.mxu1  ;;  %3974 = vmatmul.mubr.bf16.vlgmr.msra.gmra.mxu1 %v9883_v40  ;;  %v10179_v36 = vpop.f32.mrf.mxu0  ;;  %3984 = vmatprep.subr.bf16.mxu0 %v8017_v25  ;;  %v513_v25 = vld [vmem:[%s9681_s21 + $0x3d8] sm:$0xff]  ;;  %v8216_v20 = vcombine.low %v641_v27, %v645_v29  ;;  %v8049_v11 = vcombine.high %v473_v55, %v477_v6 }
 0x1e4   : > { %4024 = vmatpush1.bf16.msra.mxu1 %v8152_v22  ;;  %4055 = vmatprep.mubr.bf16.mxu1 %v9741_v60  ;;  %v8000_v60 = vcombine.low %v425_v43, %v429_v44  ;;  %v8097_v22 = vcombine.high %v521_v13, %v525_v14  ;;  %v633_v43 = vld [vmem:[%s9681_s21 + $0x798] sm:$0xff] }
 0x1e5   : > { %v10181_v41 = vpop.f32.mrf.mxu1  ;;  %4025 = vmatprep.subr.bf16.mxu1 %v8145_v26  ;;  %v3692_v45 = vpop.f32.mrf.mxu0  ;;  %v517_v26 = vld [vmem:[%s9681_s21 + $0x3f8] sm:$0xff] }
 0x1e6   : > { %3985 = vmatpush1.bf16.msra.mxu0 %v8016_v35  ;;  %v8089_v35 = vcombine.high %v513_v25, %v517_v26  ;;  %v637_v44 = vld [vmem:[%s9681_s21 + $0x7b8] sm:$0xff]  ;;  %v8088_v45 = vcombine.low %v513_v25, %v517_v26 }
 0x1e7   : > { %v3733_v47 = vpop.f32.mrf.mxu1  ;;  %v3693_v48 = vpop.f32.mrf.mxu0  ;;  %3986 = vmatprep.subr.bf16.mxu0 %v8009_v39  ;;  %v505_v39 = vld [vmem:[%s9681_s21 + $0x398] sm:$0xff] }
 0x1e8   : > { %4026 = vmatpush1.bf16.msra.mxu1 %v8144_v38  ;;  %v8217_v38 = vcombine.high %v641_v27, %v645_v29  ;;  %v8209_v47 = vcombine.high %v633_v43, %v637_v44  ;;  %v501_v48 = vld [vmem:[%s9681_s21 + $0x378] sm:$0xff] }
 0x1e9   : > { %v3734_v51 = vpop.f32.mrf.mxu1  ;;  %4027 = vmatprep.subr.bf16.mxu1 %v8137_v42  ;;  %v509_v42 = vld [vmem:[%s9681_s21 + $0x3b8] sm:$0xff] }
 0x1ea   : > { %3987 = vmatpush1.bf16.msra.mxu0 %v8008_v23  ;;  %v8081_v46 = vcombine.high %v505_v39, %v509_v42  ;;  %v497_v23 = vld [vmem:[%s9681_s21 + $0x358] sm:$0xff]  ;;  %v8080_v51 = vcombine.low %v505_v39, %v509_v42 }
 0x1eb   : > { %3988 = vmatprep.subr.bf16.mxu0 %v8001_v50  ;;  %v629_v50 = vld [vmem:[%s9681_s21 + $0x778] sm:$0xff]  ;;  %v8073_v52 = vcombine.high %v497_v23, %v501_v48 }
 0x1ec   : > { %4028 = vmatpush1.bf16.msra.mxu1 %v8136_v49  ;;  %v625_v49 = vld [vmem:[%s9681_s21 + $0x758] sm:$0xff] }
 0x1ed   : > { %4029 = vmatprep.subr.bf16.mxu1 %v8129_v59  ;;  %v8208_v59 = vcombine.low %v633_v43, %v637_v44  ;;  %v8201_v53 = vcombine.high %v625_v49, %v629_v50  ;;  %v465_v13 = vld [vmem:[%s9681_s21 + $0x258] sm:$0xff] }
 0x1ee   : > { %3989 = vmatpush1.bf16.msra.mxu0 %v8000_v60  ;;  %v617_v60 = vld [vmem:[%s9681_s21 + $0x718] sm:$0xff] }
 0x1ef   : > { %3990 = vmatprep.subr.bf16.mxu0 %v7993_v61  ;;  %v8072_v61 = vcombine.low %v497_v23, %v501_v48  ;;  %v469_v14 = vld [vmem:[%s9681_s21 + $0x278] sm:$0xff] }
 0x1f0   : > { %4030 = vmatpush1.bf16.msra.mxu1 %v8128_v58  ;;  %v621_v58 = vld [vmem:[%s9681_s21 + $0x738] sm:$0xff]  ;;  %v8041_v25 = vcombine.high %v465_v13, %v469_v14 }
 0x1f1   : > { %4031 = vmatprep.subr.bf16.mxu1 %v8121_v62  ;;  %v8200_v62 = vcombine.low %v625_v49, %v629_v50  ;;  %v8193_v18 = vcombine.high %v617_v60, %v621_v58  ;;  %v457_v27 = vld [vmem:[%s9681_s21 + $0x218] sm:$0xff] }
 0x1f2   : > { %3991 = vmatpush1.bf16.msra.mxu0 %v7992_v1  ;;  %v609_v1 = vld [vmem:[%s9681_s21 + $0x6d8] sm:$0xff] }
 0x1f3   : > { %3992 = vmatprep.subr.bf16.mxu0 %v7985_v3  ;;  %v8064_v3 = vcombine.low %v489_v56, %v493_v57  ;;  %v461_v29 = vld [vmem:[%s9681_s21 + $0x238] sm:$0xff]  ;;  %v3730_v57 = vadd.f32 %v10176_v34, %v10171_v31  ;;  %v380_v34 = vld [vmem:[#allocation2 + $0x18] sm:$0xff] }
 0x1f4   : > { %4032 = vmatpush1.bf16.msra.mxu1 %v8120_v2  ;;  %v613_v2 = vld [vmem:[%s9681_s21 + $0x6f8] sm:$0xff]  ;;  %v8033_v39 = vcombine.high %v457_v27, %v461_v29 }
 0x1f5   : > { %4033 = vmatprep.subr.bf16.mxu1 %v8113_v4  ;;  %v8192_v4 = vcombine.low %v617_v60, %v621_v58  ;;  %v8185_v54 = vcombine.high %v609_v1, %v613_v2  ;;  %v705_v43 = vld [vmem:[%s9681_s21 + $0x9d8] sm:$0xff] }
 0x1f6   : > { %3993 = vmatpush1.bf16.msra.mxu0 %v7984_v7  ;;  %v601_v7 = vld [vmem:[%s9681_s21 + $0x698] sm:$0xff] }
 0x1f7   : > { %3994 = vmatprep.subr.bf16.mxu0 %v7977_v9  ;;  %v8056_v9 = vcombine.low %v481_v24, %v485_v0  ;;  %v709_v44 = vld [vmem:[%s9681_s21 + $0x9f8] sm:$0xff]  ;;  %v3732_v24 = vadd.f32 %v10181_v41, %v10179_v36 }
 0x1f8   : > { %4034 = vmatpush1.bf16.msra.mxu1 %v8112_v8  ;;  %v605_v8 = vld [vmem:[%s9681_s21 + $0x6b8] sm:$0xff]  ;;  %v8281_v23 = vcombine.high %v705_v43, %v709_v44 }
 0x1f9   : > { %4035 = vmatprep.subr.bf16.mxu1 %v8105_v10  ;;  %v8184_v10 = vcombine.low %v609_v1, %v613_v2  ;;  %v8177_v12 = vcombine.high %v601_v7, %v605_v8  ;;  %v697_v49 = vld [vmem:[%s9681_s21 + $0x998] sm:$0xff] }
 0x1fa   : > { %3995 = vmatpush1.bf16.msra.mxu0 %v7976_v15  ;;  %v593_v15 = vld [vmem:[%s9681_s21 + $0x658] sm:$0xff] }
 0x1fb   : > { %3996 = vmatprep.subr.bf16.mxu0 %v7969_v19  ;;  %v8048_v19 = vcombine.low %v473_v55, %v477_v6  ;;  %v701_v50 = vld [vmem:[%s9681_s21 + $0x9b8] sm:$0xff] }
 0x1fc   : > { %4036 = vmatpush1.bf16.msra.mxu1 %v8104_v16  ;;  %v597_v16 = vld [vmem:[%s9681_s21 + $0x678] sm:$0xff]  ;;  %v8273_v56 = vcombine.high %v697_v49, %v701_v50  ;;  %v8272_v31 = vcombine.low %v697_v49, %v701_v50 }
 0x1fd   : > { %4037 = vmatprep.subr.bf16.mxu1 %v8097_v22  ;;  %v8176_v22 = vcombine.low %v601_v7, %v605_v8  ;;  %v8169_v26 = vcombine.high %v593_v15, %v597_v16  ;;  %v689_v58 = vld [vmem:[%s9681_s21 + $0x958] sm:$0xff] }
 0x1fe   : > { %3997 = vmatpush1.bf16.msra.mxu0 %v7968_v32  ;;  %v585_v32 = vld [vmem:[%s9681_s21 + $0x618] sm:$0xff] }
 0x1ff   : > { %3998 = vmatprep.subr.bf16.mxu0 %v8089_v35  ;;  %v8040_v35 = vcombine.low %v465_v13, %v469_v14  ;;  %v681_v41 = vld [vmem:[%s9681_s21 + $0x918] sm:$0xff] }
 0x200   : > { %4038 = vmatpush1.bf16.msra.mxu1 %v8096_v33  ;;  %v589_v33 = vld [vmem:[%s9681_s21 + $0x638] sm:$0xff] }
 0x201   : > { %4039 = vmatprep.subr.bf16.mxu1 %v8217_v38  ;;  %v8168_v38 = vcombine.low %v593_v15, %v597_v16  ;;  %v8161_v42 = vcombine.high %v585_v32, %v589_v33  ;;  %v685_v55 = vld [vmem:[%s9681_s21 + $0x938] sm:$0xff] }
 0x202   : > { %3999 = vmatpush2.bf16.msra.mxu0 %v8088_v45  ;;  %v833_v45 = vld [vmem:[%s9681_s21 + $0xdd8] sm:$0xff] }
 0x203   : > { %4000 = vmatprep.subr.bf16.mxu0 %v8081_v46  ;;  %v8032_v46 = vcombine.low %v457_v27, %v461_v29  ;;  %v809_v7 = vld [vmem:[%s9681_s21 + $0xd18] sm:$0xff]  ;;  %v8256_v27 = vcombine.low %v681_v41, %v685_v55 }
 0x204   : > { %4040 = vmatpush2.bf16.msra.mxu1 %v8216_v20  ;;  %v837_v20 = vld [vmem:[%s9681_s21 + $0xdf8] sm:$0xff] }
 0x205   : > { %4041 = vmatprep.subr.bf16.mxu1 %v8209_v47  ;;  %v8160_v47 = vcombine.low %v585_v32, %v589_v33  ;;  %v8409_v48 = vcombine.high %v833_v45, %v837_v20  ;;  %v813_v8 = vld [vmem:[%s9681_s21 + $0xd38] sm:$0xff] }
 0x206   : > { %4001 = vmatpush2.bf16.msra.mxu0 %v8080_v51  ;;  %v825_v51 = vld [vmem:[%s9681_s21 + $0xd98] sm:$0xff]  ;;  %v8384_v29 = vcombine.low %v809_v7, %v813_v8 }
 0x207   : > { %4002 = vmatprep.subr.bf16.mxu0 %v8073_v52  ;;  %v8280_v52 = vcombine.low %v705_v43, %v709_v44 }
 0x208   : > { %4042 = vmatpush2.bf16.msra.mxu1 %v8208_v59  ;;  %v829_v59 = vld [vmem:[%s9681_s21 + $0xdb8] sm:$0xff] }
 0x209   : > { %4043 = vmatprep.subr.bf16.mxu1 %v8201_v53  ;;  %v8408_v53 = vcombine.low %v833_v45, %v837_v20  ;;  %v8401_v60 = vcombine.high %v825_v51, %v829_v59 }
 0x20a   : > { %4003 = vmatpush2.bf16.msra.mxu0 %v8072_v61  ;;  %v693_v61 = vld [vmem:[%s9681_s21 + $0x978] sm:$0xff] }
 0x20b   : > { %4004 = vmatprep.subr.bf16.mxu0 %v8065_v63  ;;  %v817_v63 = vld [vmem:[%s9681_s21 + $0xd58] sm:$0xff] }
 0x20c   : > { %4044 = vmatpush2.bf16.msra.mxu1 %v8200_v62 }
 0x20d   : > { %4045 = vmatprep.subr.bf16.mxu1 %v8193_v18  ;;  %v821_v18 = vld [vmem:[%s9681_s21 + $0xd78] sm:$0xff] }
 0x20e   : > { %4005 = vmatpush2.bf16.msra.mxu0 %v8064_v3  ;;  %v8265_v3 = vcombine.high %v689_v58, %v693_v61  ;;  %v8393_v36 = vcombine.high %v817_v63, %v821_v18  ;;  %v8392_v14 = vcombine.low %v817_v63, %v821_v18  ;;  %v769_v63 = vld [vmem:[%s9681_s21 + $0xbd8] sm:$0xff] }
 0x20f   : > { %4006 = vmatprep.subr.bf16.mxu0 %v8057_v5  ;;  %v773_v18 = vld [vmem:[%s9681_s21 + $0xbf8] sm:$0xff] }
 0x210   : > { %4046 = vmatpush2.bf16.msra.mxu1 %v8192_v4 }
 0x211   : > { %4047 = vmatprep.subr.bf16.mxu1 %v8185_v54 }
 0x212   : > { %4007 = vmatpush2.bf16.msra.mxu0 %v8056_v9 }
 0x213   : > { %4008 = vmatprep.subr.bf16.mxu0 %v8049_v11 }
 0x214   : > { %4048 = vmatpush2.bf16.msra.mxu1 %v8184_v10 }
 0x215   : > { %4049 = vmatprep.subr.bf16.mxu1 %v8177_v12  ;;  %v8264_v12 = vcombine.low %v689_v58, %v693_v61 }
 0x216   : > { %4009 = vmatpush2.bf16.msra.mxu0 %v8048_v19  ;;  %v673_v19 = vld [vmem:[%s9681_s21 + $0x8d8] sm:$0xff] }
 0x217   : > { %4010 = vmatprep.subr.bf16.mxu0 %v8041_v25  ;;  %v801_v25 = vld [vmem:[%s9681_s21 + $0xcd8] sm:$0xff] }
 0x218   : > { %4050 = vmatpush2.bf16.msra.mxu1 %v8176_v22  ;;  %v677_v22 = vld [vmem:[%s9681_s21 + $0x8f8] sm:$0xff] }
 0x219   : > { %4051 = vmatprep.subr.bf16.mxu1 %v8169_v26  ;;  %v805_v26 = vld [vmem:[%s9681_s21 + $0xcf8] sm:$0xff]  ;;  %v8249_v32 = vcombine.high %v673_v19, %v677_v22  ;;  %v8248_v43 = vcombine.low %v673_v19, %v677_v22 }
 0x21a   : > { %4011 = vmatpush2.bf16.msra.mxu0 %v8040_v35  ;;  %v8377_v33 = vcombine.high %v801_v25, %v805_v26  ;;  %v665_v35 = vld [vmem:[%s9681_s21 + $0x898] sm:$0xff]  ;;  %v8376_v44 = vcombine.low %v801_v25, %v805_v26 }
 0x21b   : > { %4012 = vmatprep.subr.bf16.mxu0 %v8033_v39  ;;  %v793_v39 = vld [vmem:[%s9681_s21 + $0xc98] sm:$0xff] }
 0x21c   : > { %4052 = vmatpush2.bf16.msra.mxu1 %v8168_v38  ;;  %v669_v38 = vld [vmem:[%s9681_s21 + $0x8b8] sm:$0xff] }
 0x21d   : > { %4053 = vmatprep.subr.bf16.mxu1 %v8161_v42  ;;  %v797_v42 = vld [vmem:[%s9681_s21 + $0xcb8] sm:$0xff]  ;;  %v8241_v45 = vcombine.high %v665_v35, %v669_v38  ;;  %v8240_v49 = vcombine.low %v665_v35, %v669_v38 }
 0x21e   : > { %4013 = vmatpush2.bf16.msra.mxu0 %v8032_v46  ;;  %v8369_v20 = vcombine.high %v793_v39, %v797_v42  ;;  %v657_v46 = vld [vmem:[%s9681_s21 + $0x858] sm:$0xff]  ;;  %v8368_v50 = vcombine.low %v793_v39, %v797_v42 }
 0x21f   : > { %4064 = vmatprep.subr.bf16.mxu0 %v8281_v23  ;;  %v785_v23 = vld [vmem:[%s9681_s21 + $0xc58] sm:$0xff] }
 0x220   : > { %4054 = vmatpush2.bf16.msra.mxu1 %v8160_v47  ;;  %v661_v47 = vld [vmem:[%s9681_s21 + $0x878] sm:$0xff] }
 0x221   : > { %4105 = vmatprep.subr.bf16.mxu1 %v8409_v48  ;;  %v3770_v62 = vpop.f32.mrf.mxu0  ;;  %4015 = vmatmul.mubr.bf16.vlgmr.msra.gmra.mxu0 %v9787_v17  ;;  %v8400_v17 = vcombine.low %v825_v51, %v829_v59  ;;  %v789_v48 = vld [vmem:[%s9681_s21 + $0xc78] sm:$0xff]  ;;  %v8233_v51 = vcombine.high %v657_v46, %v661_v47 }
 0x222   : > { %v3771_v0 = vadd.f32 %v3770_v62, %v3730_v57  ;;  %4065 = vmatpush1.bf16.msra.mxu0 %v8280_v52  ;;  %4096 = vmatprep.mubr.bf16.mxu0 %v9805_v28  ;;  %v8257_v28 = vcombine.high %v681_v41, %v685_v55  ;;  %v8361_v59 = vcombine.high %v785_v23, %v789_v48  ;;  %v649_v52 = vld [vmem:[%s9681_s21 + $0x818] sm:$0xff] }
 0x223   : > { %v3811_v1 = vpop.f32.mrf.mxu1  ;;  %4056 = vmatmul.mubr.bf16.vlgmr.msra.gmra.mxu1 %v9796_v21  ;;  %v3772_v2 = vpop.f32.mrf.mxu0  ;;  %4066 = vmatprep.subr.bf16.mxu0 %v8273_v56  ;;  %v381_v21 = vld [vmem:[#allocation2 + $0x10] sm:$0xff]  ;;  %v777_v56 = vld [vmem:[%s9681_s21 + $0xc18] sm:$0xff]  ;;  %v8360_v58 = vcombine.low %v785_v23, %v789_v48 }
 0x224   : > { %4106 = vmatpush1.bf16.msra.mxu1 %v8408_v53  ;;  %v3812_v4 = vadd.f32 %v3811_v1, %v3771_v0  ;;  %v3773_v5 = vadd.f32 %v3772_v2, %v3732_v24  ;;  %4137 = vmatprep.mubr.bf16.mxu1 %v9812_v30  ;;  %v8385_v30 = vcombine.high %v809_v7, %v813_v8  ;;  %v653_v53 = vld [vmem:[%s9681_s21 + $0x838] sm:$0xff] }
 0x225   : > { %v3813_v54 = vpop.f32.mrf.mxu1  ;;  %4107 = vmatprep.subr.bf16.mxu1 %v8401_v60  ;;  %v3774_v6 = vpop.f32.mrf.mxu0  ;;  %v781_v57 = vld [vmem:[%s9681_s21 + $0xc38] sm:$0xff]  ;;  %v8232_v60 = vcombine.low %v657_v46, %v661_v47  ;;  %v8225_v61 = vcombine.high %v649_v52, %v653_v53  ;;  %v8224_v1 = vcombine.low %v649_v52, %v653_v53 }
 0x226   : > { %v4148_v9 = vadd.f32 %v3812_v4, %v380_v34  ;;  %v3814_v10 = vadd.f32 %v3813_v54, %v3773_v5  ;;  %4067 = vmatpush1.bf16.msra.mxu0 %v8272_v31  ;;  %v8353_v62 = vcombine.high %v777_v56, %v781_v57  ;;  %v897_v24 = vld [vmem:[%s9681_s21 + $0xfd8] sm:$0xff]  ;;  %v8352_v31 = vcombine.low %v777_v56, %v781_v57 }
 0x227   : > { %v3815_v11 = vpop.f32.mrf.mxu1  ;;  %v3775_v13 = vpop.f32.mrf.mxu0  ;;  %4068 = vmatprep.subr.bf16.mxu0 %v8265_v3  ;;  %v901_v0 = vld [vmem:[%s9681_s21 + $0xff8] sm:$0xff]  ;;  %v8345_v34 = vcombine.high %v769_v63, %v773_v18  ;;  %v8344_v54 = vcombine.low %v769_v63, %v773_v18 }
 0x228   : > { %4108 = vmatpush1.bf16.msra.mxu1 %v8400_v17  ;;  %4156 = vst [vmem:[#allocation2 + $0x18] sm:$0xff] %v4148_v9  ;;  %v4149_v15 = vadd.f32 %v3814_v10, %v381_v21  ;;  %v8473_v2 = vcombine.high %v897_v24, %v901_v0  ;;  %v761_v17 = vld [vmem:[%s9681_s21 + $0xb98] sm:$0xff] }
 0x229   : > { %v3816_v16 = vpop.f32.mrf.mxu1  ;;  %4109 = vmatprep.subr.bf16.mxu1 %v8393_v36  ;;  %v765_v3 = vld [vmem:[%s9681_s21 + $0xbb8] sm:$0xff]  ;;  %v8472_v36 = vcombine.low %v897_v24, %v901_v0 }
 0x22a   : > { %4157 = vst [vmem:[#allocation2 + $0x10] sm:$0xff] %v4149_v15  ;;  %4069 = vmatpush1.bf16.msra.mxu0 %v8264_v12  ;;  %v889_v4 = vld [vmem:[%s9681_s21 + $0xf98] sm:$0xff]  ;;  %v8337_v41 = vcombine.high %v761_v17, %v765_v3  ;;  %v8336_v9 = vcombine.low %v761_v17, %v765_v3 }
 0x22b   : > { %4070 = vmatprep.subr.bf16.mxu0 %v8257_v28  ;;  %v893_v5 = vld [vmem:[%s9681_s21 + $0xfb8] sm:$0xff] }
 0x22c   : > { %4110 = vmatpush1.bf16.msra.mxu1 %v8392_v14  ;;  %v8465_v55 = vcombine.high %v889_v4, %v893_v5  ;;  %v753_v21 = vld [vmem:[%s9681_s21 + $0xb58] sm:$0xff]  ;;  %v8464_v10 = vcombine.low %v889_v4, %v893_v5 }
 0x22d   : > { %4111 = vmatprep.subr.bf16.mxu1 %v8385_v30  ;;  %v757_v6 = vld [vmem:[%s9681_s21 + $0xb78] sm:$0xff] }
 0x22e   : > { %4071 = vmatpush1.bf16.msra.mxu0 %v8256_v27  ;;  %v881_v7 = vld [vmem:[%s9681_s21 + $0xf58] sm:$0xff]  ;;  %v8329_v11 = vcombine.high %v753_v21, %v757_v6  ;;  %v8328_v16 = vcombine.low %v753_v21, %v757_v6 }
 0x22f   : > { %4072 = vmatprep.subr.bf16.mxu0 %v8249_v32  ;;  %v885_v8 = vld [vmem:[%s9681_s21 + $0xf78] sm:$0xff] }
 0x230   : > { %4112 = vmatpush1.bf16.msra.mxu1 %v8384_v29  ;;  %v8457_v12 = vcombine.high %v881_v7, %v885_v8  ;;  %v745_v13 = vld [vmem:[%s9681_s21 + $0xb18] sm:$0xff]  ;;  %v8456_v30 = vcombine.low %v881_v7, %v885_v8 }
 0x231   : > { %4113 = vmatprep.subr.bf16.mxu1 %v8377_v33  ;;  %v749_v14 = vld [vmem:[%s9681_s21 + $0xb38] sm:$0xff] }
 0x232   : > { %4073 = vmatpush1.bf16.msra.mxu0 %v8248_v43  ;;  %v873_v28 = vld [vmem:[%s9681_s21 + $0xf18] sm:$0xff]  ;;  %v8321_v19 = vcombine.high %v745_v13, %v749_v14  ;;  %v8320_v32 = vcombine.low %v745_v13, %v749_v14 }
 0x233   : > { %4074 = vmatprep.subr.bf16.mxu0 %v8241_v45  ;;  %v877_v15 = vld [vmem:[%s9681_s21 + $0xf38] sm:$0xff] }
 0x234   : > { %4114 = vmatpush1.bf16.msra.mxu1 %v8376_v44  ;;  %v8449_v22 = vcombine.high %v873_v28, %v877_v15  ;;  %v737_v25 = vld [vmem:[%s9681_s21 + $0xad8] sm:$0xff]  ;;  %v8448_v33 = vcombine.low %v873_v28, %v877_v15 }
 0x235   : > { %4115 = vmatprep.subr.bf16.mxu1 %v8369_v20  ;;  %v741_v26 = vld [vmem:[%s9681_s21 + $0xaf8] sm:$0xff] }
 0x236   : > { %4075 = vmatpush1.bf16.msra.mxu0 %v8240_v49  ;;  %v865_v27 = vld [vmem:[%s9681_s21 + $0xed8] sm:$0xff]  ;;  %v8313_v35 = vcombine.high %v737_v25, %v741_v26  ;;  %v8312_v45 = vcombine.low %v737_v25, %v741_v26 }
 0x237   : > { %4076 = vmatprep.subr.bf16.mxu0 %v8233_v51  ;;  %v869_v29 = vld [vmem:[%s9681_s21 + $0xef8] sm:$0xff] }
 0x238   : > { %4116 = vmatpush1.bf16.msra.mxu1 %v8368_v50  ;;  %v8441_v38 = vcombine.high %v865_v27, %v869_v29  ;;  %v729_v39 = vld [vmem:[%s9681_s21 + $0xa98] sm:$0xff]  ;;  %v8440_v20 = vcombine.low %v865_v27, %v869_v29 }
 0x239   : > { %4117 = vmatprep.subr.bf16.mxu1 %v8361_v59  ;;  %v733_v42 = vld [vmem:[%s9681_s21 + $0xab8] sm:$0xff] }
 0x23a   : > { %4077 = vmatpush1.bf16.msra.mxu0 %v8232_v60  ;;  %v857_v43 = vld [vmem:[%s9681_s21 + $0xe98] sm:$0xff]  ;;  %v8305_v46 = vcombine.high %v729_v39, %v733_v42  ;;  %v8304_v51 = vcombine.low %v729_v39, %v733_v42 }
 0x23b   : > { %4078 = vmatprep.subr.bf16.mxu0 %v8225_v61  ;;  %v861_v44 = vld [vmem:[%s9681_s21 + $0xeb8] sm:$0xff] }
 0x23c   : > { %4118 = vmatpush1.bf16.msra.mxu1 %v8360_v58  ;;  %v8433_v47 = vcombine.high %v857_v43, %v861_v44  ;;  %v721_v23 = vld [vmem:[%s9681_s21 + $0xa58] sm:$0xff]  ;;  %v8432_v59 = vcombine.low %v857_v43, %v861_v44 }
 0x23d   : > { %4119 = vmatprep.subr.bf16.mxu1 %v8353_v62  ;;  %v725_v48 = vld [vmem:[%s9681_s21 + $0xa78] sm:$0xff] }
 0x23e   : > { %4079 = vmatpush1.bf16.msra.mxu0 %v8224_v1  ;;  %v849_v49 = vld [vmem:[%s9681_s21 + $0xe58] sm:$0xff]  ;;  %v8297_v52 = vcombine.high %v721_v23, %v725_v48  ;;  %v8296_v61 = vcombine.low %v721_v23, %v725_v48 }
 0x23f   : > { %4080 = vmatprep.subr.bf16.mxu0 %v8345_v34  ;;  %v853_v50 = vld [vmem:[%s9681_s21 + $0xe78] sm:$0xff] }
 0x240   : > { %4120 = vmatpush1.bf16.msra.mxu1 %v8352_v31  ;;  %v8425_v53 = vcombine.high %v849_v49, %v853_v50  ;;  %v713_v56 = vld [vmem:[%s9681_s21 + $0xa18] sm:$0xff]  ;;  %v8424_v62 = vcombine.low %v849_v49, %v853_v50 }
 0x241   : > { %4121 = vmatprep.subr.bf16.mxu1 %v8473_v2  ;;  %v717_v57 = vld [vmem:[%s9681_s21 + $0xa38] sm:$0xff] }
 0x242   : > { %4081 = vmatpush2.bf16.msra.mxu0 %v8344_v54  ;;  %v841_v60 = vld [vmem:[%s9681_s21 + $0xe18] sm:$0xff]  ;;  %v8289_v63 = vcombine.high %v713_v56, %v717_v57  ;;  %v8288_v24 = vcombine.low %v713_v56, %v717_v57 }
 0x243   : > { %4082 = vmatprep.subr.bf16.mxu0 %v8337_v41  ;;  %v845_v58 = vld [vmem:[%s9681_s21 + $0xe38] sm:$0xff]  ;;  %s9515_s21 = smov (!%p8474_p2), 16  }
 0x244   : > { %4122 = vmatpush2.bf16.msra.mxu1 %v8472_v36  ;;  %v8417_v18 = vcombine.high %v841_v60, %v845_v58  ;;  %v8416_v0 = vcombine.low %v841_v60, %v845_v58  ;;  %v382_v6 = vld [vmem:[#allocation2 + $0x8] sm:$0xff] }
 0x245   : > { %4123 = vmatprep.subr.bf16.mxu1 %v8465_v55  ;;  %v384_v42 = vld [vmem:[#allocation2 + $0x28] sm:$0xff] }
 0x246   : > { %4083 = vmatpush2.bf16.msra.mxu0 %v8336_v9 }
 0x247   : > { %4084 = vmatprep.subr.bf16.mxu0 %v8329_v11 }
 0x248   : > { %4124 = vmatpush2.bf16.msra.mxu1 %v8464_v10 }
 0x249   : > { %4125 = vmatprep.subr.bf16.mxu1 %v8457_v12 }
 0x24a   : > { %4085 = vmatpush2.bf16.msra.mxu0 %v8328_v16 }
 0x24b   : > { %4086 = vmatprep.subr.bf16.mxu0 %v8321_v19 }
 0x24c   : > { %4126 = vmatpush2.bf16.msra.mxu1 %v8456_v30 }
 0x24d   : > { %4127 = vmatprep.subr.bf16.mxu1 %v8449_v22 }
 0x24e   : > { %4087 = vmatpush2.bf16.msra.mxu0 %v8320_v32 }
 0x24f   : > { %4088 = vmatprep.subr.bf16.mxu0 %v8313_v35 }
 0x250   : > { %4128 = vmatpush2.bf16.msra.mxu1 %v8448_v33 }
 0x251   : > { %4129 = vmatprep.subr.bf16.mxu1 %v8441_v38 }
 0x252   : > { %4089 = vmatpush2.bf16.msra.mxu0 %v8312_v45 }
 0x253   : > { %4090 = vmatprep.subr.bf16.mxu0 %v8305_v46  ;;  %v385_v46 = vld [vmem:[#allocation2 + $0x38] sm:$0xff] }
 0x254   : > { %4130 = vmatpush2.bf16.msra.mxu1 %v8440_v20 }
 0x255   : > { %4131 = vmatprep.subr.bf16.mxu1 %v8433_v47 }
 0x256   : > { %4091 = vmatpush2.bf16.msra.mxu0 %v8304_v51 }
 0x257   : > { %4092 = vmatprep.subr.bf16.mxu0 %v8297_v52 }
 0x258   : > { %4132 = vmatpush2.bf16.msra.mxu1 %v8432_v59 }
 0x259   : > { %4133 = vmatprep.subr.bf16.mxu1 %v8425_v53 }
 0x25a   : > { %4093 = vmatpush2.bf16.msra.mxu0 %v8296_v61 }
 0x25b   : > { %4094 = vmatprep.subr.bf16.mxu0 %v8289_v63 }
 0x25c   : > { %4134 = vmatpush2.bf16.msra.mxu1 %v8424_v62 }
 0x25d   : > { %4135 = vmatprep.subr.bf16.mxu1 %v8417_v18 }
 0x25e   : > { %4095 = vmatpush2.bf16.msra.mxu0 %v8288_v24 }
 0x260   : > { %4136 = vmatpush2.bf16.msra.mxu1 %v8416_v0 }
 0x261   : > { %v3852_v1 = vpop.f32.mrf.mxu0  ;;  %4097 = vmatmul.mubr.bf16.vlgmr.msra.gmra.mxu0 %v9877_v37  ;;  %v383_v37 = vld [vmem:[#allocation2 + $0x20] sm:$0xff] }
 0x263   : > { %v3893_v31 = vpop.f32.mrf.mxu1  ;;  %4138 = vmatmul.mubr.bf16.vlgmr.msra.gmra.mxu1 %v9883_v40  ;;  %v3854_v34 = vpop.f32.mrf.mxu0 }
 0x264   : > { %v3894_v54 = vadd.f32 %v3893_v31, %v3852_v1 }
 0x265   : > { %v3895_v2 = vpop.f32.mrf.mxu1  ;;  %v3856_v17 = vpop.f32.mrf.mxu0 }
 0x266   : > { %v3896_v41 = vadd.f32 %v3895_v2, %v3854_v34 }
 0x267   : > { %v3897_v3 = vpop.f32.mrf.mxu1  ;;  %v3857_v4 = vpop.f32.mrf.mxu0 }
 0x269   : > { %v3898_v5 = vpop.f32.mrf.mxu1 }
 0x2a1   : > { %v3934_v36 = vpop.f32.mrf.mxu0 }
 0x2a2   : > { %v3935_v55 = vadd.f32 %v3934_v36, %v3894_v54 }
 0x2a3   : > { %v3975_v21 = vpop.f32.mrf.mxu1  ;;  %v3936_v7 = vpop.f32.mrf.mxu0 }
 0x2a4   : > { %v3976_v8 = vadd.f32 %v3975_v21, %v3935_v55  ;;  %v3937_v9 = vadd.f32 %v3936_v7, %v3896_v41 }
 0x2a5   : > { %v3977_v10 = vpop.f32.mrf.mxu1  ;;  %v3938_v11 = vpop.f32.mrf.mxu0 }
 0x2a6   : > { %v4150_v12 = vadd.f32 %v3976_v8, %v382_v6  ;;  %v3978_v40 = vadd.f32 %v3977_v10, %v3937_v9 }
 0x2a7   : > { %v3979_v13 = vpop.f32.mrf.mxu1  ;;  %v3939_v14 = vpop.f32.mrf.mxu0 }
 0x2a8   : > { %4158 = vst [vmem:[#allocation2 + $0x8] sm:$0xff] %v4150_v12  ;;  %v4151_v28 = vadd.f32 %v3978_v40, %v383_v37 }
 0x2a9   : > { %v3980_v15 = vpop.f32.mrf.mxu1 }
 0x2aa   : > { %4159 = vst [vmem:[#allocation2 + $0x20] sm:$0xff] %v4151_v28 }
 0x2e1   : > { %v4016_v16 = vpop.f32.mrf.mxu0 }
 0x2e3   : > { %v4057_v30 = vpop.f32.mrf.mxu1  ;;  %v4018_v19 = vpop.f32.mrf.mxu0 }
 0x2e4   : > { %v4058_v32 = vadd.f32 %v4057_v30, %v4016_v16 }
 0x2e5   : > { %v4059_v22 = vpop.f32.mrf.mxu1  ;;  %v4020_v25 = vpop.f32.mrf.mxu0 }
 0x2e6   : > { %v4060_v35 = vadd.f32 %v4059_v22, %v4018_v19 }
 0x2e7   : > { %v4061_v26 = vpop.f32.mrf.mxu1  ;;  %v4021_v27 = vpop.f32.mrf.mxu0 }
 0x2e9   : > { %v4062_v29 = vpop.f32.mrf.mxu1 }
 0x321   : > { %v4098_v33 = vpop.f32.mrf.mxu0 }
 0x322   : > { %v4099_v38 = vadd.f32 %v4098_v33, %v4058_v32 }
 0x323   : > { %v4139_v39 = vpop.f32.mrf.mxu1  ;;  %v4100_v43 = vpop.f32.mrf.mxu0 }
 0x324   : > { %v4140_v44 = vadd.f32 %v4139_v39, %v4099_v38  ;;  %v4101_v45 = vadd.f32 %v4100_v43, %v4060_v35 }
 0x325   : > { %v4141_v20 = vpop.f32.mrf.mxu1  ;;  %v4102_v47 = vpop.f32.mrf.mxu0 }
 0x326   : > { %v4152_v23 = vadd.f32 %v4140_v44, %v384_v42  ;;  %v4142_v48 = vadd.f32 %v4141_v20, %v4101_v45  ;;  %4165 = sbr.rel (%p8474_p2) target bundleno = 9135 (0x23af), region = 72 }
 0x327   : > { %v4143_v49 = vpop.f32.mrf.mxu1  ;;  %v4103_v50 = vpop.f32.mrf.mxu0 }
 0x328   : > { %4160 = vst [vmem:[#allocation2 + $0x28] sm:$0xff] %v4152_v23  ;;  %v4153_v51 = vadd.f32 %v4142_v48, %v385_v46 }
 0x329   : > { %v4144_v59 = vpop.f32.mrf.mxu1 }
 0x32a   : > { %4161 = vst [vmem:[#allocation2 + $0x38] sm:$0xff] %v4153_v51 }
 0x32b   : > { %v9174_v52 = vld [vmem:[%s11141_s2 + $0x78] sm:$0xff]   ;;  %v9178_v60 = vld [vmem:[%s11141_s2 + $0x70] sm:$0xff]   ;;  %v9182_v63 = vld [vmem:[%s11141_s2 + $0x68] sm:$0xff]   ;;  %vm4869_vm0 = vcmask 523264   ;;  %vm4871_vm1 = vcmask 517120   ;;  %vm4875_vm2 = vcmask 519168  }
 0x32c   : > { %v9175_v53 = vld [vmem:[%s11141_s2 + $0xf8] sm:$0xff]   ;;  %8619 = vmatprep.subr.bf16.mxu0 %v9174_v52  ;;  %v9179_v58 = vld [vmem:[%s11141_s2 + $0xf0] sm:$0xff]   ;;  %v9183_v18 = vld [vmem:[%s11141_s2 + $0xe8] sm:$0xff]   ;;  %vm5073_vm7 = vcmask 130048   ;;  %vm5189_vm8 = vcmask 1041408   ;;  %vm5163_vm9 = vcmask 74752  }
 0x32d   : > { %v9176_v56 = vld [vmem:[%s11141_s2 + $0x38] sm:$0xff]   ;;  %8641 = vmatprep.subr.bf16.mxu1 %v9175_v53  ;;  %v9180_v61 = vld [vmem:[%s11141_s2 + $0x30] sm:$0xff]   ;;  %v9184_v24 = vld [vmem:[%s11141_s2 + $0x28] sm:$0xff]   ;;  %vm5159_vm10 = vcmask 80896   ;;  %vm5898_vm11 = vcmask 261120   ;;  %vm5901_vm12 = vcmask 392192  }
 0x32e   : > { %v9177_v57 = vld [vmem:[%s11141_s2 + $0xb8] sm:$0xff]   ;;  %8620 = vmatpush3.bf16.msra.mxu0 %v9176_v56  ;;  %v9181_v62 = vld [vmem:[%s11141_s2 + $0xb0] sm:$0xff]   ;;  %v9185_v0 = vld [vmem:[%s11141_s2 + $0xa8] sm:$0xff]  }
 0x32f   : > { %8642 = vmatpush3.bf16.msra.mxu1 %v9177_v57  ;;  %8621 = vmatprep.subr.bf16.mxu0 %v9178_v60  ;;  %v9186_v1 = vld [vmem:[%s11141_s2 + $0x60] sm:$0xff]   ;;  %v9190_v17 = vld [vmem:[%s11141_s2 + $0x58] sm:$0xff]   ;;  %v9194_v54 = vld [vmem:[%s11141_s2 + $0x50] sm:$0xff]  }
 0x330   : > { %8643 = vmatprep.subr.bf16.mxu1 %v9179_v58  ;;  %v9187_v31 = vld [vmem:[%s11141_s2 + $0xe0] sm:$0xff]   ;;  %v9191_v3 = vld [vmem:[%s11141_s2 + $0xd8] sm:$0xff]   ;;  %v9195_v36 = vld [vmem:[%s11141_s2 + $0xd0] sm:$0xff]  }
 0x331   : > { %v9188_v34 = vld [vmem:[%s11141_s2 + $0x20] sm:$0xff]   ;;  %v9192_v4 = vld [vmem:[%s11141_s2 + $0x18] sm:$0xff]   ;;  %v9196_v41 = vld [vmem:[%s11141_s2 + $0x10] sm:$0xff]  }
 0x332   : > { %8622 = vmatpush3.bf16.msra.mxu0 %v9180_v61  ;;  %v9189_v2 = vld [vmem:[%s11141_s2 + $0xa0] sm:$0xff]   ;;  %v9193_v5 = vld [vmem:[%s11141_s2 + $0x98] sm:$0xff]   ;;  %v9197_v55 = vld [vmem:[%s11141_s2 + $0x90] sm:$0xff]  }
 0x333   : > { %8644 = vmatpush3.bf16.msra.mxu1 %v9181_v62  ;;  %8623 = vmatprep.subr.bf16.mxu0 %v9182_v63  ;;  %v9198_v21 = vld [vmem:[%s11141_s2 + $0x48] sm:$0xff]   ;;  %v9202_v9 = vld [vmem:[%s11141_s2 + $0x40] sm:$0xff]   ;;  %v4178_v40 = vld [vmem:[#allocation2 + $0x10] sm:$0xff] }
 0x334   : > { %8645 = vmatprep.subr.bf16.mxu1 %v9183_v18  ;;  %v9199_v6 = vld [vmem:[%s11141_s2 + $0xc8] sm:$0xff]   ;;  %v9203_v10 = vld [vmem:[%s11141_s2 + $0xc0] sm:$0xff]   ;;  %v4175_v13 = vld [vmem:[#allocation2 + $0x30] sm:$0xff]  ;;  %v4186_v28 = vpack.c.bf16 %v4178_v40, %v4178_v40 }
 0x335   : > { %v9200_v7 = vld [vmem:[%s11141_s2 + $0x8] sm:$0xff]   ;;  %v9204_v37 = vld [vmem:[%s11141_s2] sm:$0xff]   ;;  %v4183_v15 = vpack.c.bf16 %v4175_v13, %v4175_v13  ;;  %v4177_v16 = vld [vmem:[#allocation2 + $0x18] sm:$0xff] }
 0x336   : > { %8624 = vmatpush3.bf16.msra.mxu0 %v9184_v24  ;;  %v9201_v8 = vld [vmem:[%s11141_s2 + $0x88] sm:$0xff]   ;;  %v9205_v11 = vld [vmem:[%s11141_s2 + $0x80] sm:$0xff]   ;;  %v4185_v30 = vpack.c.bf16 %v4177_v16, %v4177_v16  ;;  %v9206_v19 = vld [vmem:[%s11141_s2 + $0x178] sm:$0xff]   ;;  %4779 = vmatprep.mubr.bf16.mxu1 %v4186_v28 }
 0x337   : > { %8646 = vmatpush3.bf16.msra.mxu1 %v9185_v0  ;;  %8625 = vmatprep.subr.bf16.mxu0 %v9186_v1  ;;  %v4176_v12 = vld [vmem:[#allocation2] sm:$0xff]  ;;  %v9207_v22 = vld [vmem:[%s11141_s2 + $0x1f8] sm:$0xff]   ;;  %v9210_v27 = vld [vmem:[%s11141_s2 + $0x170] sm:$0xff]  }
 0x338   : > { %8647 = vmatprep.subr.bf16.mxu1 %v9187_v31  ;;  %v4184_v14 = vpack.c.bf16 %v4176_v12, %v4176_v12  ;;  %v9208_v25 = vld [vmem:[%s11141_s2 + $0x138] sm:$0xff]   ;;  %v9211_v29 = vld [vmem:[%s11141_s2 + $0x1f0] sm:$0xff]   ;;  %v9214_v35 = vld [vmem:[%s11141_s2 + $0x168] sm:$0xff]  }
 0x339   : > { %v9209_v26 = vld [vmem:[%s11141_s2 + $0x1b8] sm:$0xff]   ;;  %v9212_v32 = vld [vmem:[%s11141_s2 + $0x130] sm:$0xff]   ;;  %v9215_v38 = vld [vmem:[%s11141_s2 + $0x1e8] sm:$0xff]  }
 0x33a   : > { %8626 = vmatpush3.bf16.msra.mxu0 %v9188_v34  ;;  %4739 = vmatprep.mubr.bf16.mxu0 %v4184_v14  ;;  %v9213_v33 = vld [vmem:[%s11141_s2 + $0x1b0] sm:$0xff]   ;;  %v9216_v39 = vld [vmem:[%s11141_s2 + $0x128] sm:$0xff]   ;;  %v9218_v43 = vld [vmem:[%s11141_s2 + $0x160] sm:$0xff]  }
 0x33b   : > { %8648 = vmatpush3.bf16.msra.mxu1 %v9189_v2  ;;  %8627 = vmatprep.subr.bf16.mxu0 %v9190_v17  ;;  %v9217_v42 = vld [vmem:[%s11141_s2 + $0x1a8] sm:$0xff]   ;;  %v9219_v44 = vld [vmem:[%s11141_s2 + $0x1e0] sm:$0xff]   ;;  %v9222_v46 = vld [vmem:[%s11141_s2 + $0x158] sm:$0xff]  }
 0x33c   : > { %8649 = vmatprep.subr.bf16.mxu1 %v9191_v3  ;;  %v9220_v45 = vld [vmem:[%s11141_s2 + $0x120] sm:$0xff]   ;;  %v9223_v47 = vld [vmem:[%s11141_s2 + $0x1d8] sm:$0xff]   ;;  %v9226_v49 = vld [vmem:[%s11141_s2 + $0x150] sm:$0xff]  }
 0x33d   : > { %v9221_v20 = vld [vmem:[%s11141_s2 + $0x1a0] sm:$0xff]   ;;  %v9224_v23 = vld [vmem:[%s11141_s2 + $0x118] sm:$0xff]   ;;  %v9227_v50 = vld [vmem:[%s11141_s2 + $0x1d0] sm:$0xff]  }
 0x33e   : > { %8628 = vmatpush3.bf16.msra.mxu0 %v9192_v4  ;;  %v9225_v48 = vld [vmem:[%s11141_s2 + $0x198] sm:$0xff]   ;;  %v9228_v51 = vld [vmem:[%s11141_s2 + $0x110] sm:$0xff]   ;;  %v9230_v52 = vld [vmem:[%s11141_s2 + $0x148] sm:$0xff]  }
 0x33f   : > { %8650 = vmatpush3.bf16.msra.mxu1 %v9193_v5  ;;  %8629 = vmatprep.subr.bf16.mxu0 %v9194_v54  ;;  %v9229_v59 = vld [vmem:[%s11141_s2 + $0x190] sm:$0xff]   ;;  %v9231_v53 = vld [vmem:[%s11141_s2 + $0x1c8] sm:$0xff]   ;;  %v9234_v60 = vld [vmem:[%s11141_s2 + $0x140] sm:$0xff]  }
 0x340   : > { %8651 = vmatprep.subr.bf16.mxu1 %v9195_v36  ;;  %v9232_v56 = vld [vmem:[%s11141_s2 + $0x108] sm:$0xff]   ;;  %v9235_v58 = vld [vmem:[%s11141_s2 + $0x1c0] sm:$0xff]   ;;  %v4182_v18 = vld [vmem:[#allocation2 + $0x38] sm:$0xff] }
 0x341   : > { %v9233_v57 = vld [vmem:[%s11141_s2 + $0x188] sm:$0xff]   ;;  %v9236_v61 = vld [vmem:[%s11141_s2 + $0x100] sm:$0xff]   ;;  %v4190_v0 = vpack.c.bf16 %v4182_v18, %v4182_v18  ;;  %v10556_v18 = vld [vmem:[#allocation7 + $0x88] sm:$0xff] }
 0x342   : > { %8630 = vmatpush3.bf16.msra.mxu0 %v9196_v41  ;;  %v9237_v62 = vld [vmem:[%s11141_s2 + $0x180] sm:$0xff]   ;;  %v4179_v1 = vld [vmem:[#allocation2 + $0x8] sm:$0xff] }
 0x343   : > { %8652 = vmatpush3.bf16.msra.mxu1 %v9197_v55  ;;  %8631 = vmatprep.subr.bf16.mxu0 %v9198_v21  ;;  %v4180_v63 = vld [vmem:[#allocation2 + $0x20] sm:$0xff]  ;;  %v4181_v31 = vld [vmem:[#allocation2 + $0x28] sm:$0xff]  ;;  %v4187_v34 = vpack.c.bf16 %v4179_v1, %v4179_v1  ;;  %v4899_v1 = vld [vmem:[#allocation7 + $0x60] sm:$0xff] }
 0x344   : > { %8653 = vmatprep.subr.bf16.mxu1 %v9199_v6  ;;  %v4188_v24 = vpack.c.bf16 %v4180_v63, %v4180_v63  ;;  %v4189_v2 = vpack.c.bf16 %v4181_v31, %v4181_v31  ;;  %v4867_v17 = vld [vmem:[%s11142_s3] sm:$0xff]  ;;  %v4868_v3 = vld [vmem:[%s11142_s3 + $0x8] sm:$0x3]  ;;  %v4907_v63 = vld [vmem:[#allocation7 + $0xa0] sm:$0xff] }
 0x345   : > { %4870 = vst.msk [vmem:[#allocation3] sm:$0xff] %vm4869_vm0, %v4867_v17  ;;  %v10562_v31 = vld [vmem:[#allocation7 + $0x48] sm:$0xff]  ;;  %v4891_v17 = vld [vmem:[#allocation7 + $0x20] sm:$0xff] }
 0x346   : > { %8632 = vmatpush3.bf16.msra.mxu0 %v9200_v7  ;;  %4872 = vst.msk [vmem:[#allocation3 + $0x8] sm:$0x3] %vm4871_vm1, %v4868_v3  ;;  %v4319_v7 = vlaneseq  ;;  %v10568_v3 = vld [vmem:[#allocation7 + $0x8] sm:$0xff] }
 0x347   : > { %8654 = vmatpush3.bf16.msra.mxu1 %v9201_v8  ;;  %8633 = vmatprep.subr.bf16.mxu0 %v9202_v9 }
 0x348   : > { %8655 = vmatprep.subr.bf16.mxu1 %v9203_v10  ;;  %v10512_v8 = vshrl.u32 %v4319_v7, 7  ;;  %v4166_v10 = vld [vmem:[%s11146_s7] sm:$0xff] }
 0x34a   : > { %8634 = vmatpush3.bf16.msra.mxu0 %v9204_v37  ;;  %v10515_v9 = vsub.s32 0, %v10512_v8 }
 0x34b   : > { %8656 = vmatpush3.bf16.msra.mxu1 %v9205_v11  ;;  %8663 = vmatprep.subr.bf16.mxu0 %v9206_v19 }
 0x34c   : > { %8685 = vmatprep.subr.bf16.mxu1 %v9207_v22  ;;  %v4322_v37 = vrot.slane %v4166_v10, %v10515_v9 }
 0x34d   : > { %4740 = vmatmul.mubr.bf16.vlgmr.msra.gmra.mxu0 %v4183_v15 }
 0x34e   : > { %4780 = vmatmul.mubr.bf16.vlgmr.msra.gmra.mxu1 %v4185_v30  ;;  %8664 = vmatpush3.bf16.msra.mxu0 %v9208_v25 }
 0x34f   : > { %8686 = vmatpush3.bf16.msra.mxu1 %v9209_v26  ;;  %8665 = vmatprep.subr.bf16.mxu0 %v9210_v27  ;;  %v4873_v27 = vld [vmem:[%s11142_s3 + $0x1] sm:$0xf] }
 0x350   : > { %8687 = vmatprep.subr.bf16.mxu1 %v9211_v29  ;;  %4819 = vmatprep.mubr.bf16.mxu0 %v4188_v24  ;;  %v4903_v24 = vld [vmem:[#allocation7 + $0x80] sm:$0xff] }
 0x351   : > { %4859 = vmatprep.mubr.bf16.mxu1 %v4190_v0  ;;  %v10559_v0 = vld [vmem:[#allocation7 + $0x68] sm:$0xff] }
 0x352   : > { %8666 = vmatpush3.bf16.msra.mxu0 %v9212_v32 }
 0x353   : > { %8688 = vmatpush3.bf16.msra.mxu1 %v9213_v33  ;;  %8667 = vmatprep.subr.bf16.mxu0 %v9214_v35  ;;  %v4877_v35 = vld [vmem:[%s11142_s3 + $0x6] sm:$0xf] }
 0x354   : > { %8689 = vmatprep.subr.bf16.mxu1 %v9215_v38 }
 0x356   : > { %8668 = vmatpush3.bf16.msra.mxu0 %v9216_v39 }
 0x357   : > { %8690 = vmatpush3.bf16.msra.mxu1 %v9217_v42  ;;  %8669 = vmatprep.subr.bf16.mxu0 %v9218_v43 }
 0x358   : > { %8691 = vmatprep.subr.bf16.mxu1 %v9219_v44 }
 0x35a   : > { %8670 = vmatpush3.bf16.msra.mxu0 %v9220_v45 }
 0x35b   : > { %8692 = vmatpush3.bf16.msra.mxu1 %v9221_v20  ;;  %8671 = vmatprep.subr.bf16.mxu0 %v9222_v46 }
 0x35c   : > { %8693 = vmatprep.subr.bf16.mxu1 %v9223_v47 }
 0x35e   : > { %8672 = vmatpush3.bf16.msra.mxu0 %v9224_v23 }
 0x35f   : > { %8694 = vmatpush3.bf16.msra.mxu1 %v9225_v48  ;;  %8673 = vmatprep.subr.bf16.mxu0 %v9226_v49 }
 0x360   : > { %8695 = vmatprep.subr.bf16.mxu1 %v9227_v50 }
 0x362   : > { %8674 = vmatpush3.bf16.msra.mxu0 %v9228_v51 }
 0x363   : > { %8696 = vmatpush3.bf16.msra.mxu1 %v9229_v59  ;;  %8675 = vmatprep.subr.bf16.mxu0 %v9230_v52 }
 0x364   : > { %8697 = vmatprep.subr.bf16.mxu1 %v9231_v53 }
 0x366   : > { %8676 = vmatpush3.bf16.msra.mxu0 %v9232_v56  ;;  %v10547_v56 = vld [vmem:[#allocation7 + $0xe8] sm:$0xff] }
 0x367   : > { %8698 = vmatpush3.bf16.msra.mxu1 %v9233_v57  ;;  %8677 = vmatprep.subr.bf16.mxu0 %v9234_v60  ;;  %v4915_v57 = vld [vmem:[#allocation7 + $0xe0] sm:$0xff]  ;;  %v10550_v60 = vld [vmem:[#allocation7 + $0xc8] sm:$0xff] }
 0x368   : > { %8699 = vmatprep.subr.bf16.mxu1 %v9235_v58  ;;  %v4911_v58 = vld [vmem:[#allocation7 + $0xc0] sm:$0xff] }
 0x36a   : > { %8678 = vmatpush3.bf16.msra.mxu0 %v9236_v61  ;;  %v10552_v61 = vld [vmem:[#allocation7 + $0xa8] sm:$0xff] }
 0x36b   : > { %8700 = vmatpush3.bf16.msra.mxu1 %v9237_v62  ;;  %5004 = vmatprep.subr.mxu0 %v10547_v56  ;;  %v9509_v62 = vmov 0.0  }
 0x36d   : > { %4820 = vmatmul.mubr.bf16.vlgmr.msra.gmra.mxu0 %v4187_v34  ;;  %v4895_v34 = vld [vmem:[#allocation7 + $0x40] sm:$0xff] }
 0x36e   : > { %4860 = vmatmul.mubr.bf16.vlgmr.msra.gmra.mxu1 %v4189_v2  ;;  %5005 = vmatpush1.msra.mxu0 %v4915_v57  ;;  %v10565_v2 = vld [vmem:[#allocation7 + $0x28] sm:$0xff] }
 0x36f   : > { %5052 = vmatprep.mubr.f32.mxu0 %v9509_v62  ;;  %5006 = vmatprep.subr.mxu0 %v10550_v60 }
 0x370   : > { %5007 = vmatpush1.msra.mxu0 %v4911_v58  ;;  %v10627_v58 = vld [vmem:[%s11143_s4 + $0x8] sm:$0x3] }
 0x371   : > { %5008 = vmatprep.subr.mxu0 %v10552_v61 }
 0x372   : > { %5009 = vmatpush1.msra.mxu0 %v4907_v63 }
 0x373   : > { %5010 = vmatprep.subr.mxu0 %v10556_v18 }
 0x374   : > { %5011 = vmatpush1.msra.mxu0 %v4903_v24  ;;  %v10632_v24 = vld [vmem:[%s11143_s4] sm:$0xff] }
 0x375   : > { %5012 = vmatprep.subr.mxu0 %v10559_v0 }
 0x376   : > { %5013 = vmatpush1.msra.mxu0 %v4899_v1 }
 0x377   : > { %5014 = vmatprep.subr.mxu0 %v10562_v31 }
 0x378   : > { %5015 = vmatpush1.msra.mxu0 %v4895_v34 }
 0x379   : > { %5016 = vmatprep.subr.mxu0 %v10565_v2 }
 0x37a   : > { %5017 = vmatpush1.msra.mxu0 %v4891_v17 }
 0x37b   : > { %5018 = vmatprep.subr.mxu0 %v10568_v3 }
 0x40d   : > { %v8635_v4 = vpop.f32.mrf.mxu0 }
 0x40e   : > { %v8657_v5 = vpop.f32.mrf.mxu1 }
 0x40f   : > { %v8636_v54 = vpop.f32.mrf.mxu0 }
 0x410   : > { %v8658_v36 = vpop.f32.mrf.mxu1  ;;  %v8637_v11 = vadd.f32 %v8636_v54, %v8635_v4  ;;  %v4887_v4 = vld [vmem:[#allocation7] sm:$0xff] }
 0x411   : > { %v8638_v41 = vpop.f32.mrf.mxu0  ;;  %v8659_v40 = vadd.f32 %v8658_v36, %v8657_v5  ;;  %5019 = vmatpush1.msra.mxu0 %v4887_v4 }
 0x412   : > { %v8660_v55 = vpop.f32.mrf.mxu1  ;;  %v4742_v12 = vadd.f32 %v8637_v11, %v4322_v37 }
 0x413   : > { %v8639_v21 = vpop.f32.mrf.mxu0 }
 0x414   : > { %v8661_v6 = vpop.f32.mrf.mxu1  ;;  %v4782_v15 = vadd.f32 %v8659_v40, %v4742_v12 }
 0x42d   : > { %v8679_v13 = vpop.f32.mrf.mxu0 }
 0x42e   : > { %v8701_v14 = vpop.f32.mrf.mxu1 }
 0x42f   : > { %v8680_v28 = vpop.f32.mrf.mxu0 }
 0x430   : > { %v8681_v16 = vadd.f32 %v8680_v28, %v8679_v13  ;;  %v8702_v30 = vpop.f32.mrf.mxu1 }
 0x431   : > { %v8682_v19 = vpop.f32.mrf.mxu0  ;;  %v8703_v25 = vadd.f32 %v8702_v30, %v8701_v14 }
 0x432   : > { %v4822_v22 = vadd.f32 %v8681_v16, %v4782_v15  ;;  %v8704_v26 = vpop.f32.mrf.mxu1  ;;  %v10572_v15 = vld [vmem:[#allocation9] sm:$0xff]  ;;  %v10575_v16 = vsub.s32 1, %v10512_v8 }
 0x433   : > { %v8683_v29 = vpop.f32.mrf.mxu0  ;;  %v4965_v30 = vrot.slane %v10572_v15, %v10515_v9 }
 0x434   : > { %v4862_v32 = vadd.f32 %v8703_v25, %v4822_v22  ;;  %v8705_v33 = vpop.f32.mrf.mxu1  ;;  %v4971_v25 = vrot.slane %v10572_v15, %v10575_v16 }
 0x436   : > { %v4874_v38 = vadd.f32 %v4873_v27, %v4862_v32  ;;  %v4879_v39 = vrot.slane %v4862_v32, 4 }
 0x438   : > { %4876 = vst.msk [vmem:[#allocation3 + $0x1] sm:$0xf] %vm4875_vm2, %v4874_v38  ;;  %v4881_v42 = vadd.f32 %v4879_v39, %v4877_v35  ;;  %v10587_v38 = vsub.s32 7, %v10512_v8 }
 0x43a   : > { %4882 = vst.msk [vmem:[#allocation3 + $0x6] sm:$0xf] %vm4875_vm2, %v4881_v42  ;;  %v4977_v39 = vrot.slane %v10572_v15, %v10587_v38 }
 0x441   : > { %v10527_v43 = vld [vmem:[#allocation3] sm:$0xff]  ;;  %v10531_v45 = vld [vmem:[#allocation3 + $0x8] sm:$0x3] }
 0x442   : > { %v4921_v44 = vsel %vm4869_vm0, %v10527_v43, 0.0  ;;  %v4924_v20 = vsel %vm4871_vm1, %v10531_v45, 0.0 }
 0x443   : > { %4922 = vadd.xlane.f32.xlu0 %v4921_v44 }
 0x447   : > { %4925 = vadd.xlane.f32.xlu0 %v4924_v20 }
 0x4cc   : > { %v4923_v46 = vpop.xlane.xlu0 %4922 }
 0x4cd   : > { %v4928_v47 = vmul.f32 0.015625, %v4923_v46 }
 0x4cf   : > { %v10536_v23 = vsub.f32 %v10527_v43, %v4928_v47 }
 0x4d0   : > { %v4926_v48 = vpop.xlane.xlu0 %4925 }
 0x4d1   : > { %v4929_v49 = vmul.f32 0.015625, %v4926_v48  ;;  %v4932_v50 = vmul.f32 %v10536_v23, %v10536_v23  ;;  %v4920_v48 = vld [vmem:[#allocation9 + $0x8] sm:$0xff] }
 0x4d3   : > { %v10541_v51 = vsub.f32 %v10531_v45, %v4929_v49  ;;  %v4934_v59 = vsel %vm4869_vm0, %v4932_v50, 0.0 }
 0x4d4   : > { %4935 = vadd.xlane.f32.xlu1 %v4934_v59  ;;  %v4981_v59 = vrot.slane %v4920_v48, %v10587_v38 }
 0x4d5   : > { %v4933_v52 = vmul.f32 %v10541_v51, %v10541_v51 }
 0x4d7   : > { %v4937_v53 = vsel %vm4871_vm1, %v4933_v52, 0.0 }
 0x4d8   : > { %4938 = vadd.xlane.f32.xlu1 %v4937_v53 }
 0x55d   : > { %v4936_v5 = vpop.xlane.xlu1 %4935 }
 0x55e   : > { %v4940_v54 = vmul.f32 0.015625, %v4936_v5 }
 0x560   : > { %v4942_v36 = vadd.f32 1e-06, %v4940_v54 }
 0x561   : > { %v4939_v41 = vpop.xlane.xlu1 %4938 }
 0x562   : > { %9238 = vrsqrt.f32 %v4942_v36  ;;  %v4941_v55 = vmul.f32 0.015625, %v4939_v41  ;;  %vm4946_vm3 = vcmp.eq.f32.partialorder %v4942_v36, inf  ;;  %v4949_v10 = vand.u32 2147483648, %v4942_v36 }
 0x563   : > { %vm4948_vm4 = vcmp.eq.f32.partialorder %v4942_v36, 0.0 }
 0x564   : > { %v4943_v21 = vadd.f32 1e-06, %v4941_v55 }
 0x566   : > { %9240 = vrsqrt.f32 %v4943_v21  ;;  %vm4953_vm5 = vcmp.eq.f32.partialorder %v4943_v21, inf  ;;  %v4956_v13 = vand.u32 2147483648, %v4943_v21  ;;  %vm4955_vm6 = vcmp.eq.f32.partialorder %v4943_v21, 0.0 }
 0x56f   : > { %v9239_v6 = vpop.eup %9238 }
 0x570   : > { %v4945_v7 = vmul.f32 %v9239_v6, %v4942_v36 }
 0x572   : > { %v4947_v37 = vsel %vm4946_vm3, %v4942_v36, %v4945_v7 }
 0x573   : > { %v4950_v11 = vsel %vm4948_vm4, %v4949_v10, %v4947_v37  ;;  %v9241_v12 = vpop.eup %9240 }
 0x574   : > { %9242 = vrcp.f32 %v4950_v11  ;;  %v4952_v40 = vmul.f32 %v9241_v12, %v4943_v21 }
 0x576   : > { %v4954_v14 = vsel %vm4953_vm5, %v4943_v21, %v4952_v40 }
 0x577   : > { %v4957_v28 = vsel %vm4955_vm6, %v4956_v13, %v4954_v14 }
 0x578   : > { %9244 = vrcp.f32 %v4957_v28 }
 0x581   : > { %v9243_v19 = vpop.eup %9242 }
 0x582   : > { %v4959_v22 = vmul.f32 %v9243_v19, %v10536_v23 }
 0x584   : > { %v4966_v26 = vmul.f32 %v4965_v30, %v4959_v22 }
 0x585   : > { %v9245_v27 = vpop.eup %9244 }
 0x586   : > { %v4972_v29 = vadd.f32 %v4971_v25, %v4966_v26  ;;  %v4961_v32 = vmul.f32 %v9245_v27, %v10541_v51 }
 0x588   : > { %8539 = vmatmul.mubr.msk.f32.vlgmr.msra.gmra.mxu0 %vm4869_vm0, %v4972_v29  ;;  %v4967_v33 = vmul.f32 %v4965_v30, %v4961_v32 }
 0x589   : > { %5058 = vmatprep.mubr.f32.mxu0 %v9509_v62 }
 0x58a   : > { %v4973_v35 = vadd.f32 %v4971_v25, %v4967_v33 }
 0x58c   : > { %8540 = vmatmul.mubr.msk.f32.gmra.mxu0 %vm4869_vm0, %v4973_v35 }
 0x648   : > { %v5054_v42 = vpop.f32.mrf.mxu0 }
 0x649   : > { %v10591_v44 = vadd.f32 %v5054_v42, %v4977_v39 }
 0x64a   : > { %v5056_v20 = vpop.f32.mrf.mxu0 }
 0x64b   : > { %5069 = vrot.lane.b32.xlu1 %v10591_v44, %s9510_s26  ;;  %v10596_v46 = vmul.f32 0.25, %v10591_v44  ;;  %v10616_v57 = vadd.f32 %v5056_v20, %v4981_v59 }
 0x64c   : > { %v5060_v47 = vpop.f32.mrf.mxu0 }
 0x64d   : > { %8845 = vmatprep.mubr.msk.f32.mxu1 %vm5073_vm7, %v10596_v46  ;;  %v10600_v23 = vadd.f32 %v5060_v47, %v4977_v39 }
 0x64e   : > { %v5062_v50 = vpop.f32.mrf.mxu0 }
 0x64f   : > { %5071 = vrot.lane.b32.xlu0 %v10600_v23, %s9510_s26  ;;  %v10608_v52 = vadd.f32 %v5062_v50, %v4981_v59  ;;  %v10614_v53 = vmul.f32 0.25, %v10600_v23 }
 0x6bd   : > { %v5070_v51 = vpop.permute.xlu1 %5069 }
 0x6c1   : > { %v5072_v49 = vpop.permute.xlu0 %5071 }
 0x6c2   : > { %8841 = vmatprep.subr.msk.mxu1 %vm5073_vm7, %v5072_v49 }
 0x6c3   : > { %8842 = vmatpush3.xpose.msk.msra.mxu1 %vm5073_vm7, %v5072_v49 }
 0x6c4   : > { %8843 = vmatprep.subr.msk.mxu1 %vm5073_vm7, %v5070_v51 }
 0x6c7   : > { %8844 = vmatpush3.xpose.msk.msra.mxu1 %vm5073_vm7, %v5070_v51 }
 0x6c8   : > { %8848 = vmatprep.subr.msk.mxu1 %vm5189_vm8, %v10608_v52 }
 0x6ca   : > { %8846 = vmatmul.mubr.msk.f32.vlgmr.msra.gmra.mxu1 %vm5073_vm7, %v10614_v53 }
 0x6cb   : > { %8849 = vmatpush3.msk.msra.mxu1 %vm5189_vm8, %v10608_v52 }
 0x6cc   : > { %8850 = vmatprep.subr.mxu1 %v10616_v57 }
 0x6cd   : > { %8851 = vmatpush3.msra.mxu1 %v10616_v57 }
 0x78a   : > { %v8847_v63 = vpop.f32.mrf.mxu1 }
 0x78b   : > { %v5156_v1 = vadd.f32 %v8847_v63, %v10627_v58 }
 0x78c   : > { %v5150_v34 = vpop.f32.mrf.mxu1 }
 0x78d   : > { %v5151_v17 = vadd.f32 %v5150_v34, %v10632_v24  ;;  %v5164_v4 = vsel %vm5163_vm9, %v5156_v1, -inf }
 0x78e   : > { %5165 = vmax.xlane.f32.xlu0 %v5164_v4 }
 0x78f   : > { %v5160_v5 = vsel %vm5159_vm10, %v5151_v17, -inf }
 0x790   : > { %5161 = vmax.xlane.f32.xlu1 %v5160_v5 }
 0x7a1   : > { %5272 = vrot.lane.b32.xlu1 %v10591_v44, %s9511_s12 }
 0x7a4   : > { %5274 = vrot.lane.b32.xlu0 %v10600_v23, %s9511_s12 }
 0x7a5   : > { %5476 = vrot.lane.b32.xlu1 %v10600_v23, %s9512_s30 }
 0x7a9   : > { %5268 = vrot.lane.b32.xlu1 %v10596_v46, %s9513_s13 }
 0x817   : > { %v5166_v54 = vpop.xlane.xlu0 %5165 }
 0x818   : > { %v5168_v36 = vsub.f32 %v5156_v1, %v5166_v54 }
 0x819   : > { %v5162_v41 = vpop.xlane.xlu1 %5161 }
 0x81a   : > { %v5171_v55 = vmul.f32 1.442695, %v5168_v36  ;;  %v5167_v21 = vsub.f32 %v5151_v17, %v5162_v41 }
 0x81b   : > { %v5275_v6 = vpop.permute.xlu0 %5274 }
 0x81c   : > { %9246 = vpow2.f32 %v5171_v55  ;;  %v5169_v7 = vmul.f32 1.442695, %v5167_v21  ;;  %8855 = vmatprep.subr.msk.mxu0 %vm5073_vm7, %v5275_v6 }
 0x81d   : > { %8856 = vmatpush3.xpose.msk.msra.mxu0 %vm5073_vm7, %v5275_v6  ;;  %v5273_v10 = vpop.permute.xlu1 %5272 }
 0x81e   : > { %9248 = vpow2.f32 %v5169_v7  ;;  %8857 = vmatprep.subr.msk.mxu0 %vm5073_vm7, %v5273_v10 }
 0x821   : > { %8858 = vmatpush3.xpose.msk.msra.mxu0 %vm5073_vm7, %v5273_v10  ;;  %v5477_v37 = vpop.permute.xlu1 %5476 }
 0x822   : > { %8869 = vmatprep.subr.msk.mxu1 %vm5073_vm7, %v5477_v37 }
 0x825   : > { %v5269_v11 = vpop.permute.xlu1 %5268 }
 0x826   : > { %8859 = vmatprep.mubr.msk.f32.mxu0 %vm5073_vm7, %v5269_v11 }
 0x829   : > { %v9247_v12 = vpop.eup %9246 }
 0x82a   : > { %v5176_v40 = vsel %vm5163_vm9, %v9247_v12, 0.0 }
 0x82b   : > { %v9249_v13 = vpop.eup %9248  ;;  %5177 = vadd.xlane.f32.xlu1 %v5176_v40 }
 0x82c   : > { %v5173_v14 = vsel %vm5159_vm10, %v9249_v13, 0.0 }
 0x82d   : > { %5174 = vadd.xlane.f32.xlu0 %v5173_v14 }
 0x83c   : > { %5474 = vrot.lane.b32.xlu1 %v10591_v44, %s9512_s30 }
 0x840   : > { %5472 = vrot.lane.b32.xlu1 %v10614_v53, %s9514_s20 }
 0x843   : > { %5270 = vrot.lane.b32.xlu0 %v10614_v53, %s9513_s13 }
 0x847   : > { %5470 = vrot.lane.b32.xlu0 %v10596_v46, %s9514_s20 }
 0x8b4   : > { %v5178_v28 = vpop.xlane.xlu1 %5177 }
 0x8b5   : > { %9250 = vrcp.f32 %v5178_v28 }
 0x8b6   : > { %v5175_v30 = vpop.xlane.xlu0 %5174 }
 0x8b7   : > { %9252 = vrcp.f32 %v5175_v30 }
 0x8b8   : > { %v5475_v32 = vpop.permute.xlu1 %5474 }
 0x8ba   : > { %v5271_v19 = vpop.permute.xlu0 %5270 }
 0x8bb   : > { %8860 = vmatmul.mubr.msk.f32.vlgmr.msra.gmra.mxu0 %vm5073_vm7, %v5271_v19 }
 0x8bc   : > { %v5473_v33 = vpop.permute.xlu1 %5472 }
 0x8be   : > { %v5471_v29 = vpop.permute.xlu0 %5470 }
 0x8c2   : > { %v9251_v22 = vpop.eup %9250 }
 0x8c3   : > { %v5182_v27 = vmul.f32 %v9251_v22, %v9247_v12 }
 0x8c4   : > { %v9253_v25 = vpop.eup %9252 }
 0x8c5   : > { %v5180_v26 = vmul.f32 %v9253_v25, %v9249_v13 }
 0x8c7   : > { %8852 = vmatprep.mubr.msk.f32.mxu1 %vm5159_vm10, %v5180_v26 }
 0x8c8   : > { %8853 = vmatmul.mubr.msk.f32.vlgmr.msra.gmra.mxu1 %vm5159_vm10, %v5182_v27 }
 0x8c9   : > { %8870 = vmatpush3.xpose.msk.msra.mxu1 %vm5073_vm7, %v5477_v37  ;;  %8873 = vmatprep.mubr.msk.f32.mxu1 %vm5073_vm7, %v5471_v29 }
 0x8ca   : > { %8871 = vmatprep.subr.msk.mxu1 %vm5073_vm7, %v5475_v32 }
 0x8cd   : > { %8872 = vmatpush3.xpose.msk.msra.mxu1 %vm5073_vm7, %v5475_v32 }
 0x8d0   : > { %8874 = vmatmul.mubr.msk.f32.vlgmr.msra.gmra.mxu1 %vm5073_vm7, %v5473_v33 }
 0x97b   : > { %v8861_v35 = vpop.f32.mrf.mxu0 }
 0x97c   : > { %v5356_v39 = vadd.f32 %v8861_v35, %v10627_v58 }
 0x97d   : > { %v5350_v42 = vpop.f32.mrf.mxu0 }
 0x97e   : > { %v5351_v20 = vadd.f32 %v5350_v42, %v10632_v24  ;;  %v5362_v47 = vsel %vm5163_vm9, %v5356_v39, -inf }
 0x97f   : > { %5363 = vmax.xlane.f32.xlu1 %v5362_v47 }
 0x980   : > { %v5359_v48 = vsel %vm5159_vm10, %v5351_v20, -inf }
 0x981   : > { %5360 = vmax.xlane.f32.xlu0 %v5359_v48 }
 0x988   : > { %v10674_v49 = vpop.f32.mrf.mxu1 }
 0x98a   : > { %v10676_v50 = vpop.f32.mrf.mxu1 }
 0x990   : > { %v8875_v51 = vpop.f32.mrf.mxu1 }
 0x991   : > { %v5558_v1 = vadd.f32 %v8875_v51, %v10627_v58 }
 0x992   : > { %v5552_v59 = vpop.f32.mrf.mxu1 }
 0x993   : > { %v5553_v63 = vadd.f32 %v5552_v59, %v10632_v24  ;;  %v5564_v17 = vsel %vm5163_vm9, %v5558_v1, -inf }
 0x995   : > { %v5561_v34 = vsel %vm5159_vm10, %v5553_v63, -inf }
 0x996   : > { %5562 = vmax.xlane.f32.xlu0 %v5561_v34 }
 0x99a   : > { %5565 = vmax.xlane.f32.xlu0 %v5564_v17 }
 0xa08   : > { %v5364_v4 = vpop.xlane.xlu1 %5363 }
 0xa09   : > { %v5366_v5 = vsub.f32 %v5356_v39, %v5364_v4 }
 0xa0a   : > { %v5361_v54 = vpop.xlane.xlu0 %5360 }
 0xa0b   : > { %v5369_v36 = vmul.f32 1.442695, %v5366_v5  ;;  %v5365_v41 = vsub.f32 %v5351_v20, %v5361_v54 }
 0xa0d   : > { %9254 = vpow2.f32 %v5369_v36  ;;  %v5367_v55 = vmul.f32 1.442695, %v5365_v41 }
 0xa0f   : > { %9256 = vpow2.f32 %v5367_v55 }
 0xa1a   : > { %v9255_v21 = vpop.eup %9254 }
 0xa1b   : > { %v5374_v6 = vsel %vm5163_vm9, %v9255_v21, 0.0 }
 0xa1c   : > { %v9257_v7 = vpop.eup %9256  ;;  %5375 = vadd.xlane.f32.xlu1 %v5374_v6 }
 0xa1d   : > { %v5371_v10 = vsel %vm5159_vm10, %v9257_v7, 0.0 }
 0xa1e   : > { %5372 = vadd.xlane.f32.xlu0 %v5371_v10 }
 0xa1f   : > { %v5563_v37 = vpop.xlane.xlu0 %5562 }
 0xa20   : > { %v5567_v11 = vsub.f32 %v5553_v63, %v5563_v37 }
 0xa22   : > { %v5569_v40 = vmul.f32 1.442695, %v5567_v11 }
 0xa23   : > { %v5566_v12 = vpop.xlane.xlu0 %5565 }
 0xa24   : > { %v5568_v13 = vsub.f32 %v5558_v1, %v5566_v12  ;;  %9258 = vpow2.f32 %v5569_v40 }
 0xa26   : > { %v5571_v14 = vmul.f32 1.442695, %v5568_v13 }
 0xa28   : > { %9260 = vpow2.f32 %v5571_v14 }
 0xa2d   : > { %5382 = vrot.lane.b32.xlu1 %v10616_v57, %s9513_s13 }
 0xa31   : > { %5585 = vrot.lane.b32.xlu1 %v10608_v52, %s9514_s20  ;;  %v9259_v28 = vpop.eup %9258 }
 0xa32   : > { %v5573_v30 = vsel %vm5159_vm10, %v9259_v28, 0.0 }
 0xa34   : > { %5384 = vrot.lane.b32.xlu0 %v10608_v52, %s9513_s13 }
 0xa35   : > { %5583 = vrot.lane.b32.xlu1 %v10616_v57, %s9514_s20  ;;  %v9261_v19 = vpop.eup %9260 }
 0xa36   : > { %v5576_v22 = vsel %vm5163_vm9, %v9261_v19, 0.0 }
 0xa53   : > { %5574 = vadd.xlane.f32.xlu0 %v5573_v30 }
 0xa59   : > { %5577 = vadd.xlane.f32.xlu1 %v5576_v22 }
 0xa69   : > { %5677 = vrot.lane.b32.xlu0 %v10600_v23, %s9515_s21 }
 0xa6a   : > { %5675 = vrot.lane.b32.xlu1 %v10591_v44, %s9515_s21 }
 0xa6d   : > { %5671 = vrot.lane.b32.xlu0 %v10596_v46, %s9516_s11 }
 0xa6e   : > { %5673 = vrot.lane.b32.xlu1 %v10614_v53, %s9516_s11 }
 0xaa5   : > { %v5376_v25 = vpop.xlane.xlu1 %5375 }
 0xaa6   : > { %9262 = vrcp.f32 %v5376_v25 }
 0xaa7   : > { %v5373_v26 = vpop.xlane.xlu0 %5372 }
 0xaa8   : > { %9264 = vrcp.f32 %v5373_v26 }
 0xaa9   : > { %v5383_v27 = vpop.permute.xlu1 %5382 }
 0xaab   : > { %v5385_v29 = vpop.permute.xlu0 %5384 }
 0xaac   : > { %8862 = vmatprep.subr.msk.mxu0 %vm5189_vm8, %v5385_v29 }
 0xaad   : > { %8863 = vmatpush3.msk.msra.mxu0 %vm5189_vm8, %v5385_v29  ;;  %v5586_v23 = vpop.permute.xlu1 %5585 }
 0xaae   : > { %8864 = vmatprep.subr.mxu0 %v5383_v27 }
 0xaaf   : > { %8865 = vmatpush3.msra.mxu0 %v5383_v27 }
 0xab0   : > { %8876 = vmatprep.subr.msk.mxu0 %vm5189_vm8, %v5586_v23 }
 0xab1   : > { %v5584_v53 = vpop.permute.xlu1 %5583 }
 0xab3   : > { %v9263_v44 = vpop.eup %9262 }
 0xab4   : > { %v5380_v33 = vmul.f32 %v9263_v44, %v9255_v21 }
 0xab5   : > { %v9265_v46 = vpop.eup %9264 }
 0xab6   : > { %v5378_v32 = vmul.f32 %v9265_v46, %v9257_v7 }
 0xab8   : > { %8866 = vmatprep.mubr.msk.f32.mxu0 %vm5159_vm10, %v5378_v32 }
 0xab9   : > { %8867 = vmatmul.mubr.msk.f32.vlgmr.msra.gmra.mxu0 %vm5159_vm10, %v5380_v33 }
 0xaba   : > { %8877 = vmatpush3.msk.msra.mxu0 %vm5189_vm8, %v5586_v23 }
 0xabb   : > { %8878 = vmatprep.subr.mxu0 %v5584_v53 }
 0xabc   : > { %8879 = vmatpush3.msra.mxu0 %v5584_v53 }
 0xadc   : > { %v5575_v35 = vpop.xlane.xlu0 %5574 }
 0xadd   : > { %9266 = vrcp.f32 %v5575_v35 }
 0xae0   : > { %v5678_v39 = vpop.permute.xlu0 %5677 }
 0xae1   : > { %8883 = vmatprep.subr.msk.mxu0 %vm5073_vm7, %v5678_v39 }
 0xae2   : > { %v5578_v42 = vpop.xlane.xlu1 %5577 }
 0xae3   : > { %9268 = vrcp.f32 %v5578_v42 }
 0xae4   : > { %v5672_v59 = vpop.permute.xlu0 %5671 }
 0xae6   : > { %v5676_v63 = vpop.permute.xlu1 %5675 }
 0xaea   : > { %v9267_v20 = vpop.eup %9266  ;;  %v5674_v1 = vpop.permute.xlu1 %5673 }
 0xaeb   : > { %v5580_v47 = vmul.f32 %v9267_v20, %v9259_v28 }
 0xaed   : > { %8880 = vmatprep.mubr.msk.f32.mxu0 %vm5159_vm10, %v5580_v47 }
 0xaf0   : > { %v9269_v48 = vpop.eup %9268 }
 0xaf1   : > { %v5582_v51 = vmul.f32 %v9269_v48, %v9261_v19 }
 0xaf3   : > { %8881 = vmatmul.mubr.msk.f32.vlgmr.msra.gmra.mxu0 %vm5159_vm10, %v5582_v51 }
 0xaf4   : > { %8884 = vmatpush3.xpose.msk.msra.mxu0 %vm5073_vm7, %v5678_v39  ;;  %8887 = vmatprep.mubr.msk.f32.mxu0 %vm5073_vm7, %v5672_v59 }
 0xaf5   : > { %8885 = vmatprep.subr.msk.mxu0 %vm5073_vm7, %v5676_v63 }
 0xaf8   : > { %8886 = vmatpush3.xpose.msk.msra.mxu0 %vm5073_vm7, %v5676_v63 }
 0xafb   : > { %8888 = vmatmul.mubr.msk.f32.vlgmr.msra.gmra.mxu0 %vm5073_vm7, %v5674_v1 }
 0xb79   : > { %v8868_v34 = vpop.f32.mrf.mxu0 }
 0xb7b   : > { %v5461_v17 = vpop.f32.mrf.mxu0 }
 0xbb3   : > { %v8882_v4 = vpop.f32.mrf.mxu0 }
 0xbb5   : > { %v5662_v5 = vpop.f32.mrf.mxu0 }
 0xbbb   : > { %v8889_v54 = vpop.f32.mrf.mxu0 }
 0xbbc   : > { %v5759_v36 = vadd.f32 %v8889_v54, %v10627_v58 }
 0xbbd   : > { %v5753_v41 = vpop.f32.mrf.mxu0 }
 0xbbe   : > { %v5754_v55 = vadd.f32 %v5753_v41, %v10632_v24  ;;  %v5765_v21 = vsel %vm5163_vm9, %v5759_v36, -inf }
 0xbbf   : > { %5766 = vmax.xlane.f32.xlu1 %v5765_v21 }
 0xbc0   : > { %v5762_v6 = vsel %vm5159_vm10, %v5754_v55, -inf }
 0xbc1   : > { %5763 = vmax.xlane.f32.xlu0 %v5762_v6 }
 0xbd0   : > { %5784 = vrot.lane.b32.xlu1 %v10616_v57, %s9516_s11 }
 0xbd4   : > { %5930 = vrot.lane.b32.xlu1 %v10547_v56, %s9510_s26 }
 0xbd8   : > { %5928 = vrot.lane.b32.xlu1 %v10550_v60, %s9510_s26 }
 0xbdc   : > { %5924 = vrot.lane.b32.xlu1 %v10556_v18, %s9510_s26 }
 0xbe0   : > { %5920 = vrot.lane.b32.xlu1 %v10562_v31, %s9510_s26 }
 0xbe4   : > { %5918 = vrot.lane.b32.xlu1 %v10565_v2, %s9510_s26 }
 0xbe8   : > { %5882 = vrot.lane.b32.xlu1 %v5662_v5, %s9512_s30 }
 0xc48   : > { %v5767_v58 = vpop.xlane.xlu1 %5766 }
 0xc49   : > { %v5769_v24 = vsub.f32 %v5759_v36, %v5767_v58 }
 0xc4a   : > { %v5764_v57 = vpop.xlane.xlu0 %5763 }
 0xc4b   : > { %v5772_v7 = vmul.f32 1.442695, %v5769_v24  ;;  %v5768_v10 = vsub.f32 %v5754_v55, %v5764_v57  ;;  %v4917_v57 = vld [vmem:[#allocation7 + $0xf0] sm:$0xff] }
 0xc4c   : > { %v5785_v11 = vpop.permute.xlu1 %5784  ;;  %8916 = vmatprep.subr.mxu0 %v4917_v57 }
 0xc4d   : > { %9270 = vpow2.f32 %v5772_v7  ;;  %v5770_v56 = vmul.f32 1.442695, %v5768_v10  ;;  %v4913_v7 = vld [vmem:[#allocation7 + $0xd0] sm:$0xff]  ;;  %8917 = vmatpush3.msra.mxu0 %v4917_v57 }
 0xc4e   : > { %v4909_v10 = vld [vmem:[#allocation7 + $0xb0] sm:$0xff]  ;;  %8918 = vmatprep.subr.mxu0 %v4913_v7 }
 0xc4f   : > { %9272 = vpow2.f32 %v5770_v56  ;;  %8919 = vmatpush3.msra.mxu0 %v4913_v7  ;;  %v4905_v56 = vld [vmem:[#allocation7 + $0x90] sm:$0xff] }
 0xc50   : > { %v5931_v40 = vpop.permute.xlu1 %5930  ;;  %8920 = vmatprep.subr.mxu0 %v4909_v10 }
 0xc51   : > { %8921 = vmatpush3.msra.mxu0 %v4909_v10 }
 0xc52   : > { %8922 = vmatprep.subr.mxu0 %v4905_v56 }
 0xc53   : > { %8923 = vmatpush3.msra.mxu0 %v4905_v56 }
 0xc5a   : > { %v9271_v60 = vpop.eup %9270 }
 0xc5b   : > { %v5777_v37 = vsel %vm5163_vm9, %v9271_v60, 0.0 }
 0xc5c   : > { %v9273_v18 = vpop.eup %9272  ;;  %5778 = vadd.xlane.f32.xlu0 %v5777_v37  ;;  %v4897_v37 = vld [vmem:[#allocation7 + $0x50] sm:$0xff] }
 0xc5d   : > { %v5774_v31 = vsel %vm5159_vm10, %v9273_v18, 0.0 }
 0xc60   : > { %5775 = vadd.xlane.f32.xlu0 %v5774_v31  ;;  %v4889_v31 = vld [vmem:[#allocation7 + $0x10] sm:$0xff] }
 0xc76   : > { %5786 = vrot.lane.b32.xlu0 %v10608_v52, %s9516_s11 }
 0xc7a   : > { %5926 = vrot.lane.b32.xlu0 %v10552_v61, %s9510_s26  ;;  %v5929_v61 = vpop.permute.xlu1 %5928 }
 0xc7e   : > { %5922 = vrot.lane.b32.xlu0 %v10559_v0, %s9510_s26 }
 0xc82   : > { %5874 = vrot.lane.b32.xlu0 %v5461_v17, %s9515_s21 }
 0xc86   : > { %5876 = vrot.lane.b32.xlu0 %v8868_v34, %s9515_s21 }
 0xc8a   : > { %5884 = vrot.lane.b32.xlu0 %v8882_v4, %s9512_s30 }
 0xc8e   : > { %5916 = vrot.lane.b32.xlu0 %v10568_v3, %s9510_s26  ;;  %v5925_v3 = vpop.permute.xlu1 %5924 }
 0xc92   : > { %v5921_v19 = vpop.permute.xlu1 %5920 }
 0xc96   : > { %v5919_v25 = vpop.permute.xlu1 %5918 }
 0xc9a   : > { %v5883_v32 = vpop.permute.xlu1 %5882 }
 0xce5   : > { %v5779_v2 = vpop.xlane.xlu0 %5778 }
 0xce6   : > { %9274 = vrcp.f32 %v5779_v2 }
 0xce9   : > { %v5776_v12 = vpop.xlane.xlu0 %5775 }
 0xcea   : > { %9276 = vrcp.f32 %v5776_v12 }
 0xced   : > { %v5787_v52 = vpop.permute.xlu0 %5786 }
 0xcee   : > { %8890 = vmatprep.subr.msk.mxu1 %vm5189_vm8, %v5787_v52 }
 0xcef   : > { %8891 = vmatpush3.msk.msra.mxu1 %vm5189_vm8, %v5787_v52 }
 0xcf0   : > { %8892 = vmatprep.subr.mxu1 %v5785_v11 }
 0xcf1   : > { %8893 = vmatpush3.msra.mxu1 %v5785_v11  ;;  %v5927_v30 = vpop.permute.xlu0 %5926 }
 0xcf2   : > { %8897 = vmatprep.subr.mxu1 %v5931_v40 }
 0xcf3   : > { %v9275_v0 = vpop.eup %9274 }
 0xcf4   : > { %v5783_v28 = vmul.f32 %v9275_v0, %v9271_v60  ;;  %v4901_v60 = vld [vmem:[#allocation7 + $0x70] sm:$0xff] }
 0xcf5   : > { %v5923_v22 = vpop.permute.xlu0 %5922  ;;  %8924 = vmatprep.subr.mxu0 %v4901_v60 }
 0xcf6   : > { %8925 = vmatpush3.msra.mxu0 %v4901_v60 }
 0xcf7   : > { %v9277_v13 = vpop.eup %9276  ;;  %8926 = vmatprep.subr.mxu0 %v4897_v37 }
 0xcf8   : > { %v5781_v14 = vmul.f32 %v9277_v13, %v9273_v18  ;;  %v4893_v18 = vld [vmem:[#allocation7 + $0x30] sm:$0xff]  ;;  %8927 = vmatpush3.msra.mxu0 %v4897_v37 }
 0xcf9   : > { %v5875_v26 = vpop.permute.xlu0 %5874  ;;  %8928 = vmatprep.subr.mxu0 %v4893_v18 }
 0xcfa   : > { %8894 = vmatprep.mubr.msk.f32.mxu1 %vm5159_vm10, %v5781_v14  ;;  %v5896_v33 = vsel %vm5073_vm7, %v10676_v50, %v5875_v26  ;;  %v5906_v50 = vsub.s32 4, %v10512_v8  ;;  %8929 = vmatpush3.msra.mxu0 %v4893_v18 }
 0xcfb   : > { %8895 = vmatmul.mubr.msk.f32.vlgmr.msra.gmra.mxu1 %vm5159_vm10, %v5783_v28  ;;  %v5899_v35 = vsel %vm5898_vm11, %v5896_v33, %v5883_v32  ;;  %8930 = vmatprep.subr.mxu0 %v4889_v31 }
 0xcfc   : > { %8898 = vmatpush3.msra.mxu1 %v5931_v40  ;;  %v5907_v51 = vrot.slane %v10572_v15, %v5906_v50  ;;  %8931 = vmatpush3.msra.mxu0 %v4889_v31 }
 0xcfd   : > { %8899 = vmatprep.subr.mxu1 %v5929_v61  ;;  %v5877_v27 = vpop.permute.xlu0 %5876 }
 0xcfe   : > { %8900 = vmatpush3.msra.mxu1 %v5929_v61  ;;  %v5897_v42 = vsel %vm5073_vm7, %v10674_v49, %v5877_v27  ;;  %v10785_v27 = vsub.s32 2, %v10512_v8 }
 0xcff   : > { %8901 = vmatprep.subr.mxu1 %v5927_v30 }
 0xd00   : > { %8902 = vmatpush3.msra.mxu1 %v5927_v30 }
 0xd01   : > { %8903 = vmatprep.subr.mxu1 %v5925_v3  ;;  %v5885_v29 = vpop.permute.xlu0 %5884 }
 0xd02   : > { %8904 = vmatpush3.msra.mxu1 %v5925_v3  ;;  %v5900_v20 = vsel %vm5898_vm11, %v5897_v42, %v5885_v29  ;;  %v10788_v29 = vsub.s32 3, %v10512_v8 }
 0xd03   : > { %8905 = vmatprep.subr.mxu1 %v5923_v22 }
 0xd04   : > { %8906 = vmatpush3.msra.mxu1 %v5923_v22  ;;  %v6072_v32 = vrot.slane %v10572_v15, %v10788_v29 }
 0xd05   : > { %8907 = vmatprep.subr.mxu1 %v5921_v19  ;;  %v5917_v23 = vpop.permute.xlu0 %5916 }
 0xd06   : > { %8908 = vmatpush3.msra.mxu1 %v5921_v19 }
 0xd07   : > { %8909 = vmatprep.subr.mxu1 %v5919_v25 }
 0xd08   : > { %8910 = vmatpush3.msra.mxu1 %v5919_v25 }
 0xd09   : > { %8911 = vmatprep.subr.mxu1 %v5917_v23 }
 0xd0a   : > { %8912 = vmatpush3.msra.mxu1 %v5917_v23  ;;  %v6066_v23 = vrot.slane %v10572_v15, %v10785_v27 }
 0xdbb   : > { %v8896_v44 = vpop.f32.mrf.mxu1 }
 0xdbd   : > { %v5863_v46 = vpop.f32.mrf.mxu1 }
 0xdbe   : > { %5890 = vrot.lane.b32.xlu1 %v5863_v46, %s9511_s12 }
 0xdc2   : > { %5892 = vrot.lane.b32.xlu1 %v8896_v44, %s9511_s12 }
 0xe30   : > { %v5891_v53 = vpop.permute.xlu1 %5890 }
 0xe31   : > { %v5902_v39 = vsel %vm5901_vm12, %v5899_v35, %v5891_v53 }
 0xe32   : > { %8913 = vmatprep.mubr.msk.f32.mxu1 %vm4869_vm0, %v5902_v39 }
 0xe34   : > { %v5893_v47 = vpop.permute.xlu1 %5892 }
 0xe35   : > { %v5903_v48 = vsel %vm5901_vm12, %v5900_v20, %v5893_v47  ;;  %v4918_v47 = vld [vmem:[#allocation7 + $0xf8] sm:$0xff] }
 0xe36   : > { %8914 = vmatmul.mubr.msk.f32.vlgmr.msra.gmra.mxu1 %vm4869_vm0, %v5903_v48  ;;  %8935 = vmatprep.subr.mxu1 %v4918_v47  ;;  %v4914_v48 = vld [vmem:[#allocation7 + $0xd8] sm:$0xff] }
 0xe37   : > { %8936 = vmatpush3.xpose.msra.mxu1 %v4918_v47 }
 0xe38   : > { %8937 = vmatprep.subr.mxu1 %v4914_v48 }
 0xe3b   : > { %8938 = vmatpush3.xpose.msra.mxu1 %v4914_v48 }
 0xef6   : > { %v8915_v59 = vpop.f32.mrf.mxu1 }
 0xef7   : > { %v6018_v63 = vadd.f32 %v8915_v59, %v5907_v51  ;;  %v4906_v59 = vld [vmem:[#allocation7 + $0x98] sm:$0xff] }
 0xef8   : > { %v6012_v1 = vpop.f32.mrf.mxu1 }
 0xef9   : > { %v10767_v34 = vadd.f32 %v6018_v63, %v10531_v45  ;;  %v6013_v49 = vadd.f32 %v6012_v1, %v5907_v51  ;;  %v4910_v51 = vld [vmem:[#allocation7 + $0xb8] sm:$0xff] }
 0xefa   : > { %8939 = vmatprep.subr.mxu1 %v4910_v51  ;;  %v4902_v63 = vld [vmem:[#allocation7 + $0x78] sm:$0xff] }
 0xefb   : > { %v10770_v17 = vadd.f32 %v6013_v49, %v10527_v43  ;;  %v6026_v4 = vsel %vm4871_vm1, %v10767_v34, 0.0  ;;  %8940 = vmatpush3.xpose.msra.mxu1 %v4910_v51  ;;  %v4898_v1 = vld [vmem:[#allocation7 + $0x58] sm:$0xff] }
 0xefc   : > { %6027 = vadd.xlane.f32.xlu1 %v6026_v4  ;;  %8941 = vmatprep.subr.mxu1 %v4906_v59  ;;  %v4894_v49 = vld [vmem:[#allocation7 + $0x38] sm:$0xff] }
 0xefd   : > { %v6023_v5 = vsel %vm4869_vm0, %v10770_v17, 0.0  ;;  %v4890_v4 = vld [vmem:[#allocation7 + $0x18] sm:$0xff] }
 0xefe   : > { %6024 = vadd.xlane.f32.xlu0 %v6023_v5  ;;  %v6077_v5 = vsub.s32 6, %v10512_v8 }
 0xeff   : > { %8942 = vmatpush3.xpose.msra.mxu1 %v4906_v59 }
 0xf00   : > { %8943 = vmatprep.subr.mxu1 %v4902_v63 }
 0xf03   : > { %8944 = vmatpush3.xpose.msra.mxu1 %v4902_v63 }
 0xf04   : > { %8945 = vmatprep.subr.mxu1 %v4898_v1 }
 0xf07   : > { %8946 = vmatpush3.xpose.msra.mxu1 %v4898_v1 }
 0xf08   : > { %8947 = vmatprep.subr.mxu1 %v4894_v49 }
 0xf0b   : > { %8948 = vmatpush3.xpose.msra.mxu1 %v4894_v49 }
 0xf0c   : > { %8949 = vmatprep.subr.mxu1 %v4890_v4 }
 0xf0f   : > { %8950 = vmatpush3.xpose.msra.mxu1 %v4890_v4 }
 0xf85   : > { %v6028_v54 = vpop.xlane.xlu1 %6027 }
 0xf86   : > { %v6030_v36 = vmul.f32 0.015625, %v6028_v54  ;;  %v6078_v54 = vrot.slane %v10572_v15, %v6077_v5 }
 0xf87   : > { %v6025_v41 = vpop.xlane.xlu0 %6024 }
 0xf88   : > { %v6029_v55 = vmul.f32 0.015625, %v6025_v41  ;;  %v10777_v21 = vsub.f32 %v10767_v34, %v6030_v36 }
 0xf8a   : > { %v6031_v45 = vsub.f32 %v10770_v17, %v6029_v55  ;;  %v6034_v58 = vmul.f32 %v10777_v21, %v10777_v21 }
 0xf8c   : > { %v6033_v6 = vmul.f32 %v6031_v45, %v6031_v45  ;;  %v6038_v24 = vsel %vm4871_vm1, %v6034_v58, 0.0 }
 0xf8e   : > { %v6035_v43 = vsel %vm4869_vm0, %v6033_v6, 0.0 }
 0xf8f   : > { %6036 = vadd.xlane.f32.xlu0 %v6035_v43 }
 0xf93   : > { %6039 = vadd.xlane.f32.xlu0 %v6038_v24 }
0x1018   : > { %v6037_v2 = vpop.xlane.xlu0 %6036 }
0x1019   : > { %v6041_v11 = vmul.f32 0.015625, %v6037_v2 }
0x101b   : > { %v6043_v12 = vadd.f32 1e-06, %v6041_v11 }
0x101c   : > { %v6040_v52 = vpop.xlane.xlu0 %6039 }
0x101d   : > { %9278 = vrsqrt.f32 %v6043_v12  ;;  %v6042_v40 = vmul.f32 0.015625, %v6040_v52  ;;  %vm6047_vm13 = vcmp.eq.f32.partialorder %v6043_v12, inf  ;;  %v6050_v14 = vand.u32 2147483648, %v6043_v12 }
0x101e   : > { %vm6049_vm14 = vcmp.eq.f32.partialorder %v6043_v12, 0.0 }
0x101f   : > { %v6044_v61 = vadd.f32 1e-06, %v6042_v40 }
0x1021   : > { %9280 = vrsqrt.f32 %v6044_v61  ;;  %vm6054_vm15 = vcmp.eq.f32.partialorder %v6044_v61, inf  ;;  %v6057_v22 = vand.u32 2147483648, %v6044_v61  ;;  %vm6056_vm2 = vcmp.eq.f32.partialorder %v6044_v61, 0.0 }
0x102a   : > { %v9279_v0 = vpop.eup %9278 }
0x102b   : > { %v6046_v13 = vmul.f32 %v9279_v0, %v6043_v12 }
0x102d   : > { %v6048_v28 = vsel %vm6047_vm13, %v6043_v12, %v6046_v13 }
0x102e   : > { %v6051_v3 = vsel %vm6049_vm14, %v6050_v14, %v6048_v28  ;;  %v9281_v30 = vpop.eup %9280  ;;  %vm7846_vm14 = vcmask 73728  }
0x102f   : > { %9282 = vrcp.f32 %v6051_v3  ;;  %v6053_v19 = vmul.f32 %v9281_v30, %v6044_v61 }
0x1031   : > { %v6055_v25 = vsel %vm6054_vm15, %v6044_v61, %v6053_v19  ;;  %vm7848_vm15 = vcmask 78853  }
0x1032   : > { %v6058_v26 = vsel %vm6056_vm2, %v6057_v22, %v6055_v25 }
0x1033   : > { %9284 = vrcp.f32 %v6058_v26 }
0x103c   : > { %v9283_v44 = vpop.eup %9282 }
0x103d   : > { %v6060_v46 = vmul.f32 %v9283_v44, %v6031_v45 }
0x103f   : > { %v6067_v33 = vmul.f32 %v6066_v23, %v6060_v46 }
0x1040   : > { %v9285_v53 = vpop.eup %9284 }
0x1041   : > { %v6073_v35 = vadd.f32 %v6072_v32, %v6067_v33  ;;  %v6062_v39 = vmul.f32 %v9285_v53, %v10777_v21 }
0x1043   : > { %8932 = vmatprep.mubr.msk.f32.mxu0 %vm4869_vm0, %v6073_v35  ;;  %v6068_v42 = vmul.f32 %v6066_v23, %v6062_v39 }
0x1045   : > { %v6074_v20 = vadd.f32 %v6072_v32, %v6068_v42 }
0x1047   : > { %8933 = vmatmul.mubr.msk.f32.vlgmr.msra.gmra.mxu0 %vm4869_vm0, %v6074_v20 }
0x1048   : > { %6467 = vmatprep.mubr.f32.mxu0 %v9509_v62 }
0x1107   : > { %v8934_v36 = vpop.f32.mrf.mxu0 }
0x1108   : > { %v6157_v41 = vadd.f32 %v8934_v36, %v6078_v54 }
0x1109   : > { %v6151_v55 = vpop.f32.mrf.mxu0 }
0x110a   : > { %v6163_v21 = vmul.f32 0.70710677, %v6157_v41  ;;  %v6152_v45 = vadd.f32 %v6151_v55, %v6078_v54 }
0x110c   : > { %v8574_v6 = vclamps-f32 %v6163_v21, 3.925725  ;;  %v6162_v43 = vmul.f32 0.70710677, %v6152_v45 }
0x110e   : > { %v6169_v58 = vmul.f32 %v8574_v6, %v8574_v6  ;;  %v8573_v24 = vclamps-f32 %v6162_v43, 3.925725 }
0x1110   : > { %v6171_v57 = vmul.f32 -2.7261424e-10, %v6169_v58  ;;  %v6197_v7 = vmul.f32 -1.45660715e-05, %v6169_v58  ;;  %v6168_v10 = vmul.f32 %v8573_v24, %v8573_v24 }
0x1112   : > { %v6173_v56 = vadd.f32 2.7706815e-08, %v6171_v57  ;;  %v6199_v60 = vadd.f32 -0.00021337405, %v6197_v7  ;;  %v6170_v37 = vmul.f32 -2.7261424e-10, %v6168_v10 }
0x1113   : > { %v6196_v18 = vmul.f32 -1.45660715e-05, %v6168_v10  ;;  %v6160_v7 = vmul.f32 0.5, %v6152_v45 }
0x1114   : > { %v6175_v31 = vmul.f32 %v6173_v56, %v6169_v58  ;;  %v6201_v2 = vmul.f32 %v6199_v60, %v6169_v58  ;;  %v6172_v11 = vadd.f32 2.7706815e-08, %v6170_v37  ;;  %v6161_v60 = vmul.f32 0.5, %v6157_v41 }
0x1115   : > { %v6198_v12 = vadd.f32 -0.00021337405, %v6196_v18 }
0x1116   : > { %v6177_v52 = vadd.f32 -2.101024e-06, %v6175_v31  ;;  %v6203_v40 = vadd.f32 -0.001682827, %v6201_v2  ;;  %v6174_v61 = vmul.f32 %v6172_v11, %v6168_v10 }
0x1117   : > { %v6200_v0 = vmul.f32 %v6198_v12, %v6168_v10 }
0x1118   : > { %v6179_v13 = vmul.f32 %v6177_v52, %v6169_v58  ;;  %v6205_v14 = vmul.f32 %v6203_v40, %v6169_v58  ;;  %v6176_v28 = vadd.f32 -2.101024e-06, %v6174_v61 }
0x1119   : > { %v6202_v3 = vadd.f32 -0.001682827, %v6200_v0 }
0x111a   : > { %v6181_v30 = vadd.f32 -5.6925062e-05, %v6179_v13  ;;  %v6207_v19 = vadd.f32 -0.0073733293, %v6205_v14  ;;  %v6178_v22 = vmul.f32 %v6176_v28, %v6168_v10 }
0x111b   : > { %v6204_v25 = vmul.f32 %v6202_v3, %v6168_v10  ;;  %v10828_v3 = vld [vmem:[#allocation7 + $0x1e8] sm:$0xff] }
0x111c   : > { %v6183_v26 = vmul.f32 %v6181_v30, %v6169_v58  ;;  %v6209_v23 = vmul.f32 %v6207_v19, %v6169_v58  ;;  %v6180_v44 = vadd.f32 -5.6925062e-05, %v6178_v22  ;;  %v6330_v30 = vld [vmem:[#allocation7 + $0x1e0] sm:$0xff]  ;;  %v10830_v19 = vld [vmem:[#allocation7 + $0x1c8] sm:$0xff]  ;;  %6419 = vmatprep.subr.mxu0 %v10828_v3 }
0x111d   : > { %v6206_v46 = vadd.f32 -0.0073733293, %v6204_v25  ;;  %v6326_v22 = vld [vmem:[#allocation7 + $0x1c0] sm:$0xff]  ;;  %6420 = vmatpush1.msra.mxu0 %v6330_v30  ;;  %v10833_v25 = vld [vmem:[#allocation7 + $0x1a8] sm:$0xff] }
0x111e   : > { %v6185_v32 = vadd.f32 -0.00073499064, %v6183_v26  ;;  %v6211_v33 = vadd.f32 -0.014264739, %v6209_v23  ;;  %v6182_v53 = vmul.f32 %v6180_v44, %v6168_v10  ;;  %6421 = vmatprep.subr.mxu0 %v10830_v19  ;;  %v6322_v26 = vld [vmem:[#allocation7 + $0x1a0] sm:$0xff]  ;;  %v10836_v23 = vld [vmem:[#allocation7 + $0x188] sm:$0xff] }
0x111f   : > { %v6208_v35 = vmul.f32 %v6206_v46, %v6168_v10  ;;  %6422 = vmatpush1.msra.mxu0 %v6326_v22  ;;  %v6318_v44 = vld [vmem:[#allocation7 + $0x180] sm:$0xff]  ;;  %v10839_v46 = vld [vmem:[#allocation7 + $0x168] sm:$0xff] }
0x1120   : > { %v6187_v39 = vmul.f32 %v6185_v32, %v6169_v58  ;;  %9286 = vrcp.f32 %v6211_v33  ;;  %v6184_v42 = vadd.f32 -0.00073499064, %v6182_v53  ;;  %6423 = vmatprep.subr.mxu0 %v10833_v25  ;;  %v6314_v32 = vld [vmem:[#allocation7 + $0x160] sm:$0xff]  ;;  %v10842_v33 = vld [vmem:[#allocation7 + $0x148] sm:$0xff] }
0x1121   : > { %v6210_v20 = vadd.f32 -0.014264739, %v6208_v35  ;;  %6424 = vmatpush1.msra.mxu0 %v6322_v26  ;;  %v6310_v53 = vld [vmem:[#allocation7 + $0x140] sm:$0xff]  ;;  %v10845_v35 = vld [vmem:[#allocation7 + $0x128] sm:$0xff] }
0x1122   : > { %v6189_v47 = vadd.f32 -0.0029546, %v6187_v39  ;;  %v6186_v48 = vmul.f32 %v6184_v42, %v6168_v10  ;;  %6425 = vmatprep.subr.mxu0 %v10836_v23  ;;  %v6306_v39 = vld [vmem:[#allocation7 + $0x120] sm:$0xff]  ;;  %v10848_v42 = vld [vmem:[#allocation7 + $0x108] sm:$0xff] }
0x1123   : > { %9288 = vrcp.f32 %v6210_v20  ;;  %6426 = vmatpush1.msra.mxu0 %v6318_v44  ;;  %v6302_v20 = vld [vmem:[#allocation7 + $0x100] sm:$0xff] }
0x1124   : > { %v6191_v51 = vmul.f32 %v6189_v47, %v6169_v58  ;;  %v6188_v59 = vadd.f32 -0.0029546, %v6186_v48  ;;  %v6222_v58 = vsub.s32 5, %v10512_v8  ;;  %6427 = vmatprep.subr.mxu0 %v10839_v46 }
0x1125   : > { %6428 = vmatpush1.msra.mxu0 %v6314_v32  ;;  %v10901_v32 = vld [vmem:[%s11143_s4 + $0x8] sm:$0x3] }
0x1126   : > { %v6190_v63 = vmul.f32 %v6188_v59, %v6168_v10  ;;  %v6193_v1 = vadd.f32 -0.016096033, %v6191_v51  ;;  %v6223_v10 = vrot.slane %v10572_v15, %v6222_v58  ;;  %6429 = vmatprep.subr.mxu0 %v10842_v33 }
0x1127   : > { %6430 = vmatpush1.msra.mxu0 %v6310_v53 }
0x1128   : > { %v6192_v49 = vadd.f32 -0.016096033, %v6190_v63  ;;  %v6195_v4 = vmul.f32 %v8574_v6, %v6193_v1  ;;  %6431 = vmatprep.subr.mxu0 %v10845_v35 }
0x1129   : > { %6432 = vmatpush1.msra.mxu0 %v6306_v39 }
0x112a   : > { %v6194_v55 = vmul.f32 %v8573_v24, %v6192_v49  ;;  %6433 = vmatprep.subr.mxu0 %v10848_v42 }
0x112b   : > { %6434 = vmatpush1.msra.mxu0 %v6302_v20  ;;  %v10907_v20 = vld [vmem:[%s11143_s4] sm:$0xff] }
0x112d   : > { %v9287_v54 = vpop.eup %9286 }
0x112e   : > { %v6215_v36 = vmul.f32 %v9287_v54, %v6195_v4 }
0x1130   : > { %v9289_v21 = vpop.eup %9288  ;;  %v6217_v57 = vadd.f32 1.0, %v6215_v36 }
0x1131   : > { %v6213_v43 = vmul.f32 %v9289_v21, %v6194_v55 }
0x1132   : > { %v6219_v18 = vmul.f32 %v6217_v57, %v6161_v60 }
0x1133   : > { %v6216_v56 = vadd.f32 1.0, %v6213_v43 }
0x1135   : > { %v6218_v37 = vmul.f32 %v6216_v56, %v6160_v7 }
0x1137   : > { %8951 = vmatprep.mubr.f32.mxu1 %v6218_v37  ;;  %v10852_v37 = vld [vmem:[#allocation9 + $0x10] sm:$0xff] }
0x1138   : > { %8952 = vmatmul.mubr.f32.vlgmr.msra.gmra.mxu1 %v6219_v18 }
0x11f8   : > { %v8953_v6 = vpop.f32.mrf.mxu1 }
0x11f9   : > { %v6296_v31 = vadd.f32 %v8953_v6, %v6223_v10 }
0x11fa   : > { %v6290_v2 = vpop.f32.mrf.mxu1 }
0x11fb   : > { %v10807_v24 = vadd.f32 %v6296_v31, %v10767_v34  ;;  %v6291_v11 = vadd.f32 %v6290_v2, %v6223_v10  ;;  %v6380_v10 = vrot.slane %v10852_v37, %v10515_v9  ;;  %v6392_v9 = vrot.slane %v10852_v37, %v10587_v38 }
0x11fd   : > { %v10810_v45 = vadd.f32 %v6291_v11, %v10770_v17  ;;  %v6340_v41 = vsel %vm4871_vm1, %v10807_v24, 0.0  ;;  %v6386_v11 = vrot.slane %v10852_v37, %v10575_v16 }
0x11fe   : > { %6341 = vadd.xlane.f32.xlu1 %v6340_v41 }
0x11ff   : > { %v6337_v12 = vsel %vm4869_vm0, %v10810_v45, 0.0 }
0x1200   : > { %6338 = vadd.xlane.f32.xlu0 %v6337_v12 }
0x1287   : > { %v6342_v52 = vpop.xlane.xlu1 %6341 }
0x1288   : > { %v6344_v15 = vmul.f32 0.015625, %v6342_v52 }
0x1289   : > { %v6339_v40 = vpop.xlane.xlu0 %6338 }
0x128a   : > { %v10817_v61 = vsub.f32 %v10807_v24, %v6344_v15  ;;  %v6343_v34 = vmul.f32 0.015625, %v6339_v40 }
0x128c   : > { %v10820_v0 = vsub.f32 %v10810_v45, %v6343_v34  ;;  %v6348_v17 = vmul.f32 %v10817_v61, %v10817_v61 }
0x128e   : > { %v6352_v13 = vsel %vm4871_vm1, %v6348_v17, 0.0  ;;  %v6347_v14 = vmul.f32 %v10820_v0, %v10820_v0 }
0x128f   : > { %6353 = vadd.xlane.f32.xlu1 %v6352_v13 }
0x1290   : > { %v6349_v28 = vsel %vm4869_vm0, %v6347_v14, 0.0 }
0x1291   : > { %6350 = vadd.xlane.f32.xlu0 %v6349_v28 }
0x1318   : > { %v6354_v47 = vpop.xlane.xlu1 %6353 }
0x1319   : > { %v6356_v48 = vmul.f32 0.015625, %v6354_v47 }
0x131a   : > { %v6351_v51 = vpop.xlane.xlu0 %6350 }
0x131b   : > { %v6358_v59 = vadd.f32 1e-06, %v6356_v48  ;;  %v6355_v63 = vmul.f32 0.015625, %v6351_v51 }
0x131d   : > { %9290 = vrsqrt.f32 %v6358_v59  ;;  %v6357_v1 = vadd.f32 1e-06, %v6355_v63  ;;  %vm6368_vm3 = vcmp.eq.f32.partialorder %v6358_v59, inf  ;;  %v6371_v54 = vand.u32 2147483648, %v6358_v59 }
0x131e   : > { %vm6370_vm4 = vcmp.eq.f32.partialorder %v6358_v59, 0.0 }
0x131f   : > { %9292 = vrsqrt.f32 %v6357_v1  ;;  %vm6361_vm5 = vcmp.eq.f32.partialorder %v6357_v1, inf  ;;  %v6364_v57 = vand.u32 2147483648, %v6357_v1  ;;  %vm6363_vm6 = vcmp.eq.f32.partialorder %v6357_v1, 0.0 }
0x132a   : > { %v9291_v49 = vpop.eup %9290 }
0x132b   : > { %v6367_v4 = vmul.f32 %v9291_v49, %v6358_v59 }
0x132c   : > { %v9293_v36 = vpop.eup %9292 }
0x132d   : > { %v6369_v55 = vsel %vm6368_vm3, %v6358_v59, %v6367_v4  ;;  %v6360_v43 = vmul.f32 %v9293_v36, %v6357_v1 }
0x132e   : > { %v6372_v21 = vsel %vm6370_vm4, %v6371_v54, %v6369_v55 }
0x132f   : > { %9294 = vrcp.f32 %v6372_v21  ;;  %v6362_v7 = vsel %vm6361_vm5, %v6357_v1, %v6360_v43 }
0x1330   : > { %v6365_v56 = vsel %vm6363_vm6, %v6364_v57, %v6362_v7 }
0x1331   : > { %9296 = vrcp.f32 %v6365_v56 }
0x133c   : > { %v9295_v60 = vpop.eup %9294 }
0x133d   : > { %v6376_v31 = vmul.f32 %v9295_v60, %v10817_v61 }
0x133e   : > { %v9297_v18 = vpop.eup %9296 }
0x133f   : > { %v6374_v6 = vmul.f32 %v9297_v18, %v10820_v0  ;;  %v6382_v12 = vmul.f32 %v6380_v10, %v6376_v31 }
0x1341   : > { %v6381_v2 = vmul.f32 %v6380_v10, %v6374_v6  ;;  %v6388_v52 = vadd.f32 %v6386_v11, %v6382_v12 }
0x1343   : > { %v6387_v41 = vadd.f32 %v6386_v11, %v6381_v2 }
0x1345   : > { %8575 = vmatmul.mubr.msk.f32.vlgmr.msra.gmra.mxu0 %vm4869_vm0, %v6387_v41 }
0x1346   : > { %6473 = vmatprep.mubr.f32.mxu0 %v9509_v62  ;;  %v6336_v62 = vld [vmem:[#allocation9 + $0x18] sm:$0xff] }
0x1347   : > { %v6396_v30 = vrot.slane %v6336_v62, %v10587_v38 }
0x1349   : > { %8576 = vmatmul.mubr.msk.f32.gmra.mxu0 %vm4869_vm0, %v6388_v52 }
0x1405   : > { %v6469_v15 = vpop.f32.mrf.mxu0 }
0x1406   : > { %v10865_v40 = vadd.f32 %v6469_v15, %v6392_v9 }
0x1407   : > { %v6471_v61 = vpop.f32.mrf.mxu0 }
0x1408   : > { %6484 = vrot.lane.b32.xlu1 %v10865_v40, %s9510_s26  ;;  %v10870_v34 = vmul.f32 0.25, %v10865_v40  ;;  %v10890_v44 = vadd.f32 %v6471_v61, %v6396_v30 }
0x1409   : > { %v6475_v0 = vpop.f32.mrf.mxu0 }
0x140a   : > { %v10872_v17 = vadd.f32 %v6475_v0, %v6392_v9  ;;  %8958 = vmatprep.mubr.msk.f32.mxu0 %vm5073_vm7, %v10870_v34 }
0x140b   : > { %v6477_v14 = vpop.f32.mrf.mxu0 }
0x140c   : > { %6486 = vrot.lane.b32.xlu0 %v10872_v17, %s9510_s26  ;;  %v10882_v22 = vadd.f32 %v6477_v14, %v6396_v30  ;;  %v10886_v26 = vmul.f32 0.25, %v10872_v17 }
0x147a   : > { %v6485_v28 = vpop.permute.xlu1 %6484 }
0x147e   : > { %v6487_v13 = vpop.permute.xlu0 %6486 }
0x147f   : > { %8954 = vmatprep.subr.msk.mxu0 %vm5073_vm7, %v6487_v13 }
0x1480   : > { %8955 = vmatpush3.xpose.msk.msra.mxu0 %vm5073_vm7, %v6487_v13 }
0x1481   : > { %8956 = vmatprep.subr.msk.mxu0 %vm5073_vm7, %v6485_v28 }
0x1484   : > { %8957 = vmatpush3.xpose.msk.msra.mxu0 %vm5073_vm7, %v6485_v28 }
0x1485   : > { %8961 = vmatprep.subr.msk.mxu0 %vm5189_vm8, %v10882_v22 }
0x1487   : > { %8959 = vmatmul.mubr.msk.f32.vlgmr.msra.gmra.mxu0 %vm5073_vm7, %v10886_v26 }
0x1488   : > { %8962 = vmatpush3.msk.msra.mxu0 %vm5189_vm8, %v10882_v22 }
0x1489   : > { %8963 = vmatprep.subr.mxu0 %v10890_v44 }
0x148a   : > { %8964 = vmatpush3.msra.mxu0 %v10890_v44 }
0x1547   : > { %v8960_v38 = vpop.f32.mrf.mxu0 }
0x1548   : > { %v6570_v53 = vadd.f32 %v10901_v32, %v8960_v38 }
0x1549   : > { %v6564_v39 = vpop.f32.mrf.mxu0 }
0x154a   : > { %v6565_v47 = vadd.f32 %v10907_v20, %v6564_v39  ;;  %v6576_v48 = vsel %vm5163_vm9, %v6570_v53, -inf }
0x154b   : > { %6577 = vmax.xlane.f32.xlu0 %v6576_v48 }
0x154c   : > { %v6573_v51 = vsel %vm5159_vm10, %v6565_v47, -inf }
0x154d   : > { %6574 = vmax.xlane.f32.xlu1 %v6573_v51 }
0x15d4   : > { %v6578_v59 = vpop.xlane.xlu0 %6577 }
0x15d5   : > { %v6580_v63 = vsub.f32 %v6570_v53, %v6578_v59 }
0x15d6   : > { %v6575_v1 = vpop.xlane.xlu1 %6574 }
0x15d7   : > { %v6583_v49 = vmul.f32 1.442695, %v6580_v63  ;;  %v6579_v4 = vsub.f32 %v6565_v47, %v6575_v1 }
0x15d9   : > { %9298 = vpow2.f32 %v6583_v49  ;;  %v6581_v54 = vmul.f32 1.442695, %v6579_v4 }
0x15db   : > { %9300 = vpow2.f32 %v6581_v54 }
0x15e6   : > { %v9299_v36 = vpop.eup %9298 }
0x15e7   : > { %v6588_v55 = vsel %vm5163_vm9, %v9299_v36, 0.0 }
0x15e8   : > { %v9301_v21 = vpop.eup %9300  ;;  %6589 = vadd.xlane.f32.xlu1 %v6588_v55 }
0x15e9   : > { %v6585_v43 = vsel %vm5159_vm10, %v9301_v21, 0.0 }
0x15ea   : > { %6586 = vadd.xlane.f32.xlu0 %v6585_v43 }
0x15f9   : > { %6683 = vrot.lane.b32.xlu1 %v10865_v40, %s9511_s12 }
0x15fd   : > { %6679 = vrot.lane.b32.xlu1 %v10870_v34, %s9513_s13 }
0x1600   : > { %6685 = vrot.lane.b32.xlu0 %v10872_v17, %s9511_s12 }
0x1601   : > { %6681 = vrot.lane.b32.xlu1 %v10886_v26, %s9513_s13 }
0x1671   : > { %v6590_v57 = vpop.xlane.xlu1 %6589 }
0x1672   : > { %9302 = vrcp.f32 %v6590_v57 }
0x1673   : > { %v6587_v7 = vpop.xlane.xlu0 %6586 }
0x1674   : > { %9304 = vrcp.f32 %v6587_v7 }
0x1675   : > { %v6684_v60 = vpop.permute.xlu1 %6683 }
0x1677   : > { %v6686_v56 = vpop.permute.xlu0 %6685 }
0x1678   : > { %8968 = vmatprep.subr.msk.mxu0 %vm5073_vm7, %v6686_v56 }
0x1679   : > { %v6680_v2 = vpop.permute.xlu1 %6679 }
0x167d   : > { %v6682_v11 = vpop.permute.xlu1 %6681 }
0x167f   : > { %v9303_v18 = vpop.eup %9302 }
0x1680   : > { %v6594_v31 = vmul.f32 %v9303_v18, %v9299_v36 }
0x1681   : > { %v9305_v10 = vpop.eup %9304 }
0x1682   : > { %v6592_v6 = vmul.f32 %v9305_v10, %v9301_v21 }
0x1684   : > { %8965 = vmatprep.mubr.msk.f32.mxu0 %vm5159_vm10, %v6592_v6 }
0x1685   : > { %8966 = vmatmul.mubr.msk.f32.vlgmr.msra.gmra.mxu0 %vm5159_vm10, %v6594_v31 }
0x1686   : > { %8969 = vmatpush3.xpose.msk.msra.mxu0 %vm5073_vm7, %v6686_v56  ;;  %8972 = vmatprep.mubr.msk.f32.mxu0 %vm5073_vm7, %v6680_v2 }
0x1687   : > { %8970 = vmatprep.subr.msk.mxu0 %vm5073_vm7, %v6684_v60 }
0x168a   : > { %8971 = vmatpush3.xpose.msk.msra.mxu0 %vm5073_vm7, %v6684_v60 }
0x168d   : > { %8973 = vmatmul.mubr.msk.f32.vlgmr.msra.gmra.mxu0 %vm5073_vm7, %v6682_v11 }
0x1745   : > { %v10930_v41 = vpop.f32.mrf.mxu0 }
0x1747   : > { %v10932_v12 = vpop.f32.mrf.mxu0 }
0x174d   : > { %v8974_v52 = vpop.f32.mrf.mxu0 }
0x174e   : > { %v6767_v9 = vadd.f32 %v10901_v32, %v8974_v52 }
0x174f   : > { %v6761_v15 = vpop.f32.mrf.mxu0 }
0x1750   : > { %v6762_v61 = vadd.f32 %v10907_v20, %v6761_v15  ;;  %v6773_v0 = vsel %vm5163_vm9, %v6767_v9, -inf }
0x1751   : > { %6774 = vmax.xlane.f32.xlu1 %v6773_v0 }
0x1752   : > { %v6770_v62 = vsel %vm5159_vm10, %v6762_v61, -inf }
0x1753   : > { %6771 = vmax.xlane.f32.xlu0 %v6770_v62 }
0x1762   : > { %6793 = vrot.lane.b32.xlu1 %v10890_v44, %s9513_s13 }
0x1766   : > { %6887 = vrot.lane.b32.xlu1 %v10872_v17, %s9512_s30 }
0x176a   : > { %6885 = vrot.lane.b32.xlu1 %v10865_v40, %s9512_s30 }
0x176e   : > { %6883 = vrot.lane.b32.xlu1 %v10886_v26, %s9514_s20 }
0x17da   : > { %v6775_v13 = vpop.xlane.xlu1 %6774 }
0x17db   : > { %v6777_v14 = vsub.f32 %v6767_v9, %v6775_v13 }
0x17dc   : > { %v6772_v28 = vpop.xlane.xlu0 %6771 }
0x17dd   : > { %v6780_v30 = vmul.f32 1.442695, %v6777_v14  ;;  %v6776_v38 = vsub.f32 %v6762_v61, %v6772_v28 }
0x17de   : > { %v6794_v1 = vpop.permute.xlu1 %6793 }
0x17df   : > { %9306 = vpow2.f32 %v6780_v30  ;;  %v6778_v53 = vmul.f32 1.442695, %v6776_v38 }
0x17e1   : > { %9308 = vpow2.f32 %v6778_v53 }
0x17e2   : > { %v6888_v4 = vpop.permute.xlu1 %6887 }
0x17e6   : > { %v6886_v57 = vpop.permute.xlu1 %6885 }
0x17ea   : > { %v6884_v7 = vpop.permute.xlu1 %6883 }
0x17ec   : > { %v9307_v39 = vpop.eup %9306 }
0x17ed   : > { %v6785_v47 = vsel %vm5163_vm9, %v9307_v39, 0.0 }
0x17ee   : > { %v9309_v48 = vpop.eup %9308  ;;  %6786 = vadd.xlane.f32.xlu0 %v6785_v47 }
0x17ef   : > { %v6782_v51 = vsel %vm5159_vm10, %v9309_v48, 0.0 }
0x17f2   : > { %6783 = vadd.xlane.f32.xlu0 %v6782_v51 }
0x1808   : > { %6795 = vrot.lane.b32.xlu0 %v10882_v22, %s9513_s13 }
0x180c   : > { %6881 = vrot.lane.b32.xlu0 %v10870_v34, %s9514_s20 }
0x1877   : > { %v6787_v59 = vpop.xlane.xlu0 %6786 }
0x1878   : > { %9310 = vrcp.f32 %v6787_v59 }
0x187b   : > { %v6784_v63 = vpop.xlane.xlu0 %6783 }
0x187c   : > { %9312 = vrcp.f32 %v6784_v63 }
0x187f   : > { %v6796_v49 = vpop.permute.xlu0 %6795 }
0x1880   : > { %8975 = vmatprep.subr.msk.mxu1 %vm5189_vm8, %v6796_v49 }
0x1881   : > { %8976 = vmatpush3.msk.msra.mxu1 %vm5189_vm8, %v6796_v49 }
0x1882   : > { %8977 = vmatprep.subr.mxu1 %v6794_v1 }
0x1883   : > { %8978 = vmatpush3.msra.mxu1 %v6794_v1  ;;  %v6882_v43 = vpop.permute.xlu0 %6881 }
0x1884   : > { %8982 = vmatprep.subr.msk.mxu1 %vm5073_vm7, %v6888_v4 }
0x1885   : > { %v9311_v54 = vpop.eup %9310 }
0x1886   : > { %v6791_v21 = vmul.f32 %v9311_v54, %v9307_v39 }
0x1889   : > { %v9313_v36 = vpop.eup %9312 }
0x188a   : > { %v6789_v55 = vmul.f32 %v9313_v36, %v9309_v48 }
0x188c   : > { %8979 = vmatprep.mubr.msk.f32.mxu1 %vm5159_vm10, %v6789_v55 }
0x188d   : > { %8980 = vmatmul.mubr.msk.f32.vlgmr.msra.gmra.mxu1 %vm5159_vm10, %v6791_v21 }
0x188e   : > { %8983 = vmatpush3.xpose.msk.msra.mxu1 %vm5073_vm7, %v6888_v4  ;;  %8986 = vmatprep.mubr.msk.f32.mxu1 %vm5073_vm7, %v6882_v43 }
0x188f   : > { %8984 = vmatprep.subr.msk.mxu1 %vm5073_vm7, %v6886_v57 }
0x1892   : > { %8985 = vmatpush3.xpose.msk.msra.mxu1 %vm5073_vm7, %v6886_v57 }
0x1895   : > { %8987 = vmatmul.mubr.msk.f32.vlgmr.msra.gmra.mxu1 %vm5073_vm7, %v6884_v7 }
0x194d   : > { %v10962_v56 = vpop.f32.mrf.mxu1 }
0x194f   : > { %v10964_v60 = vpop.f32.mrf.mxu1 }
0x1955   : > { %v8988_v18 = vpop.f32.mrf.mxu1 }
0x1956   : > { %v6969_v10 = vadd.f32 %v10901_v32, %v8988_v18 }
0x1957   : > { %v6963_v6 = vpop.f32.mrf.mxu1 }
0x1958   : > { %v6964_v31 = vadd.f32 %v10907_v20, %v6963_v6  ;;  %v6975_v2 = vsel %vm5163_vm9, %v6969_v10, -inf }
0x1959   : > { %6976 = vmax.xlane.f32.xlu1 %v6975_v2 }
0x195a   : > { %v6972_v11 = vsel %vm5159_vm10, %v6964_v31, -inf }
0x195b   : > { %6973 = vmax.xlane.f32.xlu0 %v6972_v11 }
0x196a   : > { %6994 = vrot.lane.b32.xlu1 %v10890_v44, %s9514_s20 }
0x196e   : > { %7088 = vrot.lane.b32.xlu1 %v10872_v17, %s9515_s21 }
0x1972   : > { %7086 = vrot.lane.b32.xlu1 %v10865_v40, %s9515_s21 }
0x1976   : > { %7084 = vrot.lane.b32.xlu1 %v10886_v26, %s9516_s11 }
0x19e2   : > { %v6977_v52 = vpop.xlane.xlu1 %6976 }
0x19e3   : > { %v6979_v9 = vsub.f32 %v6969_v10, %v6977_v52 }
0x19e4   : > { %v6974_v15 = vpop.xlane.xlu0 %6973 }
0x19e5   : > { %v6982_v61 = vmul.f32 1.442695, %v6979_v9  ;;  %v6978_v0 = vsub.f32 %v6964_v31, %v6974_v15 }
0x19e6   : > { %v6995_v30 = vpop.permute.xlu1 %6994 }
0x19e7   : > { %9314 = vpow2.f32 %v6982_v61  ;;  %v6980_v62 = vmul.f32 1.442695, %v6978_v0 }
0x19e9   : > { %9316 = vpow2.f32 %v6980_v62 }
0x19ea   : > { %v7089_v53 = vpop.permute.xlu1 %7088 }
0x19ee   : > { %v7087_v59 = vpop.permute.xlu1 %7086 }
0x19f2   : > { %v7085_v63 = vpop.permute.xlu1 %7084 }
0x19f4   : > { %v9315_v13 = vpop.eup %9314 }
0x19f5   : > { %v6987_v14 = vsel %vm5163_vm9, %v9315_v13, 0.0 }
0x19f6   : > { %v9317_v28 = vpop.eup %9316  ;;  %6988 = vadd.xlane.f32.xlu0 %v6987_v14 }
0x19f7   : > { %v6984_v17 = vsel %vm5159_vm10, %v9317_v28, 0.0 }
0x19fa   : > { %6985 = vadd.xlane.f32.xlu0 %v6984_v17 }
0x1a10   : > { %6996 = vrot.lane.b32.xlu0 %v10882_v22, %s9514_s20 }
0x1a14   : > { %7082 = vrot.lane.b32.xlu0 %v10870_v34, %s9516_s11 }
0x1a7f   : > { %v6989_v40 = vpop.xlane.xlu0 %6988 }
0x1a80   : > { %9318 = vrcp.f32 %v6989_v40 }
0x1a83   : > { %v6986_v26 = vpop.xlane.xlu0 %6985 }
0x1a84   : > { %9320 = vrcp.f32 %v6986_v26 }
0x1a87   : > { %v6997_v38 = vpop.permute.xlu0 %6996 }
0x1a88   : > { %8989 = vmatprep.subr.msk.mxu0 %vm5189_vm8, %v6997_v38 }
0x1a89   : > { %8990 = vmatpush3.msk.msra.mxu0 %vm5189_vm8, %v6997_v38 }
0x1a8a   : > { %8991 = vmatprep.subr.mxu0 %v6995_v30 }
0x1a8b   : > { %8992 = vmatpush3.msra.mxu0 %v6995_v30  ;;  %v7083_v34 = vpop.permute.xlu0 %7082 }
0x1a8c   : > { %8996 = vmatprep.subr.msk.mxu0 %vm5073_vm7, %v7089_v53 }
0x1a8d   : > { %v9319_v39 = vpop.eup %9318 }
0x1a8e   : > { %v6993_v51 = vmul.f32 %v9319_v39, %v9315_v13 }
0x1a91   : > { %v9321_v47 = vpop.eup %9320 }
0x1a92   : > { %v6991_v48 = vmul.f32 %v9321_v47, %v9317_v28 }
0x1a94   : > { %8993 = vmatprep.mubr.msk.f32.mxu0 %vm5159_vm10, %v6991_v48 }
0x1a95   : > { %8994 = vmatmul.mubr.msk.f32.vlgmr.msra.gmra.mxu0 %vm5159_vm10, %v6993_v51 }
0x1a96   : > { %8997 = vmatpush3.xpose.msk.msra.mxu0 %vm5073_vm7, %v7089_v53  ;;  %9000 = vmatprep.mubr.msk.f32.mxu0 %vm5073_vm7, %v7083_v34 }
0x1a97   : > { %8998 = vmatprep.subr.msk.mxu0 %vm5073_vm7, %v7087_v59 }
0x1a9a   : > { %8999 = vmatpush3.xpose.msk.msra.mxu0 %vm5073_vm7, %v7087_v59 }
0x1a9d   : > { %9001 = vmatmul.mubr.msk.f32.vlgmr.msra.gmra.mxu0 %vm5073_vm7, %v7085_v63 }
0x1b55   : > { %v8995_v1 = vpop.f32.mrf.mxu0 }
0x1b57   : > { %v7073_v49 = vpop.f32.mrf.mxu0 }
0x1b5d   : > { %v9002_v4 = vpop.f32.mrf.mxu0 }
0x1b5e   : > { %v7170_v54 = vadd.f32 %v10901_v32, %v9002_v4 }
0x1b5f   : > { %v7164_v36 = vpop.f32.mrf.mxu0 }
0x1b60   : > { %v7165_v55 = vadd.f32 %v10907_v20, %v7164_v36  ;;  %v7176_v21 = vsel %vm5163_vm9, %v7170_v54, -inf }
0x1b61   : > { %7177 = vmax.xlane.f32.xlu1 %v7176_v21 }
0x1b62   : > { %v7173_v43 = vsel %vm5159_vm10, %v7165_v55, -inf }
0x1b63   : > { %7174 = vmax.xlane.f32.xlu0 %v7173_v43 }
0x1b72   : > { %7195 = vrot.lane.b32.xlu1 %v10890_v44, %s9516_s11 }
0x1b76   : > { %7339 = vrot.lane.b32.xlu1 %v10828_v3, %s9510_s26 }
0x1b7a   : > { %7337 = vrot.lane.b32.xlu1 %v10830_v19, %s9510_s26 }
0x1b7e   : > { %7333 = vrot.lane.b32.xlu1 %v10836_v23, %s9510_s26 }
0x1b82   : > { %7329 = vrot.lane.b32.xlu1 %v10842_v33, %s9510_s26 }
0x1b86   : > { %7327 = vrot.lane.b32.xlu1 %v10845_v35, %s9510_s26 }
0x1b8a   : > { %7293 = vrot.lane.b32.xlu1 %v7073_v49, %s9512_s30 }
0x1bea   : > { %v7178_v32 = vpop.xlane.xlu1 %7177 }
0x1beb   : > { %v7180_v20 = vsub.f32 %v7170_v54, %v7178_v32 }
0x1bec   : > { %v7175_v44 = vpop.xlane.xlu0 %7174 }
0x1bed   : > { %v7183_v57 = vmul.f32 1.442695, %v7180_v20  ;;  %v7179_v7 = vsub.f32 %v7165_v55, %v7175_v44  ;;  %v6332_v44 = vld [vmem:[#allocation7 + $0x1f0] sm:$0xff] }
0x1bee   : > { %v7196_v10 = vpop.permute.xlu1 %7195  ;;  %9029 = vmatprep.subr.mxu0 %v6332_v44 }
0x1bef   : > { %9322 = vpow2.f32 %v7183_v57  ;;  %v7181_v3 = vmul.f32 1.442695, %v7179_v7  ;;  %v6328_v57 = vld [vmem:[#allocation7 + $0x1d0] sm:$0xff]  ;;  %9030 = vmatpush3.msra.mxu0 %v6332_v44 }
0x1bf0   : > { %v6324_v7 = vld [vmem:[#allocation7 + $0x1b0] sm:$0xff]  ;;  %9031 = vmatprep.subr.mxu0 %v6328_v57 }
0x1bf1   : > { %9324 = vpow2.f32 %v7181_v3  ;;  %9032 = vmatpush3.msra.mxu0 %v6328_v57  ;;  %v6320_v3 = vld [vmem:[#allocation7 + $0x190] sm:$0xff] }
0x1bf2   : > { %v7340_v6 = vpop.permute.xlu1 %7339  ;;  %9033 = vmatprep.subr.mxu0 %v6324_v7 }
0x1bf3   : > { %9034 = vmatpush3.msra.mxu0 %v6324_v7 }
0x1bf4   : > { %9035 = vmatprep.subr.mxu0 %v6320_v3 }
0x1bf5   : > { %9036 = vmatpush3.msra.mxu0 %v6320_v3 }
0x1bfc   : > { %v9323_v19 = vpop.eup %9322 }
0x1bfd   : > { %v7188_v18 = vsel %vm5163_vm9, %v9323_v19, 0.0 }
0x1bfe   : > { %v9325_v23 = vpop.eup %9324  ;;  %7189 = vadd.xlane.f32.xlu0 %v7188_v18  ;;  %v6312_v18 = vld [vmem:[#allocation7 + $0x150] sm:$0xff] }
0x1bff   : > { %v7185_v33 = vsel %vm5159_vm10, %v9325_v23, 0.0 }
0x1c02   : > { %7186 = vadd.xlane.f32.xlu0 %v7185_v33  ;;  %v6304_v33 = vld [vmem:[#allocation7 + $0x110] sm:$0xff] }
0x1c18   : > { %7197 = vrot.lane.b32.xlu0 %v10882_v22, %s9516_s11 }
0x1c1c   : > { %7335 = vrot.lane.b32.xlu0 %v10833_v25, %s9510_s26 }
0x1c20   : > { %7331 = vrot.lane.b32.xlu0 %v10839_v46, %s9510_s26  ;;  %v7338_v46 = vpop.permute.xlu1 %7337 }
0x1c24   : > { %7285 = vrot.lane.b32.xlu0 %v10964_v60, %s9515_s21 }
0x1c28   : > { %7287 = vrot.lane.b32.xlu0 %v10962_v56, %s9515_s21 }
0x1c2c   : > { %7295 = vrot.lane.b32.xlu0 %v8995_v1, %s9512_s30 }
0x1c30   : > { %7325 = vrot.lane.b32.xlu0 %v10848_v42, %s9510_s26  ;;  %v7334_v42 = vpop.permute.xlu1 %7333 }
0x1c34   : > { %v7330_v52 = vpop.permute.xlu1 %7329 }
0x1c38   : > { %v7328_v15 = vpop.permute.xlu1 %7327 }
0x1c3c   : > { %v7294_v17 = vpop.permute.xlu1 %7293 }
0x1c87   : > { %v7190_v35 = vpop.xlane.xlu0 %7189 }
0x1c88   : > { %9326 = vrcp.f32 %v7190_v35 }
0x1c8b   : > { %v7187_v22 = vpop.xlane.xlu0 %7186 }
0x1c8c   : > { %9328 = vrcp.f32 %v7187_v22 }
0x1c8f   : > { %v7198_v25 = vpop.permute.xlu0 %7197 }
0x1c90   : > { %9003 = vmatprep.subr.msk.mxu1 %vm5189_vm8, %v7198_v25 }
0x1c91   : > { %9004 = vmatpush3.msk.msra.mxu1 %vm5189_vm8, %v7198_v25 }
0x1c92   : > { %9005 = vmatprep.subr.mxu1 %v7196_v10 }
0x1c93   : > { %9006 = vmatpush3.msra.mxu1 %v7196_v10  ;;  %v7336_v11 = vpop.permute.xlu0 %7335 }
0x1c94   : > { %9010 = vmatprep.subr.mxu1 %v7340_v6 }
0x1c95   : > { %v9327_v56 = vpop.eup %9326 }
0x1c96   : > { %v7194_v2 = vmul.f32 %v9327_v56, %v9323_v19  ;;  %v6316_v19 = vld [vmem:[#allocation7 + $0x170] sm:$0xff] }
0x1c97   : > { %v7332_v9 = vpop.permute.xlu0 %7331  ;;  %9037 = vmatprep.subr.mxu0 %v6316_v19 }
0x1c98   : > { %9038 = vmatpush3.msra.mxu0 %v6316_v19 }
0x1c99   : > { %v9329_v60 = vpop.eup %9328  ;;  %9039 = vmatprep.subr.mxu0 %v6312_v18 }
0x1c9a   : > { %v7192_v31 = vmul.f32 %v9329_v60, %v9325_v23  ;;  %v6308_v23 = vld [vmem:[#allocation7 + $0x130] sm:$0xff]  ;;  %9040 = vmatpush3.msra.mxu0 %v6312_v18 }
0x1c9b   : > { %v7286_v61 = vpop.permute.xlu0 %7285  ;;  %9041 = vmatprep.subr.mxu0 %v6308_v23 }
0x1c9c   : > { %9007 = vmatprep.mubr.msk.f32.mxu1 %vm5159_vm10, %v7192_v31  ;;  %v7307_v40 = vsel %vm5073_vm7, %v10932_v12, %v7286_v61  ;;  %v7316_v12 = vrot.slane %v10852_v37, %v5906_v50  ;;  %9042 = vmatpush3.msra.mxu0 %v6308_v23 }
0x1c9d   : > { %9008 = vmatmul.mubr.msk.f32.vlgmr.msra.gmra.mxu1 %vm5159_vm10, %v7194_v2  ;;  %v7309_v30 = vsel %vm5898_vm11, %v7307_v40, %v7294_v17  ;;  %9043 = vmatprep.subr.mxu0 %v6304_v33 }
0x1c9e   : > { %9011 = vmatpush3.msra.mxu1 %v7340_v6  ;;  %9044 = vmatpush3.msra.mxu0 %v6304_v33 }
0x1c9f   : > { %9012 = vmatprep.subr.mxu1 %v7338_v46  ;;  %v7288_v0 = vpop.permute.xlu0 %7287 }
0x1ca0   : > { %9013 = vmatpush3.msra.mxu1 %v7338_v46  ;;  %v7308_v53 = vsel %vm5073_vm7, %v10930_v41, %v7288_v0  ;;  %v7475_v0 = vrot.slane %v10852_v37, %v10785_v27 }
0x1ca1   : > { %9014 = vmatprep.subr.mxu1 %v7336_v11 }
0x1ca2   : > { %9015 = vmatpush3.msra.mxu1 %v7336_v11 }
0x1ca3   : > { %9016 = vmatprep.subr.mxu1 %v7334_v42  ;;  %v7296_v62 = vpop.permute.xlu0 %7295 }
0x1ca4   : > { %9017 = vmatpush3.msra.mxu1 %v7334_v42  ;;  %v7310_v39 = vsel %vm5898_vm11, %v7308_v53, %v7296_v62  ;;  %v6333_v53 = vld [vmem:[#allocation7 + $0x1f8] sm:$0xff] }
0x1ca5   : > { %9018 = vmatprep.subr.mxu1 %v7332_v9 }
0x1ca6   : > { %9019 = vmatpush3.msra.mxu1 %v7332_v9 }
0x1ca7   : > { %9020 = vmatprep.subr.mxu1 %v7330_v52  ;;  %v7326_v13 = vpop.permute.xlu0 %7325 }
0x1ca8   : > { %9021 = vmatpush3.msra.mxu1 %v7330_v52 }
0x1ca9   : > { %9022 = vmatprep.subr.mxu1 %v7328_v15 }
0x1caa   : > { %9023 = vmatpush3.msra.mxu1 %v7328_v15 }
0x1cab   : > { %9024 = vmatprep.subr.mxu1 %v7326_v13 }
0x1cac   : > { %9025 = vmatpush3.msra.mxu1 %v7326_v13 }
0x1cad   : > { %9048 = vmatprep.subr.mxu1 %v6333_v53 }
0x1d5d   : > { %v9009_v14 = vpop.f32.mrf.mxu1 }
0x1d5f   : > { %v7274_v28 = vpop.f32.mrf.mxu1 }
0x1d60   : > { %7301 = vrot.lane.b32.xlu1 %v7274_v28, %s9511_s12 }
0x1d64   : > { %7303 = vrot.lane.b32.xlu1 %v9009_v14, %s9511_s12  ;;  %v7481_v14 = vrot.slane %v10852_v37, %v10788_v29 }
0x1dd2   : > { %v7302_v26 = vpop.permute.xlu1 %7301 }
0x1dd3   : > { %v7311_v38 = vsel %vm5901_vm12, %v7309_v30, %v7302_v26 }
0x1dd4   : > { %9026 = vmatprep.mubr.msk.f32.mxu1 %vm4869_vm0, %v7311_v38 }
0x1dd6   : > { %v7304_v47 = vpop.permute.xlu1 %7303 }
0x1dd7   : > { %v7312_v48 = vsel %vm5901_vm12, %v7310_v39, %v7304_v47  ;;  %v6329_v39 = vld [vmem:[#allocation7 + $0x1d8] sm:$0xff] }
0x1dd8   : > { %9027 = vmatmul.mubr.msk.f32.vlgmr.msra.gmra.mxu1 %vm4869_vm0, %v7312_v48  ;;  %v6325_v47 = vld [vmem:[#allocation7 + $0x1b8] sm:$0xff] }
0x1dd9   : > { %9049 = vmatpush3.xpose.msra.mxu1 %v6333_v53  ;;  %v6321_v48 = vld [vmem:[#allocation7 + $0x198] sm:$0xff] }
0x1dda   : > { %9050 = vmatprep.subr.mxu1 %v6329_v39 }
0x1ddd   : > { %9051 = vmatpush3.xpose.msra.mxu1 %v6329_v39 }
0x1dde   : > { %9052 = vmatprep.subr.mxu1 %v6325_v47 }
0x1de1   : > { %9053 = vmatpush3.xpose.msra.mxu1 %v6325_v47 }
0x1de2   : > { %9054 = vmatprep.subr.mxu1 %v6321_v48 }
0x1de5   : > { %9055 = vmatpush3.xpose.msra.mxu1 %v6321_v48 }
0x1e98   : > { %v9028_v51 = vpop.f32.mrf.mxu1 }
0x1e99   : > { %v7427_v34 = vadd.f32 %v9028_v51, %v7316_v12  ;;  %v6313_v51 = vld [vmem:[#allocation7 + $0x158] sm:$0xff] }
0x1e9a   : > { %v7421_v59 = vpop.f32.mrf.mxu1 }
0x1e9b   : > { %v11046_v63 = vadd.f32 %v7427_v34, %v10807_v24  ;;  %v7422_v1 = vadd.f32 %v7421_v59, %v7316_v12  ;;  %v6317_v12 = vld [vmem:[#allocation7 + $0x178] sm:$0xff] }
0x1e9c   : > { %9056 = vmatprep.subr.mxu1 %v6317_v12  ;;  %v6309_v34 = vld [vmem:[#allocation7 + $0x138] sm:$0xff] }
0x1e9d   : > { %v11049_v41 = vadd.f32 %v7422_v1, %v10810_v45  ;;  %v7435_v49 = vsel %vm4871_vm1, %v11046_v63, 0.0  ;;  %9057 = vmatpush3.xpose.msra.mxu1 %v6317_v12  ;;  %v6305_v59 = vld [vmem:[#allocation7 + $0x118] sm:$0xff]  ;;  %v7487_v1 = vrot.slane %v10852_v37, %v6077_v5 }
0x1e9e   : > { %7436 = vadd.xlane.f32.xlu1 %v7435_v49  ;;  %9058 = vmatprep.subr.mxu1 %v6313_v51 }
0x1e9f   : > { %v7432_v4 = vsel %vm4869_vm0, %v11049_v41, 0.0 }
0x1ea0   : > { %7433 = vadd.xlane.f32.xlu0 %v7432_v4 }
0x1ea1   : > { %9059 = vmatpush3.xpose.msra.mxu1 %v6313_v51 }
0x1ea2   : > { %9060 = vmatprep.subr.mxu1 %v6309_v34 }
0x1ea5   : > { %9061 = vmatpush3.xpose.msra.mxu1 %v6309_v34 }
0x1ea6   : > { %9062 = vmatprep.subr.mxu1 %v6305_v59 }
0x1ea9   : > { %9063 = vmatpush3.xpose.msra.mxu1 %v6305_v59 }
0x1f27   : > { %v7437_v54 = vpop.xlane.xlu1 %7436 }
0x1f28   : > { %v7439_v50 = vmul.f32 0.015625, %v7437_v54 }
0x1f29   : > { %v7434_v36 = vpop.xlane.xlu0 %7433 }
0x1f2a   : > { %v7438_v55 = vmul.f32 0.015625, %v7434_v36  ;;  %v11056_v21 = vsub.f32 %v11046_v63, %v7439_v50 }
0x1f2c   : > { %v7440_v24 = vsub.f32 %v11049_v41, %v7438_v55  ;;  %v7443_v32 = vmul.f32 %v11056_v21, %v11056_v21 }
0x1f2e   : > { %v7442_v43 = vmul.f32 %v7440_v24, %v7440_v24  ;;  %v7447_v20 = vsel %vm4871_vm1, %v7443_v32, 0.0 }
0x1f30   : > { %v7444_v45 = vsel %vm4869_vm0, %v7442_v43, 0.0 }
0x1f31   : > { %7445 = vadd.xlane.f32.xlu0 %v7444_v45 }
0x1f35   : > { %7448 = vadd.xlane.f32.xlu0 %v7447_v20 }
0x1fba   : > { %v7446_v35 = vpop.xlane.xlu0 %7445 }
0x1fbb   : > { %v7450_v10 = vmul.f32 0.015625, %v7446_v35 }
0x1fbd   : > { %v7452_v22 = vadd.f32 1e-06, %v7450_v10 }
0x1fbe   : > { %v7449_v25 = vpop.xlane.xlu0 %7448 }
0x1fbf   : > { %9330 = vrsqrt.f32 %v7452_v22  ;;  %v7451_v6 = vmul.f32 0.015625, %v7449_v25  ;;  %vm7456_vm7 = vcmp.eq.f32.partialorder %v7452_v22, inf  ;;  %v7459_v31 = vand.u32 2147483648, %v7452_v22 }
0x1fc0   : > { %vm7458_vm8 = vcmp.eq.f32.partialorder %v7452_v22, 0.0 }
0x1fc1   : > { %v7453_v46 = vadd.f32 1e-06, %v7451_v6 }
0x1fc3   : > { %9332 = vrsqrt.f32 %v7453_v46  ;;  %vm7463_vm9 = vcmp.eq.f32.partialorder %v7453_v46, inf  ;;  %v7466_v9 = vand.u32 2147483648, %v7453_v46  ;;  %vm7465_vm10 = vcmp.eq.f32.partialorder %v7453_v46, 0.0 }
0x1fcc   : > { %v9331_v56 = vpop.eup %9330 }
0x1fcd   : > { %v7455_v60 = vmul.f32 %v9331_v56, %v7452_v22 }
0x1fcf   : > { %v7457_v2 = vsel %vm7456_vm7, %v7452_v22, %v7455_v60 }
0x1fd0   : > { %v7460_v42 = vsel %vm7458_vm8, %v7459_v31, %v7457_v2  ;;  %v9333_v11 = vpop.eup %9332 }
0x1fd1   : > { %9334 = vrcp.f32 %v7460_v42  ;;  %v7462_v52 = vmul.f32 %v9333_v11, %v7453_v46 }
0x1fd3   : > { %v7464_v15 = vsel %vm7463_vm9, %v7453_v46, %v7462_v52 }
0x1fd4   : > { %v7467_v61 = vsel %vm7465_vm10, %v7466_v9, %v7464_v15 }
0x1fd5   : > { %9336 = vrcp.f32 %v7467_v61 }
0x1fde   : > { %v9335_v62 = vpop.eup %9334 }
0x1fdf   : > { %v7469_v13 = vmul.f32 %v9335_v62, %v7440_v24 }
0x1fe1   : > { %v7476_v28 = vmul.f32 %v7475_v0, %v7469_v13 }
0x1fe2   : > { %v9337_v17 = vpop.eup %9336 }
0x1fe3   : > { %v7482_v40 = vadd.f32 %v7481_v14, %v7476_v28  ;;  %v7471_v26 = vmul.f32 %v9337_v17, %v11056_v21 }
0x1fe5   : > { %9045 = vmatprep.mubr.msk.f32.mxu0 %vm4869_vm0, %v7482_v40  ;;  %v7477_v30 = vmul.f32 %v7475_v0, %v7471_v26 }
0x1fe7   : > { %v7483_v38 = vadd.f32 %v7481_v14, %v7477_v30 }
0x1fe9   : > { %9046 = vmatmul.mubr.msk.f32.vlgmr.msra.gmra.mxu0 %vm4869_vm0, %v7483_v38 }
0x20a9   : > { %v9047_v49 = vpop.f32.mrf.mxu0 }
0x20aa   : > { %v7566_v4 = vadd.f32 %v9047_v49, %v7487_v1 }
0x20ab   : > { %v7560_v54 = vpop.f32.mrf.mxu0 }
0x20ac   : > { %v7572_v50 = vmul.f32 0.70710677, %v7566_v4  ;;  %v7561_v36 = vadd.f32 %v7560_v54, %v7487_v1 }
0x20ae   : > { %v8610_v55 = vclamps-f32 %v7572_v50, 3.925725  ;;  %v7571_v21 = vmul.f32 0.70710677, %v7561_v36  ;;  %v7569_v54 = vmul.f32 0.5, %v7561_v36 }
0x20b0   : > { %v7578_v24 = vmul.f32 %v8610_v55, %v8610_v55  ;;  %v8609_v43 = vclamps-f32 %v7571_v21, 3.925725  ;;  %v7570_v21 = vmul.f32 0.5, %v7566_v4 }
0x20b2   : > { %v7580_v45 = vmul.f32 -2.7261424e-10, %v7578_v24  ;;  %v7606_v32 = vmul.f32 -1.45660715e-05, %v7578_v24  ;;  %v7577_v20 = vmul.f32 %v8609_v43, %v8609_v43 }
0x20b4   : > { %v7582_v44 = vadd.f32 2.7706815e-08, %v7580_v45  ;;  %v7608_v57 = vadd.f32 -0.00021337405, %v7606_v32  ;;  %v7579_v7 = vmul.f32 -2.7261424e-10, %v7577_v20 }
0x20b5   : > { %v7605_v3 = vmul.f32 -1.45660715e-05, %v7577_v20 }
0x20b6   : > { %v7584_v19 = vmul.f32 %v7582_v44, %v7578_v24  ;;  %v7610_v18 = vmul.f32 %v7608_v57, %v7578_v24  ;;  %v7581_v23 = vadd.f32 2.7706815e-08, %v7579_v7 }
0x20b7   : > { %v7607_v5 = vadd.f32 -0.00021337405, %v7605_v3 }
0x20b8   : > { %v7586_v33 = vadd.f32 -2.101024e-06, %v7584_v19  ;;  %v7612_v35 = vadd.f32 -0.001682827, %v7610_v18  ;;  %v7583_v10 = vmul.f32 %v7581_v23, %v7577_v20 }
0x20b9   : > { %v7609_v22 = vmul.f32 %v7607_v5, %v7577_v20 }
0x20ba   : > { %v7588_v25 = vmul.f32 %v7586_v33, %v7578_v24  ;;  %v7614_v6 = vmul.f32 %v7612_v35, %v7578_v24  ;;  %v7585_v46 = vadd.f32 -2.101024e-06, %v7583_v10  ;;  %v4173_v35 = vld [vmem:[%s11146_s7 + $0x38] sm:$0xff]  ;;  %v4172_v10 = vld [vmem:[%s11146_s7 + $0x30] sm:$0xff] }
0x20bb   : > { %v7611_v56 = vadd.f32 -0.001682827, %v7609_v22  ;;  %v4171_v22 = vld [vmem:[%s11146_s7 + $0x28] sm:$0xff] }
0x20bc   : > { %v7590_v60 = vadd.f32 -5.6925062e-05, %v7588_v25  ;;  %v7616_v31 = vadd.f32 -0.0073733293, %v7614_v6  ;;  %v7587_v2 = vmul.f32 %v7585_v46, %v7577_v20  ;;  %v4170_v25 = vld [vmem:[%s11146_s7 + $0x20] sm:$0xff]  ;;  %v4169_v6 = vld [vmem:[%s11146_s7 + $0x18] sm:$0xff] }
0x20bd   : > { %v7613_v42 = vmul.f32 %v7611_v56, %v7577_v20  ;;  %v4168_v46 = vld [vmem:[%s11146_s7 + $0x10] sm:$0xff]  ;;  %v4167_v56 = vld [vmem:[%s11146_s7 + $0x8] sm:$0xff] }
0x20be   : > { %v7592_v11 = vmul.f32 %v7590_v60, %v7578_v24  ;;  %v7618_v52 = vmul.f32 %v7616_v31, %v7578_v24  ;;  %v7589_v9 = vadd.f32 -5.6925062e-05, %v7587_v2 }
0x20bf   : > { %v7615_v15 = vadd.f32 -0.0073733293, %v7613_v42 }
0x20c0   : > { %v7594_v61 = vadd.f32 -0.00073499064, %v7592_v11  ;;  %v7620_v0 = vadd.f32 -0.014264739, %v7618_v52  ;;  %v7591_v62 = vmul.f32 %v7589_v9, %v7577_v20 }
0x20c1   : > { %v7617_v13 = vmul.f32 %v7615_v15, %v7577_v20 }
0x20c2   : > { %v7596_v14 = vmul.f32 %v7594_v61, %v7578_v24  ;;  %9338 = vrcp.f32 %v7620_v0  ;;  %v7593_v28 = vadd.f32 -0.00073499064, %v7591_v62 }
0x20c3   : > { %v7619_v17 = vadd.f32 -0.014264739, %v7617_v13 }
0x20c4   : > { %v7598_v40 = vadd.f32 -0.0029546, %v7596_v14  ;;  %v7595_v26 = vmul.f32 %v7593_v28, %v7577_v20 }
0x20c5   : > { %9340 = vrcp.f32 %v7619_v17 }
0x20c6   : > { %v7600_v30 = vmul.f32 %v7598_v40, %v7578_v24  ;;  %v7597_v38 = vadd.f32 -0.0029546, %v7595_v26  ;;  %v7632_v24 = vrot.slane %v10852_v37, %v6222_v58 }
0x20c8   : > { %v7599_v53 = vmul.f32 %v7597_v38, %v7577_v20  ;;  %v7602_v39 = vadd.f32 -0.016096033, %v7600_v30  ;;  %v9352_v38 = vld [vmem:[%s11146_s7] sm:$0xff] }
0x20ca   : > { %v7601_v47 = vadd.f32 -0.016096033, %v7599_v53  ;;  %v7604_v48 = vmul.f32 %v8610_v55, %v7602_v39  ;;  %v7753_v53 = vrot.slane %v9352_v38, %v10575_v16 }
0x20cc   : > { %v7603_v34 = vmul.f32 %v8609_v43, %v7601_v47 }
0x20cf   : > { %v9339_v12 = vpop.eup %9338 }
0x20d0   : > { %v7624_v51 = vmul.f32 %v9339_v12, %v7604_v48  ;;  %v7759_v12 = vrot.slane %v9352_v38, %v10785_v27 }
0x20d2   : > { %v9341_v59 = vpop.eup %9340  ;;  %v7626_v49 = vadd.f32 1.0, %v7624_v51 }
0x20d3   : > { %v7622_v1 = vmul.f32 %v9341_v59, %v7603_v34 }
0x20d4   : > { %v7628_v32 = vmul.f32 %v7626_v49, %v7570_v21 }
0x20d5   : > { %v7625_v50 = vadd.f32 1.0, %v7622_v1  ;;  %v7765_v1 = vrot.slane %v9352_v38, %v10788_v29 }
0x20d7   : > { %v7627_v45 = vmul.f32 %v7625_v50, %v7569_v54 }
0x20d9   : > { %9064 = vmatprep.mubr.f32.mxu1 %v7627_v45 }
0x20da   : > { %9065 = vmatmul.mubr.f32.vlgmr.msra.gmra.mxu1 %v7628_v32 }
0x219a   : > { %v9066_v20 = vpop.f32.mrf.mxu1 }
0x219b   : > { %v7705_v44 = vadd.f32 %v9066_v20, %v7632_v24 }
0x219c   : > { %v7699_v55 = vpop.f32.mrf.mxu1 }
0x219d   : > { %v7709_v57 = vadd.f32 %v7705_v44, %v11046_v63  ;;  %v7700_v43 = vadd.f32 %v7699_v55, %v7632_v24 }
0x219f   : > { %v7708_v7 = vadd.f32 %v7700_v43, %v11049_v41  ;;  %v7713_v36 = vsel %vm4871_vm1, %v7709_v57, 0.0  ;;  %v4174_v41 = vld [vmem:[%s11146_s7 + $0x40] sm:$0xff] }
0x21a0   : > { %7714 = vadd.xlane.f32.xlu1 %v7713_v36  ;;  %9067 = vmatprep.subr.mxu0 %v4174_v41 }
0x21a1   : > { %v7710_v4 = vsel %vm4869_vm0, %v7708_v7, 0.0  ;;  %9068 = vmatpush3.msra.mxu0 %v4174_v41 }
0x21a2   : > { %7711 = vadd.xlane.f32.xlu0 %v7710_v4  ;;  %9069 = vmatprep.subr.mxu0 %v4173_v35 }
0x21a3   : > { %9070 = vmatpush3.msra.mxu0 %v4173_v35 }
0x21a4   : > { %9071 = vmatprep.subr.mxu0 %v4172_v10 }
0x21a5   : > { %9072 = vmatpush3.msra.mxu0 %v4172_v10 }
0x21a6   : > { %9073 = vmatprep.subr.mxu0 %v4171_v22 }
0x21a7   : > { %9074 = vmatpush3.msra.mxu0 %v4171_v22 }
0x21a8   : > { %9075 = vmatprep.subr.mxu0 %v4170_v25 }
0x21a9   : > { %9076 = vmatpush3.msra.mxu0 %v4170_v25 }
0x21aa   : > { %9077 = vmatprep.subr.mxu0 %v4169_v6 }
0x21ab   : > { %9078 = vmatpush3.msra.mxu0 %v4169_v6 }
0x21ac   : > { %9079 = vmatprep.subr.mxu0 %v4168_v46 }
0x21ad   : > { %9080 = vmatpush3.msra.mxu0 %v4168_v46 }
0x21ae   : > { %9081 = vmatprep.subr.mxu0 %v4167_v56 }
0x21af   : > { %9082 = vmatpush3.msra.mxu0 %v4167_v56 }
0x2229   : > { %v7715_v3 = vpop.xlane.xlu1 %7714 }
0x222a   : > { %v7717_v19 = vmul.f32 0.015625, %v7715_v3 }
0x222b   : > { %v7712_v18 = vpop.xlane.xlu0 %7711 }
0x222c   : > { %v7719_v8 = vsub.f32 %v7709_v57, %v7717_v19  ;;  %v7716_v23 = vmul.f32 0.015625, %v7712_v18 }
0x222e   : > { %v7718_v58 = vsub.f32 %v7708_v7, %v7716_v23  ;;  %v7721_v37 = vmul.f32 %v7719_v8, %v7719_v8 }
0x2230   : > { %v7725_v5 = vsel %vm4871_vm1, %v7721_v37, 0.0  ;;  %v7720_v33 = vmul.f32 %v7718_v58, %v7718_v58 }
0x2231   : > { %7726 = vadd.xlane.f32.xlu1 %v7725_v5 }
0x2232   : > { %v7722_v63 = vsel %vm4869_vm0, %v7720_v33, 0.0 }
0x2233   : > { %7723 = vadd.xlane.f32.xlu0 %v7722_v63 }
0x22ba   : > { %v7727_v60 = vpop.xlane.xlu1 %7726 }
0x22bb   : > { %v7729_v31 = vmul.f32 0.015625, %v7727_v60 }
0x22bc   : > { %v7724_v2 = vpop.xlane.xlu0 %7723 }
0x22bd   : > { %v7731_v42 = vadd.f32 1e-06, %v7729_v31  ;;  %v7728_v11 = vmul.f32 0.015625, %v7724_v2 }
0x22bf   : > { %9342 = vrsqrt.f32 %v7731_v42  ;;  %v7730_v52 = vadd.f32 1e-06, %v7728_v11  ;;  %vm7741_vm1 = vcmp.eq.f32.partialorder %v7731_v42, inf  ;;  %v7744_v61 = vand.u32 2147483648, %v7731_v42 }
0x22c0   : > { %vm7743_vm11 = vcmp.eq.f32.partialorder %v7731_v42, 0.0 }
0x22c1   : > { %9344 = vrsqrt.f32 %v7730_v52  ;;  %vm7734_vm12 = vcmp.eq.f32.partialorder %v7730_v52, inf  ;;  %v7737_v28 = vand.u32 2147483648, %v7730_v52  ;;  %vm7736_vm13 = vcmp.eq.f32.partialorder %v7730_v52, 0.0 }
0x22cc   : > { %v9343_v9 = vpop.eup %9342 }
0x22cd   : > { %v7740_v15 = vmul.f32 %v9343_v9, %v7731_v42 }
0x22ce   : > { %v9345_v0 = vpop.eup %9344 }
0x22cf   : > { %v7742_v62 = vsel %vm7741_vm1, %v7731_v42, %v7740_v15  ;;  %v7733_v14 = vmul.f32 %v9345_v0, %v7730_v52 }
0x22d0   : > { %v7745_v13 = vsel %vm7743_vm11, %v7744_v61, %v7742_v62 }
0x22d1   : > { %9346 = vrcp.f32 %v7745_v13  ;;  %v7735_v17 = vsel %vm7734_vm12, %v7730_v52, %v7733_v14 }
0x22d2   : > { %v7738_v40 = vsel %vm7736_vm13, %v7737_v28, %v7735_v17 }
0x22d3   : > { %9348 = vrcp.f32 %v7738_v40 }
0x22de   : > { %v9347_v26 = vpop.eup %9346 }
0x22df   : > { %v7749_v30 = vmul.f32 %v9347_v26, %v7719_v8 }
0x22e0   : > { %v9349_v39 = vpop.eup %9348 }
0x22e1   : > { %v7747_v47 = vmul.f32 %v9349_v39, %v7718_v58  ;;  %v7755_v48 = vmul.f32 %v7753_v53, %v7749_v30 }
0x22e3   : > { %v7754_v51 = vmul.f32 %v7753_v53, %v7747_v47  ;;  %v7761_v59 = vadd.f32 %v7759_v12, %v7755_v48 }
0x22e5   : > { %v7760_v34 = vadd.f32 %v7759_v12, %v7754_v51 }
0x22e7   : > { %9083 = vmatprep.mubr.msk.f32.mxu0 %vm4869_vm0, %v7760_v34 }
0x22e8   : > { %9084 = vmatmul.mubr.msk.f32.vlgmr.msra.gmra.mxu0 %vm4869_vm0, %v7761_v59 }
0x23a8   : > { %v9085_v49 = vpop.f32.mrf.mxu0 }
0x23aa   : > { %v7838_v54 = vpop.f32.mrf.mxu0 }
0x23ab   : > { %v7839_v50 = vadd.f32 %v7838_v54, %v7765_v1 }
0x23ad   : > { %7847 = vst.msk [vmem:[#allocation10] sm:$0x1] %vm7846_vm14, %v7839_v50 }
0x23ae   : > { %7849 = vst.msk [vmem:[#allocation10 - $0x4] sm:$0x20] %vm7848_vm15, %v7839_v50 }
0x23af PF: > { %p9116_p9 = scmp.eq.s32.totalorder %s9582_s9, 2  ;;  %s9517_s24 = smov [#allocation10]  }
0x23b0   : > { %s7857_s26 = sshll.u32 %s9517_s24, 4  ;;  %s7858_s26 = int_to_ptr.vmem [resolvable:$true] %s7857_s26 }
0x23b1   : > { %s9433_s14 = scalar_lea.vmem %s7858_s26, 32  ;;  %p9440_p11 = scmp.lt.s32.totalorder %s7858_s26, %s7858_s26 }
0x23b2   : > { %p9434_p3 = scmp.ne.s32.totalorder %s7858_s26, %s9433_s14  ;;  %p9441_p12 = scmp.lt.s32.totalorder %s9433_s14, %s9433_s14 }
0x23b4   : > { %p9435_p7 = pnand %p9434_p3, %p9116_p9  ;;  %p9442_p0 = por %p9441_p12, %p9440_p11 }
0x23b6   : > { %p9436_p10 = pneg %p9435_p7 }
0x23b8   : > { %p9443_p4 = pnand %p9442_p0, %p9436_p10 }
0x23ba   : > { %9446 = shalt.err (!%p9443_p4)
}
0x23bb   : > { %9097 = dma.vmem_to_hbm [thread:$0]  (%p9116_p9), %s7858_s26, 32, %s11147_s8, [#allocation6]  }
0x23bc   : > { %9482 = dma.done.wait (%p9116_p9), [#allocation6], 32  }
0x23bd   : > { %9484 = vsyncadd (%p9116_p9), [#allocation6], 4294967264 }
0x23be PF: > { %s11160_s16 = smov %s9629_s27  ;;  %p20_p1 = scmp.ge.s32.totalorder %s9629_s27, 5  }
0x23bf   : > { %s11161_s27 = smov %s9491_s28  ;;  %s11162_s28 = smov %s9495_s29 }
0x23c0   : > { %s11163_s29 = smov %s9638_s15  ;;  %s11164_s30 = smov %s11160_s16 }
0x23c1   :  { %22 = sbr.rel (!%p20_p1) target bundleno = 5 (0x5), region = 110 }
0x23c6   :  { %7870 = vsyncpa [#allocation5], 1 }
0x23c7   :  { %7872 = vsyncpa [#allocation5 + $0x1], 1 }
0x23c8   :  { %7873 = vsyncpa [#allocation8], 1 }
0x23c9   :  { %7874 = vsyncpa [#allocation6], 1 }
0x23ca   :  { %7876 = vsyncpa [#allocation6 + $0x1], 1 }

</bundles_post_ra>
